<compile_context>
chip_gen: v6e
topology: v6e:2x2x1
jax: 0.10.0
libtpu: 0.0.40
codegen_flags: <defaults>
</compile_context>

<pallas_src>
import functools
import math

import jax
import jax.numpy as jnp
from jax.experimental import pallas as pl
from jax.experimental.pallas import tpu as pltpu

_LANE = 128
_SUBLANE = 8


def _round_up(n, m):
    return ((n + m - 1) // m) * m


def _pad2(a, shape):
    return jnp.pad(a, [(0, s - d) for d, s in zip(a.shape, shape)])


# ---------------------------------------------------------------------------
# Fused kernel
# ---------------------------------------------------------------------------
def _gru_fused_kernel(*refs, num_layers):
    """refs = (x_flat, [w_i, w_h, b] * num_layers, w_fc, b_fc, out, seq_buf).

    x_flat : (T*Bp, F)     time-major, batch padded to a multiple of 8
    w_i    : (3, Din, Hp)  per-gate input weights, gate order [r, z, n]
    w_h    : (3, Hp, Hp)   per-gate hidden weights
    b      : (4, 1, Hp)    [b_ir+b_hr, b_iz+b_hz, b_in, b_hn]
    w_fc   : (Hp, OUT),  b_fc: (1, OUT)
    out    : (Bp, OUT)
    seq_buf: (T*Bp, Hp)    VMEM scratch for the inter-layer sequence
    """
    x_ref = refs[0]
    w_fc_ref = refs[1 + 3 * num_layers]
    b_fc_ref = refs[2 + 3 * num_layers]
    o_ref = refs[3 + 3 * num_layers]
    seq_buf = refs[4 + 3 * num_layers]

    b_pad = o_ref.shape[0]
    t_len = x_ref.shape[0] // b_pad

    flat_in = x_ref[...]                               # (T*Bp, Din)
    h = None
    for layer in range(num_layers):
        w_i_ref = refs[1 + 3 * layer]
        w_h_ref = refs[2 + 3 * layer]
        b_ref = refs[3 + 3 * layer]
        h_pad = w_h_ref.shape[-1]

        if layer > 0:
            flat_in = seq_buf[...]                     # (T*Bp, Hp)

        # Hoisted input projection: whole-sequence matmul per gate (off the
        # serial critical path), with pre-summed r/z biases folded in.
        gi_r = jnp.dot(flat_in, w_i_ref[0], preferred_element_type=jnp.float32) + b_ref[0]
        gi_z = jnp.dot(flat_in, w_i_ref[1], preferred_element_type=jnp.float32) + b_ref[1]
        gi_n = jnp.dot(flat_in, w_i_ref[2], preferred_element_type=jnp.float32) + b_ref[2]

        w_hr = w_h_ref[0]
        w_hz = w_h_ref[1]
        w_hn = w_h_ref[2]
        b_hn = b_ref[3]

        last_layer = layer == num_layers - 1
        h = jnp.zeros((b_pad, h_pad), jnp.float32)
        for t in range(t_len):                         # static T -> fully unrolled recurrence
            row = t * b_pad
            gh_r = jnp.dot(h, w_hr, preferred_element_type=jnp.float32)
            gh_z = jnp.dot(h, w_hz, preferred_element_type=jnp.float32)
            gh_n = jnp.dot(h, w_hn, preferred_element_type=jnp.float32) + b_hn
            r = jax.nn.sigmoid(gi_r[row:row + b_pad] + gh_r)
            z = jax.nn.sigmoid(gi_z[row:row + b_pad] + gh_z)
            n = jnp.tanh(gi_n[row:row + b_pad] + r * gh_n)
            h = (1.0 - z) * n + z * h
            if not last_layer:
                seq_buf[row:row + b_pad, :] = h        # sublane/lane-aligned VMEM store

    # FC head fused on the final hidden state only.
    o_ref[...] = jnp.dot(h, w_fc_ref[...], preferred_element_type=jnp.float32) + b_fc_ref[...]


# ---------------------------------------------------------------------------
# Wrapper
# ---------------------------------------------------------------------------
@functools.partial(jax.jit, static_argnames=("output_len", "num_flow"))
def gru_forward(x, params, *, output_len, num_flow):
    """x: (B, T, num_flow) batch_first, like the PyTorch module."""
    B, T, F = x.shape
    b_pad = _round_up(B, _SUBLANE)
    h_pad = params["w_fc"].shape[0]
    out_f = params["w_fc"].shape[1]
    num_layers = len(params["layers"])

    # Layout plumbing only: time-major, batch padded to 8 sublanes, flattened.
    x_t = jnp.transpose(x.astype(jnp.float32), (1, 0, 2))        # (T, B, F)
    if b_pad != B:
        x_t = jnp.pad(x_t, ((0, 0), (0, b_pad - B), (0, 0)))
    x_flat = x_t.reshape(T * b_pad, F)

    layer_args = []
    for lp in params["layers"]:
        layer_args.extend((lp["w_i"], lp["w_h"], lp["b"]))

    out = pl.pallas_call(
        functools.partial(_gru_fused_kernel, num_layers=num_layers),
        out_shape=jax.ShapeDtypeStruct((b_pad, out_f), jnp.float32),
        scratch_shapes=[pltpu.VMEM((T * b_pad, h_pad), jnp.float32)],
    )(x_flat, *layer_args, params["w_fc"], params["b_fc"])

    return out[:B].reshape(B, output_len, num_flow)


# ---------------------------------------------------------------------------
# Parameters (PyTorch-shaped raw weights + kernel-layout packing)
# ---------------------------------------------------------------------------
def init_raw_params(key, num_flow, hidden, num_layers, output_len):
    """PyTorch-shaped weights, uniform(-1/sqrt(H), 1/sqrt(H))."""
    raw = {"layers": []}
    bound = 1.0 / math.sqrt(hidden)
    for layer in range(num_layers):
        d_in = num_flow if layer == 0 else hidden
        key, k1, k2, k3, k4 = jax.random.split(key, 5)
        raw["layers"].append({
            "w_ih": jax.random.uniform(k1, (3 * hidden, d_in), jnp.float32, -bound, bound),
            "w_hh": jax.random.uniform(k2, (3 * hidden, hidden), jnp.float32, -bound, bound),
            "b_ih": jax.random.uniform(k3, (3 * hidden,), jnp.float32, -bound, bound),
            "b_hh": jax.random.uniform(k4, (3 * hidden,), jnp.float32, -bound, bound),
        })
    out_f = num_flow * output_len
    key, k5, k6 = jax.random.split(key, 3)
    raw["w_fc"] = jax.random.uniform(k5, (out_f, hidden), jnp.float32, -bound, bound)
    raw["b_fc"] = jax.random.uniform(k6, (out_f,), jnp.float32, -bound, bound)
    return raw


def pack_params(raw, num_flow, hidden):
    """Repack raw PyTorch weights into lane-dense per-gate panels for the kernel."""
    h_pad = _round_up(hidden, _LANE)
    packed = {"layers": []}
    for idx, lp in enumerate(raw["layers"]):
        d_in = num_flow if idx == 0 else hidden
        d_in_pad = d_in if idx == 0 else h_pad
        gates_i, gates_h = [], []
        for g in range(3):                             # gate order [r, z, n]
            wi = lp["w_ih"][g * hidden:(g + 1) * hidden, :].T     # (d_in, H)
            wh = lp["w_hh"][g * hidden:(g + 1) * hidden, :].T     # (H, H)
            gates_i.append(_pad2(wi, (d_in_pad, h_pad)))
            gates_h.append(_pad2(wh, (h_pad, h_pad)))
        w_i = jnp.stack(gates_i, axis=0)               # (3, Din, Hp)
        w_h = jnp.stack(gates_h, axis=0)               # (3, Hp, Hp)
        b_r = lp["b_ih"][0:hidden] + lp["b_hh"][0:hidden]
        b_z = lp["b_ih"][hidden:2 * hidden] + lp["b_hh"][hidden:2 * hidden]
        b_in = lp["b_ih"][2 * hidden:3 * hidden]
        b_hn = lp["b_hh"][2 * hidden:3 * hidden]
        b = jnp.stack([_pad2(v, (h_pad,)) for v in (b_r, b_z, b_in, b_hn)], axis=0)
        packed["layers"].append({"w_i": w_i, "w_h": w_h, "b": b.reshape(4, 1, h_pad)})
    out_f = raw["w_fc"].shape[0]
    packed["w_fc"] = _pad2(raw["w_fc"].T, (h_pad, out_f))         # (Hp, OUT)
    packed["b_fc"] = raw["b_fc"].reshape(1, out_f)
    return packed


# ---------------------------------------------------------------------------
# Pure-JAX reference (mirrors PyTorch nn.GRU) for a correctness check
# ---------------------------------------------------------------------------
def gru_reference(x, raw, output_len, num_flow):
    B, T, _ = x.shape
    seq = x.astype(jnp.float32)
    for lp in raw["layers"]:
        H = lp["w_hh"].shape[1]
        h = jnp.zeros((B, H), jnp.float32)
        outs = []
        for t in range(T):
            gi = seq[:, t] @ lp["w_ih"].T + lp["b_ih"]
            gh = h @ lp["w_hh"].T + lp["b_hh"]
            r = jax.nn.sigmoid(gi[:, 0:H] + gh[:, 0:H])
            z = jax.nn.sigmoid(gi[:, H:2 * H] + gh[:, H:2 * H])
            n = jnp.tanh(gi[:, 2 * H:3 * H] + r * gh[:, 2 * H:3 * H])
            h = (1.0 - z) * n + z * h
            outs.append(h)
        seq = jnp.stack(outs, axis=1)
    out = seq[:, -1] @ raw["w_fc"].T + raw["b_fc"]
    return out.reshape(B, output_len, num_flow)


if __name__ == "__main__":
    # Small, module-consistent shapes.
    num_flow = 8       # args.num_mon_flow (= in_dim)
    hidden = 32        # args.hidden
    num_layers = 2     # args.layers
    output_len = 4     # args.output_len
    batch = 2
    seq = 8

    key = jax.random.PRNGKey(0)
    key, kx = jax.random.split(key)
    x = jax.random.normal(kx, (batch, seq, num_flow), jnp.float32)

    raw = init_raw_params(key, num_flow, hidden, num_layers, output_len)
    params = pack_params(raw, num_flow, hidden)

    y = gru_forward(x, params, output_len=output_len, num_flow=num_flow)
    jax.block_until_ready(y)

    assert y.shape == (batch, output_len, num_flow), y.shape
    assert jnp.all(jnp.isfinite(y)), "non-finite output"

    y_ref = gru_reference(x, raw, output_len, num_flow)
    assert jnp.allclose(y, y_ref, atol=2e-4, rtol=2e-4), (
        float(jnp.max(jnp.abs(y - y_ref))))

    print("KERNEL_OK")
</pallas_src>

<mosaic_0001>
module attributes {stable_mosaic.version = 11 : i64} {
  func.func @_gru_fused_kernel(%arg0: memref<64x8xf32, #tpu.memory_space<vmem>>, %arg1: memref<3x8x128xf32, #tpu.memory_space<vmem>>, %arg2: memref<3x128x128xf32, #tpu.memory_space<vmem>>, %arg3: memref<4x1x128xf32, #tpu.memory_space<vmem>>, %arg4: memref<3x128x128xf32, #tpu.memory_space<vmem>>, %arg5: memref<3x128x128xf32, #tpu.memory_space<vmem>>, %arg6: memref<4x1x128xf32, #tpu.memory_space<vmem>>, %arg7: memref<128x32xf32, #tpu.memory_space<vmem>>, %arg8: memref<1x32xf32, #tpu.memory_space<vmem>>, %arg9: memref<8x32xf32, #tpu.memory_space<vmem>>, %arg10: memref<64x128xf32, #tpu.memory_space<vmem>>) attributes {dimension_semantics = [], scalar_prefetch = 0 : i64, scratch_operands = 1 : i64, tpu.core_type = #tpu.core_type<tc>} {
    %c0 = arith.constant 0 : index
    %c0_0 = arith.constant 0 : index
    %0 = vector.load %arg0[%c0, %c0_0] : memref<64x8xf32, #tpu.memory_space<vmem>>, vector<64x8xf32>
    %c0_1 = arith.constant 0 : index
    %c0_2 = arith.constant 0 : index
    %c0_3 = arith.constant 0 : index
    %1 = vector.load %arg1[%c0_1, %c0_2, %c0_3] : memref<3x8x128xf32, #tpu.memory_space<vmem>>, vector<1x8x128xf32>
    %2 = vector.shape_cast %1 : vector<1x8x128xf32> to vector<8x128xf32>
    %cst = arith.constant dense<0.000000e+00> : vector<64x128xf32>
    %3 = tpu.matmul %0, %2, %cst {dimension_numbers = #tpu.dot_dimension_numbers<[1], [0], [0], [1], [0, 0, 1, 1], [], []>} : vector<64x8xf32>, vector<8x128xf32>, vector<64x128xf32> -> vector<64x128xf32>
    %c0_4 = arith.constant 0 : index
    %c0_5 = arith.constant 0 : index
    %c0_6 = arith.constant 0 : index
    %4 = vector.load %arg3[%c0_4, %c0_5, %c0_6] : memref<4x1x128xf32, #tpu.memory_space<vmem>>, vector<1x1x128xf32>
    %5 = vector.shape_cast %4 : vector<1x1x128xf32> to vector<1x128xf32>
    %6 = vector.broadcast %5 : vector<1x128xf32> to vector<64x128xf32>
    %7 = arith.addf %3, %6 : vector<64x128xf32>
    %c1 = arith.constant 1 : index
    %c0_7 = arith.constant 0 : index
    %c0_8 = arith.constant 0 : index
    %8 = vector.load %arg1[%c1, %c0_7, %c0_8] : memref<3x8x128xf32, #tpu.memory_space<vmem>>, vector<1x8x128xf32>
    %9 = vector.shape_cast %8 : vector<1x8x128xf32> to vector<8x128xf32>
    %cst_9 = arith.constant dense<0.000000e+00> : vector<64x128xf32>
    %10 = tpu.matmul %0, %9, %cst_9 {dimension_numbers = #tpu.dot_dimension_numbers<[1], [0], [0], [1], [0, 0, 1, 1], [], []>} : vector<64x8xf32>, vector<8x128xf32>, vector<64x128xf32> -> vector<64x128xf32>
    %c1_10 = arith.constant 1 : index
    %c0_11 = arith.constant 0 : index
    %c0_12 = arith.constant 0 : index
    %11 = vector.load %arg3[%c1_10, %c0_11, %c0_12] : memref<4x1x128xf32, #tpu.memory_space<vmem>>, vector<1x1x128xf32>
    %12 = vector.shape_cast %11 : vector<1x1x128xf32> to vector<1x128xf32>
    %13 = vector.broadcast %12 : vector<1x128xf32> to vector<64x128xf32>
    %14 = arith.addf %10, %13 : vector<64x128xf32>
    %c2 = arith.constant 2 : index
    %c0_13 = arith.constant 0 : index
    %c0_14 = arith.constant 0 : index
    %15 = vector.load %arg1[%c2, %c0_13, %c0_14] : memref<3x8x128xf32, #tpu.memory_space<vmem>>, vector<1x8x128xf32>
    %16 = vector.shape_cast %15 : vector<1x8x128xf32> to vector<8x128xf32>
    %cst_15 = arith.constant dense<0.000000e+00> : vector<64x128xf32>
    %17 = tpu.matmul %0, %16, %cst_15 {dimension_numbers = #tpu.dot_dimension_numbers<[1], [0], [0], [1], [0, 0, 1, 1], [], []>} : vector<64x8xf32>, vector<8x128xf32>, vector<64x128xf32> -> vector<64x128xf32>
    %c2_16 = arith.constant 2 : index
    %c0_17 = arith.constant 0 : index
    %c0_18 = arith.constant 0 : index
    %18 = vector.load %arg3[%c2_16, %c0_17, %c0_18] : memref<4x1x128xf32, #tpu.memory_space<vmem>>, vector<1x1x128xf32>
    %19 = vector.shape_cast %18 : vector<1x1x128xf32> to vector<1x128xf32>
    %20 = vector.broadcast %19 : vector<1x128xf32> to vector<64x128xf32>
    %21 = arith.addf %17, %20 : vector<64x128xf32>
    %c0_19 = arith.constant 0 : index
    %c0_20 = arith.constant 0 : index
    %c0_21 = arith.constant 0 : index
    %22 = vector.load %arg2[%c0_19, %c0_20, %c0_21] : memref<3x128x128xf32, #tpu.memory_space<vmem>>, vector<1x128x128xf32>
    %23 = vector.shape_cast %22 : vector<1x128x128xf32> to vector<128x128xf32>
    %c1_22 = arith.constant 1 : index
    %c0_23 = arith.constant 0 : index
    %c0_24 = arith.constant 0 : index
    %24 = vector.load %arg2[%c1_22, %c0_23, %c0_24] : memref<3x128x128xf32, #tpu.memory_space<vmem>>, vector<1x128x128xf32>
    %25 = vector.shape_cast %24 : vector<1x128x128xf32> to vector<128x128xf32>
    %c2_25 = arith.constant 2 : index
    %c0_26 = arith.constant 0 : index
    %c0_27 = arith.constant 0 : index
    %26 = vector.load %arg2[%c2_25, %c0_26, %c0_27] : memref<3x128x128xf32, #tpu.memory_space<vmem>>, vector<1x128x128xf32>
    %27 = vector.shape_cast %26 : vector<1x128x128xf32> to vector<128x128xf32>
    %c3 = arith.constant 3 : index
    %c0_28 = arith.constant 0 : index
    %c0_29 = arith.constant 0 : index
    %28 = vector.load %arg3[%c3, %c0_28, %c0_29] : memref<4x1x128xf32, #tpu.memory_space<vmem>>, vector<1x1x128xf32>
    %29 = vector.shape_cast %28 : vector<1x1x128xf32> to vector<1x128xf32>
    %cst_30 = arith.constant 0.000000e+00 : f32
    %30 = vector.broadcast %cst_30 : f32 to vector<8x128xf32>
    %cst_31 = arith.constant dense<0.000000e+00> : vector<8x128xf32>
    %31 = tpu.matmul %30, %23, %cst_31 {dimension_numbers = #tpu.dot_dimension_numbers<[1], [0], [0], [1], [0, 0, 1, 1], [], []>} : vector<8x128xf32>, vector<128x128xf32>, vector<8x128xf32> -> vector<8x128xf32>
    %cst_32 = arith.constant dense<0.000000e+00> : vector<8x128xf32>
    %32 = tpu.matmul %30, %25, %cst_32 {dimension_numbers = #tpu.dot_dimension_numbers<[1], [0], [0], [1], [0, 0, 1, 1], [], []>} : vector<8x128xf32>, vector<128x128xf32>, vector<8x128xf32> -> vector<8x128xf32>
    %cst_33 = arith.constant dense<0.000000e+00> : vector<8x128xf32>
    %33 = tpu.matmul %30, %27, %cst_33 {dimension_numbers = #tpu.dot_dimension_numbers<[1], [0], [0], [1], [0, 0, 1, 1], [], []>} : vector<8x128xf32>, vector<128x128xf32>, vector<8x128xf32> -> vector<8x128xf32>
    %34 = vector.broadcast %29 : vector<1x128xf32> to vector<8x128xf32>
    %35 = arith.addf %33, %34 : vector<8x128xf32>
    %36 = vector.extract_strided_slice %7 {offsets = [0, 0], sizes = [8, 128], strides = [1, 1]} : vector<64x128xf32> to vector<8x128xf32>
    %37 = arith.addf %36, %31 : vector<8x128xf32>
    %38 = arith.negf %37 : vector<8x128xf32>
    %39 = math.exp %38 : vector<8x128xf32>
    %cst_34 = arith.constant 1.000000e+00 : f32
    %40 = vector.broadcast %cst_34 : f32 to vector<8x128xf32>
    %41 = arith.addf %40, %39 : vector<8x128xf32>
    %42 = arith.divf %40, %41 : vector<8x128xf32>
    %43 = vector.extract_strided_slice %14 {offsets = [0, 0], sizes = [8, 128], strides = [1, 1]} : vector<64x128xf32> to vector<8x128xf32>
    %44 = arith.addf %43, %32 : vector<8x128xf32>
    %45 = arith.negf %44 : vector<8x128xf32>
    %46 = math.exp %45 : vector<8x128xf32>
    %cst_35 = arith.constant 1.000000e+00 : f32
    %47 = vector.broadcast %cst_35 : f32 to vector<8x128xf32>
    %48 = arith.addf %47, %46 : vector<8x128xf32>
    %49 = arith.divf %47, %48 : vector<8x128xf32>
    %50 = vector.extract_strided_slice %21 {offsets = [0, 0], sizes = [8, 128], strides = [1, 1]} : vector<64x128xf32> to vector<8x128xf32>
    %51 = arith.mulf %42, %35 : vector<8x128xf32>
    %52 = arith.addf %50, %51 : vector<8x128xf32>
    %53 = math.tanh %52 : vector<8x128xf32>
    %cst_36 = arith.constant 1.000000e+00 : f32
    %54 = vector.broadcast %cst_36 : f32 to vector<8x128xf32>
    %55 = arith.subf %54, %49 : vector<8x128xf32>
    %56 = arith.mulf %55, %53 : vector<8x128xf32>
    %57 = arith.mulf %49, %30 : vector<8x128xf32>
    %58 = arith.addf %56, %57 : vector<8x128xf32>
    %c0_37 = arith.constant 0 : index
    %c0_38 = arith.constant 0 : index
    %59 = vector.load %arg10[%c0_37, %c0_38] : memref<64x128xf32, #tpu.memory_space<vmem>>, vector<8x128xf32>
    tpu.vector_store %arg10[%c0_37, %c0_38], %58 {strides = array<i32>} : memref<64x128xf32, #tpu.memory_space<vmem>>, vector<8x128xf32>,
    %cst_39 = arith.constant dense<0.000000e+00> : vector<8x128xf32>
    %60 = tpu.matmul %58, %23, %cst_39 {dimension_numbers = #tpu.dot_dimension_numbers<[1], [0], [0], [1], [0, 0, 1, 1], [], []>} : vector<8x128xf32>, vector<128x128xf32>, vector<8x128xf32> -> vector<8x128xf32>
    %cst_40 = arith.constant dense<0.000000e+00> : vector<8x128xf32>
    %61 = tpu.matmul %58, %25, %cst_40 {dimension_numbers = #tpu.dot_dimension_numbers<[1], [0], [0], [1], [0, 0, 1, 1], [], []>} : vector<8x128xf32>, vector<128x128xf32>, vector<8x128xf32> -> vector<8x128xf32>
    %cst_41 = arith.constant dense<0.000000e+00> : vector<8x128xf32>
    %62 = tpu.matmul %58, %27, %cst_41 {dimension_numbers = #tpu.dot_dimension_numbers<[1], [0], [0], [1], [0, 0, 1, 1], [], []>} : vector<8x128xf32>, vector<128x128xf32>, vector<8x128xf32> -> vector<8x128xf32>
    %63 = vector.broadcast %29 : vector<1x128xf32> to vector<8x128xf32>
    %64 = arith.addf %62, %63 : vector<8x128xf32>
    %65 = vector.extract_strided_slice %7 {offsets = [8, 0], sizes = [8, 128], strides = [1, 1]} : vector<64x128xf32> to vector<8x128xf32>
    %66 = arith.addf %65, %60 : vector<8x128xf32>
    %67 = arith.negf %66 : vector<8x128xf32>
    %68 = math.exp %67 : vector<8x128xf32>
    %cst_42 = arith.constant 1.000000e+00 : f32
    %69 = vector.broadcast %cst_42 : f32 to vector<8x128xf32>
    %70 = arith.addf %69, %68 : vector<8x128xf32>
    %71 = arith.divf %69, %70 : vector<8x128xf32>
    %72 = vector.extract_strided_slice %14 {offsets = [8, 0], sizes = [8, 128], strides = [1, 1]} : vector<64x128xf32> to vector<8x128xf32>
    %73 = arith.addf %72, %61 : vector<8x128xf32>
    %74 = arith.negf %73 : vector<8x128xf32>
    %75 = math.exp %74 : vector<8x128xf32>
    %cst_43 = arith.constant 1.000000e+00 : f32
    %76 = vector.broadcast %cst_43 : f32 to vector<8x128xf32>
    %77 = arith.addf %76, %75 : vector<8x128xf32>
    %78 = arith.divf %76, %77 : vector<8x128xf32>
    %79 = vector.extract_strided_slice %21 {offsets = [8, 0], sizes = [8, 128], strides = [1, 1]} : vector<64x128xf32> to vector<8x128xf32>
    %80 = arith.mulf %71, %64 : vector<8x128xf32>
    %81 = arith.addf %79, %80 : vector<8x128xf32>
    %82 = math.tanh %81 : vector<8x128xf32>
    %cst_44 = arith.constant 1.000000e+00 : f32
    %83 = vector.broadcast %cst_44 : f32 to vector<8x128xf32>
    %84 = arith.subf %83, %78 : vector<8x128xf32>
    %85 = arith.mulf %84, %82 : vector<8x128xf32>
    %86 = arith.mulf %78, %58 : vector<8x128xf32>
    %87 = arith.addf %85, %86 : vector<8x128xf32>
    %c8 = arith.constant 8 : index
    %c0_45 = arith.constant 0 : index
    %88 = vector.load %arg10[%c8, %c0_45] : memref<64x128xf32, #tpu.memory_space<vmem>>, vector<8x128xf32>
    tpu.vector_store %arg10[%c8, %c0_45], %87 {strides = array<i32>} : memref<64x128xf32, #tpu.memory_space<vmem>>, vector<8x128xf32>,
    %cst_46 = arith.constant dense<0.000000e+00> : vector<8x128xf32>
    %89 = tpu.matmul %87, %23, %cst_46 {dimension_numbers = #tpu.dot_dimension_numbers<[1], [0], [0], [1], [0, 0, 1, 1], [], []>} : vector<8x128xf32>, vector<128x128xf32>, vector<8x128xf32> -> vector<8x128xf32>
    %cst_47 = arith.constant dense<0.000000e+00> : vector<8x128xf32>
    %90 = tpu.matmul %87, %25, %cst_47 {dimension_numbers = #tpu.dot_dimension_numbers<[1], [0], [0], [1], [0, 0, 1, 1], [], []>} : vector<8x128xf32>, vector<128x128xf32>, vector<8x128xf32> -> vector<8x128xf32>
    %cst_48 = arith.constant dense<0.000000e+00> : vector<8x128xf32>
    %91 = tpu.matmul %87, %27, %cst_48 {dimension_numbers = #tpu.dot_dimension_numbers<[1], [0], [0], [1], [0, 0, 1, 1], [], []>} : vector<8x128xf32>, vector<128x128xf32>, vector<8x128xf32> -> vector<8x128xf32>
    %92 = vector.broadcast %29 : vector<1x128xf32> to vector<8x128xf32>
    %93 = arith.addf %91, %92 : vector<8x128xf32>
    %94 = vector.extract_strided_slice %7 {offsets = [16, 0], sizes = [8, 128], strides = [1, 1]} : vector<64x128xf32> to vector<8x128xf32>
    %95 = arith.addf %94, %89 : vector<8x128xf32>
    %96 = arith.negf %95 : vector<8x128xf32>
    %97 = math.exp %96 : vector<8x128xf32>
    %cst_49 = arith.constant 1.000000e+00 : f32
    %98 = vector.broadcast %cst_49 : f32 to vector<8x128xf32>
    %99 = arith.addf %98, %97 : vector<8x128xf32>
    %100 = arith.divf %98, %99 : vector<8x128xf32>
    %101 = vector.extract_strided_slice %14 {offsets = [16, 0], sizes = [8, 128], strides = [1, 1]} : vector<64x128xf32> to vector<8x128xf32>
    %102 = arith.addf %101, %90 : vector<8x128xf32>
    %103 = arith.negf %102 : vector<8x128xf32>
    %104 = math.exp %103 : vector<8x128xf32>
    %cst_50 = arith.constant 1.000000e+00 : f32
    %105 = vector.broadcast %cst_50 : f32 to vector<8x128xf32>
    %106 = arith.addf %105, %104 : vector<8x128xf32>
    %107 = arith.divf %105, %106 : vector<8x128xf32>
    %108 = vector.extract_strided_slice %21 {offsets = [16, 0], sizes = [8, 128], strides = [1, 1]} : vector<64x128xf32> to vector<8x128xf32>
    %109 = arith.mulf %100, %93 : vector<8x128xf32>
    %110 = arith.addf %108, %109 : vector<8x128xf32>
    %111 = math.tanh %110 : vector<8x128xf32>
    %cst_51 = arith.constant 1.000000e+00 : f32
    %112 = vector.broadcast %cst_51 : f32 to vector<8x128xf32>
    %113 = arith.subf %112, %107 : vector<8x128xf32>
    %114 = arith.mulf %113, %111 : vector<8x128xf32>
    %115 = arith.mulf %107, %87 : vector<8x128xf32>
    %116 = arith.addf %114, %115 : vector<8x128xf32>
    %c16 = arith.constant 16 : index
    %c0_52 = arith.constant 0 : index
    %117 = vector.load %arg10[%c16, %c0_52] : memref<64x128xf32, #tpu.memory_space<vmem>>, vector<8x128xf32>
    tpu.vector_store %arg10[%c16, %c0_52], %116 {strides = array<i32>} : memref<64x128xf32, #tpu.memory_space<vmem>>, vector<8x128xf32>,
    %cst_53 = arith.constant dense<0.000000e+00> : vector<8x128xf32>
    %118 = tpu.matmul %116, %23, %cst_53 {dimension_numbers = #tpu.dot_dimension_numbers<[1], [0], [0], [1], [0, 0, 1, 1], [], []>} : vector<8x128xf32>, vector<128x128xf32>, vector<8x128xf32> -> vector<8x128xf32>
    %cst_54 = arith.constant dense<0.000000e+00> : vector<8x128xf32>
    %119 = tpu.matmul %116, %25, %cst_54 {dimension_numbers = #tpu.dot_dimension_numbers<[1], [0], [0], [1], [0, 0, 1, 1], [], []>} : vector<8x128xf32>, vector<128x128xf32>, vector<8x128xf32> -> vector<8x128xf32>
    %cst_55 = arith.constant dense<0.000000e+00> : vector<8x128xf32>
    %120 = tpu.matmul %116, %27, %cst_55 {dimension_numbers = #tpu.dot_dimension_numbers<[1], [0], [0], [1], [0, 0, 1, 1], [], []>} : vector<8x128xf32>, vector<128x128xf32>, vector<8x128xf32> -> vector<8x128xf32>
    %121 = vector.broadcast %29 : vector<1x128xf32> to vector<8x128xf32>
    %122 = arith.addf %120, %121 : vector<8x128xf32>
    %123 = vector.extract_strided_slice %7 {offsets = [24, 0], sizes = [8, 128], strides = [1, 1]} : vector<64x128xf32> to vector<8x128xf32>
    %124 = arith.addf %123, %118 : vector<8x128xf32>
    %125 = arith.negf %124 : vector<8x128xf32>
    %126 = math.exp %125 : vector<8x128xf32>
    %cst_56 = arith.constant 1.000000e+00 : f32
    %127 = vector.broadcast %cst_56 : f32 to vector<8x128xf32>
    %128 = arith.addf %127, %126 : vector<8x128xf32>
    %129 = arith.divf %127, %128 : vector<8x128xf32>
    %130 = vector.extract_strided_slice %14 {offsets = [24, 0], sizes = [8, 128], strides = [1, 1]} : vector<64x128xf32> to vector<8x128xf32>
    %131 = arith.addf %130, %119 : vector<8x128xf32>
    %132 = arith.negf %131 : vector<8x128xf32>
    %133 = math.exp %132 : vector<8x128xf32>
    %cst_57 = arith.constant 1.000000e+00 : f32
    %134 = vector.broadcast %cst_57 : f32 to vector<8x128xf32>
    %135 = arith.addf %134, %133 : vector<8x128xf32>
    %136 = arith.divf %134, %135 : vector<8x128xf32>
    %137 = vector.extract_strided_slice %21 {offsets = [24, 0], sizes = [8, 128], strides = [1, 1]} : vector<64x128xf32> to vector<8x128xf32>
    %138 = arith.mulf %129, %122 : vector<8x128xf32>
    %139 = arith.addf %137, %138 : vector<8x128xf32>
    %140 = math.tanh %139 : vector<8x128xf32>
    %cst_58 = arith.constant 1.000000e+00 : f32
    %141 = vector.broadcast %cst_58 : f32 to vector<8x128xf32>
    %142 = arith.subf %141, %136 : vector<8x128xf32>
    %143 = arith.mulf %142, %140 : vector<8x128xf32>
    %144 = arith.mulf %136, %116 : vector<8x128xf32>
    %145 = arith.addf %143, %144 : vector<8x128xf32>
    %c24 = arith.constant 24 : index
    %c0_59 = arith.constant 0 : index
    %146 = vector.load %arg10[%c24, %c0_59] : memref<64x128xf32, #tpu.memory_space<vmem>>, vector<8x128xf32>
    tpu.vector_store %arg10[%c24, %c0_59], %145 {strides = array<i32>} : memref<64x128xf32, #tpu.memory_space<vmem>>, vector<8x128xf32>,
    %cst_60 = arith.constant dense<0.000000e+00> : vector<8x128xf32>
    %147 = tpu.matmul %145, %23, %cst_60 {dimension_numbers = #tpu.dot_dimension_numbers<[1], [0], [0], [1], [0, 0, 1, 1], [], []>} : vector<8x128xf32>, vector<128x128xf32>, vector<8x128xf32> -> vector<8x128xf32>
    %cst_61 = arith.constant dense<0.000000e+00> : vector<8x128xf32>
    %148 = tpu.matmul %145, %25, %cst_61 {dimension_numbers = #tpu.dot_dimension_numbers<[1], [0], [0], [1], [0, 0, 1, 1], [], []>} : vector<8x128xf32>, vector<128x128xf32>, vector<8x128xf32> -> vector<8x128xf32>
    %cst_62 = arith.constant dense<0.000000e+00> : vector<8x128xf32>
    %149 = tpu.matmul %145, %27, %cst_62 {dimension_numbers = #tpu.dot_dimension_numbers<[1], [0], [0], [1], [0, 0, 1, 1], [], []>} : vector<8x128xf32>, vector<128x128xf32>, vector<8x128xf32> -> vector<8x128xf32>
    %150 = vector.broadcast %29 : vector<1x128xf32> to vector<8x128xf32>
    %151 = arith.addf %149, %150 : vector<8x128xf32>
    %152 = vector.extract_strided_slice %7 {offsets = [32, 0], sizes = [8, 128], strides = [1, 1]} : vector<64x128xf32> to vector<8x128xf32>
    %153 = arith.addf %152, %147 : vector<8x128xf32>
    %154 = arith.negf %153 : vector<8x128xf32>
    %155 = math.exp %154 : vector<8x128xf32>
    %cst_63 = arith.constant 1.000000e+00 : f32
    %156 = vector.broadcast %cst_63 : f32 to vector<8x128xf32>
    %157 = arith.addf %156, %155 : vector<8x128xf32>
    %158 = arith.divf %156, %157 : vector<8x128xf32>
    %159 = vector.extract_strided_slice %14 {offsets = [32, 0], sizes = [8, 128], strides = [1, 1]} : vector<64x128xf32> to vector<8x128xf32>
    %160 = arith.addf %159, %148 : vector<8x128xf32>
    %161 = arith.negf %160 : vector<8x128xf32>
    %162 = math.exp %161 : vector<8x128xf32>
    %cst_64 = arith.constant 1.000000e+00 : f32
    %163 = vector.broadcast %cst_64 : f32 to vector<8x128xf32>
    %164 = arith.addf %163, %162 : vector<8x128xf32>
    %165 = arith.divf %163, %164 : vector<8x128xf32>
    %166 = vector.extract_strided_slice %21 {offsets = [32, 0], sizes = [8, 128], strides = [1, 1]} : vector<64x128xf32> to vector<8x128xf32>
    %167 = arith.mulf %158, %151 : vector<8x128xf32>
    %168 = arith.addf %166, %167 : vector<8x128xf32>
    %169 = math.tanh %168 : vector<8x128xf32>
    %cst_65 = arith.constant 1.000000e+00 : f32
    %170 = vector.broadcast %cst_65 : f32 to vector<8x128xf32>
    %171 = arith.subf %170, %165 : vector<8x128xf32>
    %172 = arith.mulf %171, %169 : vector<8x128xf32>
    %173 = arith.mulf %165, %145 : vector<8x128xf32>
    %174 = arith.addf %172, %173 : vector<8x128xf32>
    %c32 = arith.constant 32 : index
    %c0_66 = arith.constant 0 : index
    %175 = vector.load %arg10[%c32, %c0_66] : memref<64x128xf32, #tpu.memory_space<vmem>>, vector<8x128xf32>
    tpu.vector_store %arg10[%c32, %c0_66], %174 {strides = array<i32>} : memref<64x128xf32, #tpu.memory_space<vmem>>, vector<8x128xf32>,
    %cst_67 = arith.constant dense<0.000000e+00> : vector<8x128xf32>
    %176 = tpu.matmul %174, %23, %cst_67 {dimension_numbers = #tpu.dot_dimension_numbers<[1], [0], [0], [1], [0, 0, 1, 1], [], []>} : vector<8x128xf32>, vector<128x128xf32>, vector<8x128xf32> -> vector<8x128xf32>
    %cst_68 = arith.constant dense<0.000000e+00> : vector<8x128xf32>
    %177 = tpu.matmul %174, %25, %cst_68 {dimension_numbers = #tpu.dot_dimension_numbers<[1], [0], [0], [1], [0, 0, 1, 1], [], []>} : vector<8x128xf32>, vector<128x128xf32>, vector<8x128xf32> -> vector<8x128xf32>
    %cst_69 = arith.constant dense<0.000000e+00> : vector<8x128xf32>
    %178 = tpu.matmul %174, %27, %cst_69 {dimension_numbers = #tpu.dot_dimension_numbers<[1], [0], [0], [1], [0, 0, 1, 1], [], []>} : vector<8x128xf32>, vector<128x128xf32>, vector<8x128xf32> -> vector<8x128xf32>
    %179 = vector.broadcast %29 : vector<1x128xf32> to vector<8x128xf32>
    %180 = arith.addf %178, %179 : vector<8x128xf32>
    %181 = vector.extract_strided_slice %7 {offsets = [40, 0], sizes = [8, 128], strides = [1, 1]} : vector<64x128xf32> to vector<8x128xf32>
    %182 = arith.addf %181, %176 : vector<8x128xf32>
    %183 = arith.negf %182 : vector<8x128xf32>
    %184 = math.exp %183 : vector<8x128xf32>
    %cst_70 = arith.constant 1.000000e+00 : f32
    %185 = vector.broadcast %cst_70 : f32 to vector<8x128xf32>
    %186 = arith.addf %185, %184 : vector<8x128xf32>
    %187 = arith.divf %185, %186 : vector<8x128xf32>
    %188 = vector.extract_strided_slice %14 {offsets = [40, 0], sizes = [8, 128], strides = [1, 1]} : vector<64x128xf32> to vector<8x128xf32>
    %189 = arith.addf %188, %177 : vector<8x128xf32>
    %190 = arith.negf %189 : vector<8x128xf32>
    %191 = math.exp %190 : vector<8x128xf32>
    %cst_71 = arith.constant 1.000000e+00 : f32
    %192 = vector.broadcast %cst_71 : f32 to vector<8x128xf32>
    %193 = arith.addf %192, %191 : vector<8x128xf32>
    %194 = arith.divf %192, %193 : vector<8x128xf32>
    %195 = vector.extract_strided_slice %21 {offsets = [40, 0], sizes = [8, 128], strides = [1, 1]} : vector<64x128xf32> to vector<8x128xf32>
    %196 = arith.mulf %187, %180 : vector<8x128xf32>
    %197 = arith.addf %195, %196 : vector<8x128xf32>
    %198 = math.tanh %197 : vector<8x128xf32>
    %cst_72 = arith.constant 1.000000e+00 : f32
    %199 = vector.broadcast %cst_72 : f32 to vector<8x128xf32>
    %200 = arith.subf %199, %194 : vector<8x128xf32>
    %201 = arith.mulf %200, %198 : vector<8x128xf32>
    %202 = arith.mulf %194, %174 : vector<8x128xf32>
    %203 = arith.addf %201, %202 : vector<8x128xf32>
    %c40 = arith.constant 40 : index
    %c0_73 = arith.constant 0 : index
    %204 = vector.load %arg10[%c40, %c0_73] : memref<64x128xf32, #tpu.memory_space<vmem>>, vector<8x128xf32>
    tpu.vector_store %arg10[%c40, %c0_73], %203 {strides = array<i32>} : memref<64x128xf32, #tpu.memory_space<vmem>>, vector<8x128xf32>,
    %cst_74 = arith.constant dense<0.000000e+00> : vector<8x128xf32>
    %205 = tpu.matmul %203, %23, %cst_74 {dimension_numbers = #tpu.dot_dimension_numbers<[1], [0], [0], [1], [0, 0, 1, 1], [], []>} : vector<8x128xf32>, vector<128x128xf32>, vector<8x128xf32> -> vector<8x128xf32>
    %cst_75 = arith.constant dense<0.000000e+00> : vector<8x128xf32>
    %206 = tpu.matmul %203, %25, %cst_75 {dimension_numbers = #tpu.dot_dimension_numbers<[1], [0], [0], [1], [0, 0, 1, 1], [], []>} : vector<8x128xf32>, vector<128x128xf32>, vector<8x128xf32> -> vector<8x128xf32>
    %cst_76 = arith.constant dense<0.000000e+00> : vector<8x128xf32>
    %207 = tpu.matmul %203, %27, %cst_76 {dimension_numbers = #tpu.dot_dimension_numbers<[1], [0], [0], [1], [0, 0, 1, 1], [], []>} : vector<8x128xf32>, vector<128x128xf32>, vector<8x128xf32> -> vector<8x128xf32>
    %208 = vector.broadcast %29 : vector<1x128xf32> to vector<8x128xf32>
    %209 = arith.addf %207, %208 : vector<8x128xf32>
    %210 = vector.extract_strided_slice %7 {offsets = [48, 0], sizes = [8, 128], strides = [1, 1]} : vector<64x128xf32> to vector<8x128xf32>
    %211 = arith.addf %210, %205 : vector<8x128xf32>
    %212 = arith.negf %211 : vector<8x128xf32>
    %213 = math.exp %212 : vector<8x128xf32>
    %cst_77 = arith.constant 1.000000e+00 : f32
    %214 = vector.broadcast %cst_77 : f32 to vector<8x128xf32>
    %215 = arith.addf %214, %213 : vector<8x128xf32>
    %216 = arith.divf %214, %215 : vector<8x128xf32>
    %217 = vector.extract_strided_slice %14 {offsets = [48, 0], sizes = [8, 128], strides = [1, 1]} : vector<64x128xf32> to vector<8x128xf32>
    %218 = arith.addf %217, %206 : vector<8x128xf32>
    %219 = arith.negf %218 : vector<8x128xf32>
    %220 = math.exp %219 : vector<8x128xf32>
    %cst_78 = arith.constant 1.000000e+00 : f32
    %221 = vector.broadcast %cst_78 : f32 to vector<8x128xf32>
    %222 = arith.addf %221, %220 : vector<8x128xf32>
    %223 = arith.divf %221, %222 : vector<8x128xf32>
    %224 = vector.extract_strided_slice %21 {offsets = [48, 0], sizes = [8, 128], strides = [1, 1]} : vector<64x128xf32> to vector<8x128xf32>
    %225 = arith.mulf %216, %209 : vector<8x128xf32>
    %226 = arith.addf %224, %225 : vector<8x128xf32>
    %227 = math.tanh %226 : vector<8x128xf32>
    %cst_79 = arith.constant 1.000000e+00 : f32
    %228 = vector.broadcast %cst_79 : f32 to vector<8x128xf32>
    %229 = arith.subf %228, %223 : vector<8x128xf32>
    %230 = arith.mulf %229, %227 : vector<8x128xf32>
    %231 = arith.mulf %223, %203 : vector<8x128xf32>
    %232 = arith.addf %230, %231 : vector<8x128xf32>
    %c48 = arith.constant 48 : index
    %c0_80 = arith.constant 0 : index
    %233 = vector.load %arg10[%c48, %c0_80] : memref<64x128xf32, #tpu.memory_space<vmem>>, vector<8x128xf32>
    tpu.vector_store %arg10[%c48, %c0_80], %232 {strides = array<i32>} : memref<64x128xf32, #tpu.memory_space<vmem>>, vector<8x128xf32>,
    %cst_81 = arith.constant dense<0.000000e+00> : vector<8x128xf32>
    %234 = tpu.matmul %232, %23, %cst_81 {dimension_numbers = #tpu.dot_dimension_numbers<[1], [0], [0], [1], [0, 0, 1, 1], [], []>} : vector<8x128xf32>, vector<128x128xf32>, vector<8x128xf32> -> vector<8x128xf32>
    %cst_82 = arith.constant dense<0.000000e+00> : vector<8x128xf32>
    %235 = tpu.matmul %232, %25, %cst_82 {dimension_numbers = #tpu.dot_dimension_numbers<[1], [0], [0], [1], [0, 0, 1, 1], [], []>} : vector<8x128xf32>, vector<128x128xf32>, vector<8x128xf32> -> vector<8x128xf32>
    %cst_83 = arith.constant dense<0.000000e+00> : vector<8x128xf32>
    %236 = tpu.matmul %232, %27, %cst_83 {dimension_numbers = #tpu.dot_dimension_numbers<[1], [0], [0], [1], [0, 0, 1, 1], [], []>} : vector<8x128xf32>, vector<128x128xf32>, vector<8x128xf32> -> vector<8x128xf32>
    %237 = vector.broadcast %29 : vector<1x128xf32> to vector<8x128xf32>
    %238 = arith.addf %236, %237 : vector<8x128xf32>
    %239 = vector.extract_strided_slice %7 {offsets = [56, 0], sizes = [8, 128], strides = [1, 1]} : vector<64x128xf32> to vector<8x128xf32>
    %240 = arith.addf %239, %234 : vector<8x128xf32>
    %241 = arith.negf %240 : vector<8x128xf32>
    %242 = math.exp %241 : vector<8x128xf32>
    %cst_84 = arith.constant 1.000000e+00 : f32
    %243 = vector.broadcast %cst_84 : f32 to vector<8x128xf32>
    %244 = arith.addf %243, %242 : vector<8x128xf32>
    %245 = arith.divf %243, %244 : vector<8x128xf32>
    %246 = vector.extract_strided_slice %14 {offsets = [56, 0], sizes = [8, 128], strides = [1, 1]} : vector<64x128xf32> to vector<8x128xf32>
    %247 = arith.addf %246, %235 : vector<8x128xf32>
    %248 = arith.negf %247 : vector<8x128xf32>
    %249 = math.exp %248 : vector<8x128xf32>
    %cst_85 = arith.constant 1.000000e+00 : f32
    %250 = vector.broadcast %cst_85 : f32 to vector<8x128xf32>
    %251 = arith.addf %250, %249 : vector<8x128xf32>
    %252 = arith.divf %250, %251 : vector<8x128xf32>
    %253 = vector.extract_strided_slice %21 {offsets = [56, 0], sizes = [8, 128], strides = [1, 1]} : vector<64x128xf32> to vector<8x128xf32>
    %254 = arith.mulf %245, %238 : vector<8x128xf32>
    %255 = arith.addf %253, %254 : vector<8x128xf32>
    %256 = math.tanh %255 : vector<8x128xf32>
    %cst_86 = arith.constant 1.000000e+00 : f32
    %257 = vector.broadcast %cst_86 : f32 to vector<8x128xf32>
    %258 = arith.subf %257, %252 : vector<8x128xf32>
    %259 = arith.mulf %258, %256 : vector<8x128xf32>
    %260 = arith.mulf %252, %232 : vector<8x128xf32>
    %261 = arith.addf %259, %260 : vector<8x128xf32>
    %c56 = arith.constant 56 : index
    %c0_87 = arith.constant 0 : index
    %262 = vector.load %arg10[%c56, %c0_87] : memref<64x128xf32, #tpu.memory_space<vmem>>, vector<8x128xf32>
    tpu.vector_store %arg10[%c56, %c0_87], %261 {strides = array<i32>} : memref<64x128xf32, #tpu.memory_space<vmem>>, vector<8x128xf32>,
    %c0_88 = arith.constant 0 : index
    %c0_89 = arith.constant 0 : index
    %263 = vector.load %arg10[%c0_88, %c0_89] : memref<64x128xf32, #tpu.memory_space<vmem>>, vector<64x128xf32>
    %c0_90 = arith.constant 0 : index
    %c0_91 = arith.constant 0 : index
    %c0_92 = arith.constant 0 : index
    %264 = vector.load %arg4[%c0_90, %c0_91, %c0_92] : memref<3x128x128xf32, #tpu.memory_space<vmem>>, vector<1x128x128xf32>
    %265 = vector.shape_cast %264 : vector<1x128x128xf32> to vector<128x128xf32>
    %cst_93 = arith.constant dense<0.000000e+00> : vector<64x128xf32>
    %266 = tpu.matmul %263, %265, %cst_93 {dimension_numbers = #tpu.dot_dimension_numbers<[1], [0], [0], [1], [0, 0, 1, 1], [], []>} : vector<64x128xf32>, vector<128x128xf32>, vector<64x128xf32> -> vector<64x128xf32>
    %c0_94 = arith.constant 0 : index
    %c0_95 = arith.constant 0 : index
    %c0_96 = arith.constant 0 : index
    %267 = vector.load %arg6[%c0_94, %c0_95, %c0_96] : memref<4x1x128xf32, #tpu.memory_space<vmem>>, vector<1x1x128xf32>
    %268 = vector.shape_cast %267 : vector<1x1x128xf32> to vector<1x128xf32>
    %269 = vector.broadcast %268 : vector<1x128xf32> to vector<64x128xf32>
    %270 = arith.addf %266, %269 : vector<64x128xf32>
    %c1_97 = arith.constant 1 : index
    %c0_98 = arith.constant 0 : index
    %c0_99 = arith.constant 0 : index
    %271 = vector.load %arg4[%c1_97, %c0_98, %c0_99] : memref<3x128x128xf32, #tpu.memory_space<vmem>>, vector<1x128x128xf32>
    %272 = vector.shape_cast %271 : vector<1x128x128xf32> to vector<128x128xf32>
    %cst_100 = arith.constant dense<0.000000e+00> : vector<64x128xf32>
    %273 = tpu.matmul %263, %272, %cst_100 {dimension_numbers = #tpu.dot_dimension_numbers<[1], [0], [0], [1], [0, 0, 1, 1], [], []>} : vector<64x128xf32>, vector<128x128xf32>, vector<64x128xf32> -> vector<64x128xf32>
    %c1_101 = arith.constant 1 : index
    %c0_102 = arith.constant 0 : index
    %c0_103 = arith.constant 0 : index
    %274 = vector.load %arg6[%c1_101, %c0_102, %c0_103] : memref<4x1x128xf32, #tpu.memory_space<vmem>>, vector<1x1x128xf32>
    %275 = vector.shape_cast %274 : vector<1x1x128xf32> to vector<1x128xf32>
    %276 = vector.broadcast %275 : vector<1x128xf32> to vector<64x128xf32>
    %277 = arith.addf %273, %276 : vector<64x128xf32>
    %c2_104 = arith.constant 2 : index
    %c0_105 = arith.constant 0 : index
    %c0_106 = arith.constant 0 : index
    %278 = vector.load %arg4[%c2_104, %c0_105, %c0_106] : memref<3x128x128xf32, #tpu.memory_space<vmem>>, vector<1x128x128xf32>
    %279 = vector.shape_cast %278 : vector<1x128x128xf32> to vector<128x128xf32>
    %cst_107 = arith.constant dense<0.000000e+00> : vector<64x128xf32>
    %280 = tpu.matmul %263, %279, %cst_107 {dimension_numbers = #tpu.dot_dimension_numbers<[1], [0], [0], [1], [0, 0, 1, 1], [], []>} : vector<64x128xf32>, vector<128x128xf32>, vector<64x128xf32> -> vector<64x128xf32>
    %c2_108 = arith.constant 2 : index
    %c0_109 = arith.constant 0 : index
    %c0_110 = arith.constant 0 : index
    %281 = vector.load %arg6[%c2_108, %c0_109, %c0_110] : memref<4x1x128xf32, #tpu.memory_space<vmem>>, vector<1x1x128xf32>
    %282 = vector.shape_cast %281 : vector<1x1x128xf32> to vector<1x128xf32>
    %283 = vector.broadcast %282 : vector<1x128xf32> to vector<64x128xf32>
    %284 = arith.addf %280, %283 : vector<64x128xf32>
    %c0_111 = arith.constant 0 : index
    %c0_112 = arith.constant 0 : index
    %c0_113 = arith.constant 0 : index
    %285 = vector.load %arg5[%c0_111, %c0_112, %c0_113] : memref<3x128x128xf32, #tpu.memory_space<vmem>>, vector<1x128x128xf32>
    %286 = vector.shape_cast %285 : vector<1x128x128xf32> to vector<128x128xf32>
    %c1_114 = arith.constant 1 : index
    %c0_115 = arith.constant 0 : index
    %c0_116 = arith.constant 0 : index
    %287 = vector.load %arg5[%c1_114, %c0_115, %c0_116] : memref<3x128x128xf32, #tpu.memory_space<vmem>>, vector<1x128x128xf32>
    %288 = vector.shape_cast %287 : vector<1x128x128xf32> to vector<128x128xf32>
    %c2_117 = arith.constant 2 : index
    %c0_118 = arith.constant 0 : index
    %c0_119 = arith.constant 0 : index
    %289 = vector.load %arg5[%c2_117, %c0_118, %c0_119] : memref<3x128x128xf32, #tpu.memory_space<vmem>>, vector<1x128x128xf32>
    %290 = vector.shape_cast %289 : vector<1x128x128xf32> to vector<128x128xf32>
    %c3_120 = arith.constant 3 : index
    %c0_121 = arith.constant 0 : index
    %c0_122 = arith.constant 0 : index
    %291 = vector.load %arg6[%c3_120, %c0_121, %c0_122] : memref<4x1x128xf32, #tpu.memory_space<vmem>>, vector<1x1x128xf32>
    %292 = vector.shape_cast %291 : vector<1x1x128xf32> to vector<1x128xf32>
    %cst_123 = arith.constant 0.000000e+00 : f32
    %293 = vector.broadcast %cst_123 : f32 to vector<8x128xf32>
    %cst_124 = arith.constant dense<0.000000e+00> : vector<8x128xf32>
    %294 = tpu.matmul %293, %286, %cst_124 {dimension_numbers = #tpu.dot_dimension_numbers<[1], [0], [0], [1], [0, 0, 1, 1], [], []>} : vector<8x128xf32>, vector<128x128xf32>, vector<8x128xf32> -> vector<8x128xf32>
    %cst_125 = arith.constant dense<0.000000e+00> : vector<8x128xf32>
    %295 = tpu.matmul %293, %288, %cst_125 {dimension_numbers = #tpu.dot_dimension_numbers<[1], [0], [0], [1], [0, 0, 1, 1], [], []>} : vector<8x128xf32>, vector<128x128xf32>, vector<8x128xf32> -> vector<8x128xf32>
    %cst_126 = arith.constant dense<0.000000e+00> : vector<8x128xf32>
    %296 = tpu.matmul %293, %290, %cst_126 {dimension_numbers = #tpu.dot_dimension_numbers<[1], [0], [0], [1], [0, 0, 1, 1], [], []>} : vector<8x128xf32>, vector<128x128xf32>, vector<8x128xf32> -> vector<8x128xf32>
    %297 = vector.broadcast %292 : vector<1x128xf32> to vector<8x128xf32>
    %298 = arith.addf %296, %297 : vector<8x128xf32>
    %299 = vector.extract_strided_slice %270 {offsets = [0, 0], sizes = [8, 128], strides = [1, 1]} : vector<64x128xf32> to vector<8x128xf32>
    %300 = arith.addf %299, %294 : vector<8x128xf32>
    %301 = arith.negf %300 : vector<8x128xf32>
    %302 = math.exp %301 : vector<8x128xf32>
    %cst_127 = arith.constant 1.000000e+00 : f32
    %303 = vector.broadcast %cst_127 : f32 to vector<8x128xf32>
    %304 = arith.addf %303, %302 : vector<8x128xf32>
    %305 = arith.divf %303, %304 : vector<8x128xf32>
    %306 = vector.extract_strided_slice %277 {offsets = [0, 0], sizes = [8, 128], strides = [1, 1]} : vector<64x128xf32> to vector<8x128xf32>
    %307 = arith.addf %306, %295 : vector<8x128xf32>
    %308 = arith.negf %307 : vector<8x128xf32>
    %309 = math.exp %308 : vector<8x128xf32>
    %cst_128 = arith.constant 1.000000e+00 : f32
    %310 = vector.broadcast %cst_128 : f32 to vector<8x128xf32>
    %311 = arith.addf %310, %309 : vector<8x128xf32>
    %312 = arith.divf %310, %311 : vector<8x128xf32>
    %313 = vector.extract_strided_slice %284 {offsets = [0, 0], sizes = [8, 128], strides = [1, 1]} : vector<64x128xf32> to vector<8x128xf32>
    %314 = arith.mulf %305, %298 : vector<8x128xf32>
    %315 = arith.addf %313, %314 : vector<8x128xf32>
    %316 = math.tanh %315 : vector<8x128xf32>
    %cst_129 = arith.constant 1.000000e+00 : f32
    %317 = vector.broadcast %cst_129 : f32 to vector<8x128xf32>
    %318 = arith.subf %317, %312 : vector<8x128xf32>
    %319 = arith.mulf %318, %316 : vector<8x128xf32>
    %320 = arith.mulf %312, %293 : vector<8x128xf32>
    %321 = arith.addf %319, %320 : vector<8x128xf32>
    %cst_130 = arith.constant dense<0.000000e+00> : vector<8x128xf32>
    %322 = tpu.matmul %321, %286, %cst_130 {dimension_numbers = #tpu.dot_dimension_numbers<[1], [0], [0], [1], [0, 0, 1, 1], [], []>} : vector<8x128xf32>, vector<128x128xf32>, vector<8x128xf32> -> vector<8x128xf32>
    %cst_131 = arith.constant dense<0.000000e+00> : vector<8x128xf32>
    %323 = tpu.matmul %321, %288, %cst_131 {dimension_numbers = #tpu.dot_dimension_numbers<[1], [0], [0], [1], [0, 0, 1, 1], [], []>} : vector<8x128xf32>, vector<128x128xf32>, vector<8x128xf32> -> vector<8x128xf32>
    %cst_132 = arith.constant dense<0.000000e+00> : vector<8x128xf32>
    %324 = tpu.matmul %321, %290, %cst_132 {dimension_numbers = #tpu.dot_dimension_numbers<[1], [0], [0], [1], [0, 0, 1, 1], [], []>} : vector<8x128xf32>, vector<128x128xf32>, vector<8x128xf32> -> vector<8x128xf32>
    %325 = vector.broadcast %292 : vector<1x128xf32> to vector<8x128xf32>
    %326 = arith.addf %324, %325 : vector<8x128xf32>
    %327 = vector.extract_strided_slice %270 {offsets = [8, 0], sizes = [8, 128], strides = [1, 1]} : vector<64x128xf32> to vector<8x128xf32>
    %328 = arith.addf %327, %322 : vector<8x128xf32>
    %329 = arith.negf %328 : vector<8x128xf32>
    %330 = math.exp %329 : vector<8x128xf32>
    %cst_133 = arith.constant 1.000000e+00 : f32
    %331 = vector.broadcast %cst_133 : f32 to vector<8x128xf32>
    %332 = arith.addf %331, %330 : vector<8x128xf32>
    %333 = arith.divf %331, %332 : vector<8x128xf32>
    %334 = vector.extract_strided_slice %277 {offsets = [8, 0], sizes = [8, 128], strides = [1, 1]} : vector<64x128xf32> to vector<8x128xf32>
    %335 = arith.addf %334, %323 : vector<8x128xf32>
    %336 = arith.negf %335 : vector<8x128xf32>
    %337 = math.exp %336 : vector<8x128xf32>
    %cst_134 = arith.constant 1.000000e+00 : f32
    %338 = vector.broadcast %cst_134 : f32 to vector<8x128xf32>
    %339 = arith.addf %338, %337 : vector<8x128xf32>
    %340 = arith.divf %338, %339 : vector<8x128xf32>
    %341 = vector.extract_strided_slice %284 {offsets = [8, 0], sizes = [8, 128], strides = [1, 1]} : vector<64x128xf32> to vector<8x128xf32>
    %342 = arith.mulf %333, %326 : vector<8x128xf32>
    %343 = arith.addf %341, %342 : vector<8x128xf32>
    %344 = math.tanh %343 : vector<8x128xf32>
    %cst_135 = arith.constant 1.000000e+00 : f32
    %345 = vector.broadcast %cst_135 : f32 to vector<8x128xf32>
    %346 = arith.subf %345, %340 : vector<8x128xf32>
    %347 = arith.mulf %346, %344 : vector<8x128xf32>
    %348 = arith.mulf %340, %321 : vector<8x128xf32>
    %349 = arith.addf %347, %348 : vector<8x128xf32>
    %cst_136 = arith.constant dense<0.000000e+00> : vector<8x128xf32>
    %350 = tpu.matmul %349, %286, %cst_136 {dimension_numbers = #tpu.dot_dimension_numbers<[1], [0], [0], [1], [0, 0, 1, 1], [], []>} : vector<8x128xf32>, vector<128x128xf32>, vector<8x128xf32> -> vector<8x128xf32>
    %cst_137 = arith.constant dense<0.000000e+00> : vector<8x128xf32>
    %351 = tpu.matmul %349, %288, %cst_137 {dimension_numbers = #tpu.dot_dimension_numbers<[1], [0], [0], [1], [0, 0, 1, 1], [], []>} : vector<8x128xf32>, vector<128x128xf32>, vector<8x128xf32> -> vector<8x128xf32>
    %cst_138 = arith.constant dense<0.000000e+00> : vector<8x128xf32>
    %352 = tpu.matmul %349, %290, %cst_138 {dimension_numbers = #tpu.dot_dimension_numbers<[1], [0], [0], [1], [0, 0, 1, 1], [], []>} : vector<8x128xf32>, vector<128x128xf32>, vector<8x128xf32> -> vector<8x128xf32>
    %353 = vector.broadcast %292 : vector<1x128xf32> to vector<8x128xf32>
    %354 = arith.addf %352, %353 : vector<8x128xf32>
    %355 = vector.extract_strided_slice %270 {offsets = [16, 0], sizes = [8, 128], strides = [1, 1]} : vector<64x128xf32> to vector<8x128xf32>
    %356 = arith.addf %355, %350 : vector<8x128xf32>
    %357 = arith.negf %356 : vector<8x128xf32>
    %358 = math.exp %357 : vector<8x128xf32>
    %cst_139 = arith.constant 1.000000e+00 : f32
    %359 = vector.broadcast %cst_139 : f32 to vector<8x128xf32>
    %360 = arith.addf %359, %358 : vector<8x128xf32>
    %361 = arith.divf %359, %360 : vector<8x128xf32>
    %362 = vector.extract_strided_slice %277 {offsets = [16, 0], sizes = [8, 128], strides = [1, 1]} : vector<64x128xf32> to vector<8x128xf32>
    %363 = arith.addf %362, %351 : vector<8x128xf32>
    %364 = arith.negf %363 : vector<8x128xf32>
    %365 = math.exp %364 : vector<8x128xf32>
    %cst_140 = arith.constant 1.000000e+00 : f32
    %366 = vector.broadcast %cst_140 : f32 to vector<8x128xf32>
    %367 = arith.addf %366, %365 : vector<8x128xf32>
    %368 = arith.divf %366, %367 : vector<8x128xf32>
    %369 = vector.extract_strided_slice %284 {offsets = [16, 0], sizes = [8, 128], strides = [1, 1]} : vector<64x128xf32> to vector<8x128xf32>
    %370 = arith.mulf %361, %354 : vector<8x128xf32>
    %371 = arith.addf %369, %370 : vector<8x128xf32>
    %372 = math.tanh %371 : vector<8x128xf32>
    %cst_141 = arith.constant 1.000000e+00 : f32
    %373 = vector.broadcast %cst_141 : f32 to vector<8x128xf32>
    %374 = arith.subf %373, %368 : vector<8x128xf32>
    %375 = arith.mulf %374, %372 : vector<8x128xf32>
    %376 = arith.mulf %368, %349 : vector<8x128xf32>
    %377 = arith.addf %375, %376 : vector<8x128xf32>
    %cst_142 = arith.constant dense<0.000000e+00> : vector<8x128xf32>
    %378 = tpu.matmul %377, %286, %cst_142 {dimension_numbers = #tpu.dot_dimension_numbers<[1], [0], [0], [1], [0, 0, 1, 1], [], []>} : vector<8x128xf32>, vector<128x128xf32>, vector<8x128xf32> -> vector<8x128xf32>
    %cst_143 = arith.constant dense<0.000000e+00> : vector<8x128xf32>
    %379 = tpu.matmul %377, %288, %cst_143 {dimension_numbers = #tpu.dot_dimension_numbers<[1], [0], [0], [1], [0, 0, 1, 1], [], []>} : vector<8x128xf32>, vector<128x128xf32>, vector<8x128xf32> -> vector<8x128xf32>
    %cst_144 = arith.constant dense<0.000000e+00> : vector<8x128xf32>
    %380 = tpu.matmul %377, %290, %cst_144 {dimension_numbers = #tpu.dot_dimension_numbers<[1], [0], [0], [1], [0, 0, 1, 1], [], []>} : vector<8x128xf32>, vector<128x128xf32>, vector<8x128xf32> -> vector<8x128xf32>
    %381 = vector.broadcast %292 : vector<1x128xf32> to vector<8x128xf32>
    %382 = arith.addf %380, %381 : vector<8x128xf32>
    %383 = vector.extract_strided_slice %270 {offsets = [24, 0], sizes = [8, 128], strides = [1, 1]} : vector<64x128xf32> to vector<8x128xf32>
    %384 = arith.addf %383, %378 : vector<8x128xf32>
    %385 = arith.negf %384 : vector<8x128xf32>
    %386 = math.exp %385 : vector<8x128xf32>
    %cst_145 = arith.constant 1.000000e+00 : f32
    %387 = vector.broadcast %cst_145 : f32 to vector<8x128xf32>
    %388 = arith.addf %387, %386 : vector<8x128xf32>
    %389 = arith.divf %387, %388 : vector<8x128xf32>
    %390 = vector.extract_strided_slice %277 {offsets = [24, 0], sizes = [8, 128], strides = [1, 1]} : vector<64x128xf32> to vector<8x128xf32>
    %391 = arith.addf %390, %379 : vector<8x128xf32>
    %392 = arith.negf %391 : vector<8x128xf32>
    %393 = math.exp %392 : vector<8x128xf32>
    %cst_146 = arith.constant 1.000000e+00 : f32
    %394 = vector.broadcast %cst_146 : f32 to vector<8x128xf32>
    %395 = arith.addf %394, %393 : vector<8x128xf32>
    %396 = arith.divf %394, %395 : vector<8x128xf32>
    %397 = vector.extract_strided_slice %284 {offsets = [24, 0], sizes = [8, 128], strides = [1, 1]} : vector<64x128xf32> to vector<8x128xf32>
    %398 = arith.mulf %389, %382 : vector<8x128xf32>
    %399 = arith.addf %397, %398 : vector<8x128xf32>
    %400 = math.tanh %399 : vector<8x128xf32>
    %cst_147 = arith.constant 1.000000e+00 : f32
    %401 = vector.broadcast %cst_147 : f32 to vector<8x128xf32>
    %402 = arith.subf %401, %396 : vector<8x128xf32>
    %403 = arith.mulf %402, %400 : vector<8x128xf32>
    %404 = arith.mulf %396, %377 : vector<8x128xf32>
    %405 = arith.addf %403, %404 : vector<8x128xf32>
    %cst_148 = arith.constant dense<0.000000e+00> : vector<8x128xf32>
    %406 = tpu.matmul %405, %286, %cst_148 {dimension_numbers = #tpu.dot_dimension_numbers<[1], [0], [0], [1], [0, 0, 1, 1], [], []>} : vector<8x128xf32>, vector<128x128xf32>, vector<8x128xf32> -> vector<8x128xf32>
    %cst_149 = arith.constant dense<0.000000e+00> : vector<8x128xf32>
    %407 = tpu.matmul %405, %288, %cst_149 {dimension_numbers = #tpu.dot_dimension_numbers<[1], [0], [0], [1], [0, 0, 1, 1], [], []>} : vector<8x128xf32>, vector<128x128xf32>, vector<8x128xf32> -> vector<8x128xf32>
    %cst_150 = arith.constant dense<0.000000e+00> : vector<8x128xf32>
    %408 = tpu.matmul %405, %290, %cst_150 {dimension_numbers = #tpu.dot_dimension_numbers<[1], [0], [0], [1], [0, 0, 1, 1], [], []>} : vector<8x128xf32>, vector<128x128xf32>, vector<8x128xf32> -> vector<8x128xf32>
    %409 = vector.broadcast %292 : vector<1x128xf32> to vector<8x128xf32>
    %410 = arith.addf %408, %409 : vector<8x128xf32>
    %411 = vector.extract_strided_slice %270 {offsets = [32, 0], sizes = [8, 128], strides = [1, 1]} : vector<64x128xf32> to vector<8x128xf32>
    %412 = arith.addf %411, %406 : vector<8x128xf32>
    %413 = arith.negf %412 : vector<8x128xf32>
    %414 = math.exp %413 : vector<8x128xf32>
    %cst_151 = arith.constant 1.000000e+00 : f32
    %415 = vector.broadcast %cst_151 : f32 to vector<8x128xf32>
    %416 = arith.addf %415, %414 : vector<8x128xf32>
    %417 = arith.divf %415, %416 : vector<8x128xf32>
    %418 = vector.extract_strided_slice %277 {offsets = [32, 0], sizes = [8, 128], strides = [1, 1]} : vector<64x128xf32> to vector<8x128xf32>
    %419 = arith.addf %418, %407 : vector<8x128xf32>
    %420 = arith.negf %419 : vector<8x128xf32>
    %421 = math.exp %420 : vector<8x128xf32>
    %cst_152 = arith.constant 1.000000e+00 : f32
    %422 = vector.broadcast %cst_152 : f32 to vector<8x128xf32>
    %423 = arith.addf %422, %421 : vector<8x128xf32>
    %424 = arith.divf %422, %423 : vector<8x128xf32>
    %425 = vector.extract_strided_slice %284 {offsets = [32, 0], sizes = [8, 128], strides = [1, 1]} : vector<64x128xf32> to vector<8x128xf32>
    %426 = arith.mulf %417, %410 : vector<8x128xf32>
    %427 = arith.addf %425, %426 : vector<8x128xf32>
    %428 = math.tanh %427 : vector<8x128xf32>
    %cst_153 = arith.constant 1.000000e+00 : f32
    %429 = vector.broadcast %cst_153 : f32 to vector<8x128xf32>
    %430 = arith.subf %429, %424 : vector<8x128xf32>
    %431 = arith.mulf %430, %428 : vector<8x128xf32>
    %432 = arith.mulf %424, %405 : vector<8x128xf32>
    %433 = arith.addf %431, %432 : vector<8x128xf32>
    %cst_154 = arith.constant dense<0.000000e+00> : vector<8x128xf32>
    %434 = tpu.matmul %433, %286, %cst_154 {dimension_numbers = #tpu.dot_dimension_numbers<[1], [0], [0], [1], [0, 0, 1, 1], [], []>} : vector<8x128xf32>, vector<128x128xf32>, vector<8x128xf32> -> vector<8x128xf32>
    %cst_155 = arith.constant dense<0.000000e+00> : vector<8x128xf32>
    %435 = tpu.matmul %433, %288, %cst_155 {dimension_numbers = #tpu.dot_dimension_numbers<[1], [0], [0], [1], [0, 0, 1, 1], [], []>} : vector<8x128xf32>, vector<128x128xf32>, vector<8x128xf32> -> vector<8x128xf32>
    %cst_156 = arith.constant dense<0.000000e+00> : vector<8x128xf32>
    %436 = tpu.matmul %433, %290, %cst_156 {dimension_numbers = #tpu.dot_dimension_numbers<[1], [0], [0], [1], [0, 0, 1, 1], [], []>} : vector<8x128xf32>, vector<128x128xf32>, vector<8x128xf32> -> vector<8x128xf32>
    %437 = vector.broadcast %292 : vector<1x128xf32> to vector<8x128xf32>
    %438 = arith.addf %436, %437 : vector<8x128xf32>
    %439 = vector.extract_strided_slice %270 {offsets = [40, 0], sizes = [8, 128], strides = [1, 1]} : vector<64x128xf32> to vector<8x128xf32>
    %440 = arith.addf %439, %434 : vector<8x128xf32>
    %441 = arith.negf %440 : vector<8x128xf32>
    %442 = math.exp %441 : vector<8x128xf32>
    %cst_157 = arith.constant 1.000000e+00 : f32
    %443 = vector.broadcast %cst_157 : f32 to vector<8x128xf32>
    %444 = arith.addf %443, %442 : vector<8x128xf32>
    %445 = arith.divf %443, %444 : vector<8x128xf32>
    %446 = vector.extract_strided_slice %277 {offsets = [40, 0], sizes = [8, 128], strides = [1, 1]} : vector<64x128xf32> to vector<8x128xf32>
    %447 = arith.addf %446, %435 : vector<8x128xf32>
    %448 = arith.negf %447 : vector<8x128xf32>
    %449 = math.exp %448 : vector<8x128xf32>
    %cst_158 = arith.constant 1.000000e+00 : f32
    %450 = vector.broadcast %cst_158 : f32 to vector<8x128xf32>
    %451 = arith.addf %450, %449 : vector<8x128xf32>
    %452 = arith.divf %450, %451 : vector<8x128xf32>
    %453 = vector.extract_strided_slice %284 {offsets = [40, 0], sizes = [8, 128], strides = [1, 1]} : vector<64x128xf32> to vector<8x128xf32>
    %454 = arith.mulf %445, %438 : vector<8x128xf32>
    %455 = arith.addf %453, %454 : vector<8x128xf32>
    %456 = math.tanh %455 : vector<8x128xf32>
    %cst_159 = arith.constant 1.000000e+00 : f32
    %457 = vector.broadcast %cst_159 : f32 to vector<8x128xf32>
    %458 = arith.subf %457, %452 : vector<8x128xf32>
    %459 = arith.mulf %458, %456 : vector<8x128xf32>
    %460 = arith.mulf %452, %433 : vector<8x128xf32>
    %461 = arith.addf %459, %460 : vector<8x128xf32>
    %cst_160 = arith.constant dense<0.000000e+00> : vector<8x128xf32>
    %462 = tpu.matmul %461, %286, %cst_160 {dimension_numbers = #tpu.dot_dimension_numbers<[1], [0], [0], [1], [0, 0, 1, 1], [], []>} : vector<8x128xf32>, vector<128x128xf32>, vector<8x128xf32> -> vector<8x128xf32>
    %cst_161 = arith.constant dense<0.000000e+00> : vector<8x128xf32>
    %463 = tpu.matmul %461, %288, %cst_161 {dimension_numbers = #tpu.dot_dimension_numbers<[1], [0], [0], [1], [0, 0, 1, 1], [], []>} : vector<8x128xf32>, vector<128x128xf32>, vector<8x128xf32> -> vector<8x128xf32>
    %cst_162 = arith.constant dense<0.000000e+00> : vector<8x128xf32>
    %464 = tpu.matmul %461, %290, %cst_162 {dimension_numbers = #tpu.dot_dimension_numbers<[1], [0], [0], [1], [0, 0, 1, 1], [], []>} : vector<8x128xf32>, vector<128x128xf32>, vector<8x128xf32> -> vector<8x128xf32>
    %465 = vector.broadcast %292 : vector<1x128xf32> to vector<8x128xf32>
    %466 = arith.addf %464, %465 : vector<8x128xf32>
    %467 = vector.extract_strided_slice %270 {offsets = [48, 0], sizes = [8, 128], strides = [1, 1]} : vector<64x128xf32> to vector<8x128xf32>
    %468 = arith.addf %467, %462 : vector<8x128xf32>
    %469 = arith.negf %468 : vector<8x128xf32>
    %470 = math.exp %469 : vector<8x128xf32>
    %cst_163 = arith.constant 1.000000e+00 : f32
    %471 = vector.broadcast %cst_163 : f32 to vector<8x128xf32>
    %472 = arith.addf %471, %470 : vector<8x128xf32>
    %473 = arith.divf %471, %472 : vector<8x128xf32>
    %474 = vector.extract_strided_slice %277 {offsets = [48, 0], sizes = [8, 128], strides = [1, 1]} : vector<64x128xf32> to vector<8x128xf32>
    %475 = arith.addf %474, %463 : vector<8x128xf32>
    %476 = arith.negf %475 : vector<8x128xf32>
    %477 = math.exp %476 : vector<8x128xf32>
    %cst_164 = arith.constant 1.000000e+00 : f32
    %478 = vector.broadcast %cst_164 : f32 to vector<8x128xf32>
    %479 = arith.addf %478, %477 : vector<8x128xf32>
    %480 = arith.divf %478, %479 : vector<8x128xf32>
    %481 = vector.extract_strided_slice %284 {offsets = [48, 0], sizes = [8, 128], strides = [1, 1]} : vector<64x128xf32> to vector<8x128xf32>
    %482 = arith.mulf %473, %466 : vector<8x128xf32>
    %483 = arith.addf %481, %482 : vector<8x128xf32>
    %484 = math.tanh %483 : vector<8x128xf32>
    %cst_165 = arith.constant 1.000000e+00 : f32
    %485 = vector.broadcast %cst_165 : f32 to vector<8x128xf32>
    %486 = arith.subf %485, %480 : vector<8x128xf32>
    %487 = arith.mulf %486, %484 : vector<8x128xf32>
    %488 = arith.mulf %480, %461 : vector<8x128xf32>
    %489 = arith.addf %487, %488 : vector<8x128xf32>
    %cst_166 = arith.constant dense<0.000000e+00> : vector<8x128xf32>
    %490 = tpu.matmul %489, %286, %cst_166 {dimension_numbers = #tpu.dot_dimension_numbers<[1], [0], [0], [1], [0, 0, 1, 1], [], []>} : vector<8x128xf32>, vector<128x128xf32>, vector<8x128xf32> -> vector<8x128xf32>
    %cst_167 = arith.constant dense<0.000000e+00> : vector<8x128xf32>
    %491 = tpu.matmul %489, %288, %cst_167 {dimension_numbers = #tpu.dot_dimension_numbers<[1], [0], [0], [1], [0, 0, 1, 1], [], []>} : vector<8x128xf32>, vector<128x128xf32>, vector<8x128xf32> -> vector<8x128xf32>
    %cst_168 = arith.constant dense<0.000000e+00> : vector<8x128xf32>
    %492 = tpu.matmul %489, %290, %cst_168 {dimension_numbers = #tpu.dot_dimension_numbers<[1], [0], [0], [1], [0, 0, 1, 1], [], []>} : vector<8x128xf32>, vector<128x128xf32>, vector<8x128xf32> -> vector<8x128xf32>
    %493 = vector.broadcast %292 : vector<1x128xf32> to vector<8x128xf32>
    %494 = arith.addf %492, %493 : vector<8x128xf32>
    %495 = vector.extract_strided_slice %270 {offsets = [56, 0], sizes = [8, 128], strides = [1, 1]} : vector<64x128xf32> to vector<8x128xf32>
    %496 = arith.addf %495, %490 : vector<8x128xf32>
    %497 = arith.negf %496 : vector<8x128xf32>
    %498 = math.exp %497 : vector<8x128xf32>
    %cst_169 = arith.constant 1.000000e+00 : f32
    %499 = vector.broadcast %cst_169 : f32 to vector<8x128xf32>
    %500 = arith.addf %499, %498 : vector<8x128xf32>
    %501 = arith.divf %499, %500 : vector<8x128xf32>
    %502 = vector.extract_strided_slice %277 {offsets = [56, 0], sizes = [8, 128], strides = [1, 1]} : vector<64x128xf32> to vector<8x128xf32>
    %503 = arith.addf %502, %491 : vector<8x128xf32>
    %504 = arith.negf %503 : vector<8x128xf32>
    %505 = math.exp %504 : vector<8x128xf32>
    %cst_170 = arith.constant 1.000000e+00 : f32
    %506 = vector.broadcast %cst_170 : f32 to vector<8x128xf32>
    %507 = arith.addf %506, %505 : vector<8x128xf32>
    %508 = arith.divf %506, %507 : vector<8x128xf32>
    %509 = vector.extract_strided_slice %284 {offsets = [56, 0], sizes = [8, 128], strides = [1, 1]} : vector<64x128xf32> to vector<8x128xf32>
    %510 = arith.mulf %501, %494 : vector<8x128xf32>
    %511 = arith.addf %509, %510 : vector<8x128xf32>
    %512 = math.tanh %511 : vector<8x128xf32>
    %cst_171 = arith.constant 1.000000e+00 : f32
    %513 = vector.broadcast %cst_171 : f32 to vector<8x128xf32>
    %514 = arith.subf %513, %508 : vector<8x128xf32>
    %515 = arith.mulf %514, %512 : vector<8x128xf32>
    %516 = arith.mulf %508, %489 : vector<8x128xf32>
    %517 = arith.addf %515, %516 : vector<8x128xf32>
    %c0_172 = arith.constant 0 : index
    %c0_173 = arith.constant 0 : index
    %518 = vector.load %arg7[%c0_172, %c0_173] : memref<128x32xf32, #tpu.memory_space<vmem>>, vector<128x32xf32>
    %cst_174 = arith.constant dense<0.000000e+00> : vector<8x32xf32>
    %519 = tpu.matmul %517, %518, %cst_174 {dimension_numbers = #tpu.dot_dimension_numbers<[1], [0], [0], [1], [0, 0, 1, 1], [], []>} : vector<8x128xf32>, vector<128x32xf32>, vector<8x32xf32> -> vector<8x32xf32>
    %c0_175 = arith.constant 0 : index
    %c0_176 = arith.constant 0 : index
    %520 = vector.load %arg8[%c0_175, %c0_176] : memref<1x32xf32, #tpu.memory_space<vmem>>, vector<1x32xf32>
    %521 = vector.broadcast %520 : vector<1x32xf32> to vector<8x32xf32>
    %522 = arith.addf %519, %521 : vector<8x32xf32>
    %c0_177 = arith.constant 0 : index
    %c0_178 = arith.constant 0 : index
    %523 = vector.load %arg9[%c0_177, %c0_178] : memref<8x32xf32, #tpu.memory_space<vmem>>, vector<8x32xf32>
    tpu.vector_store %arg9[%c0_177, %c0_178], %522 {strides = array<i32>} : memref<8x32xf32, #tpu.memory_space<vmem>>, vector<8x32xf32>,
    return
  }
}

</mosaic_0001>

<bundles_post_ra>
// kernel: gru_forward.1
= control target key start
LH: loop header
LB: loop body
LE: loop exit
PB: predicated region body
PF: predicated region fallthrough
CT: control target
= control target key end

     0   :  { %14 = vsyncpa [#allocation4], 0  ;;  %s10558_s0 = inlined_call_operand.vmem [shape: f32[64,8], index: 0, kind: input, shape index: {}]   ;;  %s10559_s1 = inlined_call_operand.vmem [shape: f32[3,8,128], index: 1, kind: input, shape index: {}]   ;;  %s10560_s2 = inlined_call_operand.hbm [shape: f32[3,128,128], index: 2, kind: input, shape index: {}]   ;;  %s10561_s3 = inlined_call_operand.vmem [shape: f32[4,1,128], index: 3, kind: input, shape index: {}]   ;;  %s10562_s4 = inlined_call_operand.hbm [shape: f32[3,128,128], index: 4, kind: input, shape index: {}]   ;;  %s10563_s5 = inlined_call_operand.hbm [shape: f32[3,128,128], index: 5, kind: input, shape index: {}]   ;;  %s10564_s6 = inlined_call_operand.vmem [shape: f32[4,1,128], index: 6, kind: input, shape index: {}]   ;;  %s10565_s7 = inlined_call_operand.vmem [shape: f32[128,32], index: 7, kind: input, shape index: {}]   ;;  %s10566_s8 = inlined_call_operand.vmem [shape: f32[1,32], index: 8, kind: input, shape index: {}]   ;;  %s10567_s9 = inlined_call_operand.vmem [shape: f32[8,32], index: 9, kind: output, shape index: {}]  }
   0x1   :  { %15 = vsyncpa [#allocation6], 0  ;;  %s7994_s30 = smov [#allocation5]   ;;  %s7995_s11 = smov [#allocation3]  }
   0x2   :  { %s39_s10 = sshll.u32 %s7994_s30, 4  ;;  %s25_s12 = sshll.u32 %s7995_s11, 4  ;;  %s40_s10 = int_to_ptr.vmem [resolvable:$true] %s39_s10  ;;  %s26_s12 = int_to_ptr.vmem [resolvable:$true] %s25_s12 }
   0x3   :  { %s7938_s13 = scalar_lea.vmem %s40_s10, 6144  ;;  %p7943_p1 = scmp.lt.s32.totalorder %s40_s10, %s40_s10 }
   0x4   :  { %p7939_p0 = scmp.ne.s32.totalorder %s40_s10, %s7938_s13  ;;  %p7944_p2 = scmp.lt.s32.totalorder %s7938_s13, %s7938_s13 }
   0x6   :  { %p7945_p3 = por %p7944_p2, %p7943_p1 }
   0x8   :  { %p7946_p4 = pnand %p7945_p3, %p7939_p0 }
   0xa   :  { %7949 = shalt.err (!%p7946_p4)
}
   0xb   :  { %s7996_s14 = smov 128   ;;  %s7997_s15 = smov 8  }
   0xc   :  { %45 = dma.hbm_to_vmem [thread:$0]  %s10562_s4, 6144, %s40_s10, [#allocation6], %s7996_s14, %s7996_s14, %s7997_s15  }
   0xd   :  { %s7958_s18 = scalar_lea.vmem %s26_s12, 6144  ;;  %p7963_p6 = scmp.lt.s32.totalorder %s26_s12, %s26_s12 }
   0xe   :  { %p7959_p5 = scmp.ne.s32.totalorder %s26_s12, %s7958_s18  ;;  %p7964_p7 = scmp.lt.s32.totalorder %s7958_s18, %s7958_s18 }
  0x10   :  { %p7965_p8 = por %p7964_p7, %p7963_p6 }
  0x12   :  { %p7966_p9 = pnand %p7965_p8, %p7959_p5 }
  0x14   :  { %7969 = shalt.err (!%p7966_p9)
}
  0x15   :  { %31 = dma.hbm_to_vmem [thread:$0]  %s10560_s2, 6144, %s26_s12, [#allocation4], %s7996_s14, %s7996_s14, %s7997_s15  }
  0x16   :  { %s7998_s21 = smov [#allocation7]  }
  0x17   :  { %s51_s22 = sshll.u32 %s7998_s21, 4  ;;  %s52_s22 = int_to_ptr.vmem [resolvable:$true] %s51_s22 }
  0x18   :  { %s7978_s23 = scalar_lea.vmem %s52_s22, 6144  ;;  %p7983_p11 = scmp.lt.s32.totalorder %s52_s22, %s52_s22 }
  0x19   :  { %p7979_p10 = scmp.ne.s32.totalorder %s52_s22, %s7978_s23  ;;  %p7984_p12 = scmp.lt.s32.totalorder %s7978_s23, %s7978_s23 }
  0x1b   :  { %p7985_p13 = por %p7984_p12, %p7983_p11 }
  0x1d   :  { %p7986_p0 = pnand %p7985_p13, %p7979_p10 }
  0x1f   :  { %7989 = shalt.err (!%p7986_p0)
}
  0x20   :  { %57 = dma.hbm_to_vmem [thread:$0]  %s10563_s5, 6144, %s52_s22, [#allocation6], %s7996_s14, %s7996_s14, %s7997_s15  }
  0x21   :  { %7990 = dma.done.wait [#allocation4], 6144  }
  0x22   :  { %7991 = vsyncadd [#allocation4], 4294961152 }
  0x23   :  { %7992 = dma.done.wait [#allocation6], 12288  }
  0x24   :  { %7993 = vsyncadd [#allocation6], 4294955008  ;;  %v81_v0 = vld [vmem:[%s10559_s1] sm:$0xff]  ;;  %vm89_vm0 = vcmask 64512   ;;  %v74_v3 = vld [vmem:[%s10558_s0 + $0x8] sm:$0xff]  ;;  %v10568_v11 = vmov 0.0  }
  0x25   :  { %v73_v1 = vld [vmem:[%s10558_s0] sm:$0xff]  ;;  %5771 = vmatprep.subr.mxu0 %v81_v0  ;;  %7660 = vmatprep.subr.mxu1 %v81_v0  ;;  %v8077_v4 = vld [vmem:[%s10558_s0 + $0x28] sm:$0xff]  ;;  %v8085_v6 = vld [vmem:[%s10558_s0 + $0x10] sm:$0xff]  ;;  %vm8000_vm1 = vmmov 0   ;;  %vm4758_vm2 = vcmask 261120  }
  0x26   :  { %v8069_v2 = vld [vmem:[%s10558_s0 + $0x20] sm:$0xff]  ;;  %5772 = vmatpush3.msra.mxu0 %v81_v0  ;;  %7661 = vmatpush3.msra.mxu1 %v81_v0  ;;  %v4775_v5 = vld [vmem:[%s10559_s1 + $0x8] sm:$0xff]  ;;  %v8093_v7 = vld [vmem:[%s10558_s0 + $0x30] sm:$0xff] }
  0x27   :  { %5773 = vmatprep.mubr.msk.f32.mxu0 %vm89_vm0, %v73_v1  ;;  %5779 = vmatprep.mubr.msk.f32.mxu1 %vm89_vm0, %v8069_v2  ;;  %v4786_v8 = vld [vmem:[%s10559_s1 + $0x10] sm:$0xff]  ;;  %v8106_v9 = vld [vmem:[%s10558_s0 + $0x18] sm:$0xff]  ;;  %v8137_v16 = vld [vmem:[#allocation3 + $0x68] sm:$0xff] }
  0x28   :  { %5774 = vmatmul.mubr.msk.f32.vlgmr.msra.gmra.mxu0 %vm89_vm0, %v74_v3  ;;  %5780 = vmatmul.mubr.msk.f32.vlgmr.msra.gmra.mxu1 %vm89_vm0, %v8077_v4  ;;  %v8111_v10 = vld [vmem:[%s10558_s0 + $0x38] sm:$0xff]  ;;  %v8129_v14 = vld [vmem:[#allocation3 + $0x70] sm:$0xff]  ;;  %v8139_v17 = vld [vmem:[#allocation3 + $0xe8] sm:$0xff] }
  0x29   :  { %5785 = vmatprep.subr.mxu1 %v4775_v5  ;;  %5776 = vmatprep.mubr.msk.f32.mxu0 %vm89_vm0, %v8085_v6  ;;  %v8123_v12 = vld [vmem:[#allocation3 + $0x78] sm:$0xff]  ;;  %v8131_v15 = vld [vmem:[#allocation3 + $0xf0] sm:$0xff]  ;;  %v8145_v18 = vld [vmem:[#allocation3 + $0x60] sm:$0xff] }
  0x2a   :  { %5786 = vmatpush3.msra.mxu1 %v4775_v5  ;;  %5782 = vmatprep.mubr.msk.f32.mxu1 %vm89_vm0, %v8093_v7  ;;  %v8125_v13 = vld [vmem:[#allocation3 + $0xf8] sm:$0xff]  ;;  %v8147_v19 = vld [vmem:[#allocation3 + $0xe0] sm:$0xff]  ;;  %v8161_v22 = vld [vmem:[#allocation3 + $0x50] sm:$0xff] }
  0x2b   :  { %5799 = vmatprep.subr.mxu0 %v4786_v8  ;;  %5813 = vmatprep.subr.mxu1 %v10568_v11  ;;  %v8153_v20 = vld [vmem:[#allocation3 + $0x58] sm:$0xff]  ;;  %v8163_v23 = vld [vmem:[#allocation3 + $0xd0] sm:$0xff]  ;;  %v8169_v24 = vld [vmem:[#allocation3 + $0x48] sm:$0xff] }
  0x2c   :  { %5777 = vmatmul.mubr.msk.f32.gmra.mxu0 %vm89_vm0, %v8106_v9  ;;  %5783 = vmatmul.mubr.msk.f32.gmra.mxu1 %vm89_vm0, %v8111_v10  ;;  %v8155_v21 = vld [vmem:[#allocation3 + $0xd8] sm:$0xff]  ;;  %v8171_v25 = vld [vmem:[#allocation3 + $0xc8] sm:$0xff]  ;;  %v8177_v26 = vld [vmem:[#allocation3 + $0x40] sm:$0xff] }
  0x2d   :  { %5800 = vmatpush3.msra.mxu0 %v4786_v8  ;;  %5787 = vmatprep.mubr.msk.f32.mxu1 %vm89_vm0, %v73_v1  ;;  %v8179_v27 = vld [vmem:[#allocation3 + $0xc0] sm:$0xff]  ;;  %v8185_v28 = vld [vmem:[#allocation3 + $0x38] sm:$0xff]  ;;  %v8195_v30 = vld [vmem:[#allocation3 + $0x30] sm:$0xff] }
  0x2e   :  { %5801 = vmatprep.mubr.msk.f32.mxu0 %vm89_vm0, %v73_v1  ;;  %5848 = vmatprep.subr.mxu0 %v10568_v11  ;;  %v8187_v29 = vld [vmem:[#allocation3 + $0xb8] sm:$0xff]  ;;  %v8200_v31 = vld [vmem:[#allocation3 + $0xb0] sm:$0xff]  ;;  %v8208_v32 = vld [vmem:[#allocation3 + $0x28] sm:$0xff] }
  0x2f   :  { %10622 = vst [vmem:[#allocation10_spill] sm:$0xff] %v8200_v31  ;;  %v8210_v33 = vld [vmem:[#allocation3 + $0xa8] sm:$0xff]  ;;  %v8219_v34 = vld [vmem:[#allocation3 + $0x20] sm:$0xff]  ;;  %v8232_v36 = vld [vmem:[#allocation3 + $0x18] sm:$0xff] }
  0x30   :  { %5788 = vmatmul.mubr.msk.f32.vlgmr.msra.gmra.mxu1 %vm89_vm0, %v74_v3  ;;  %5802 = vmatmul.mubr.msk.f32.vlgmr.msra.gmra.mxu0 %vm89_vm0, %v74_v3  ;;  %10623 = vst [vmem:[#allocation11_spill] sm:$0xff] %v8210_v33  ;;  %v8224_v35 = vld [vmem:[#allocation3 + $0xa0] sm:$0xff]  ;;  %v8234_v37 = vld [vmem:[#allocation3 + $0x98] sm:$0xff]  ;;  %v8243_v38 = vld [vmem:[#allocation3 + $0x10] sm:$0xff] }
  0x31   :  { %5814 = vmatpush3.msra.mxu1 %v8123_v12  ;;  %5849 = vmatpush3.msra.mxu0 %v8125_v13  ;;  %10624 = vst [vmem:[#allocation12_spill] sm:$0xff] %v8224_v35  ;;  %10625 = vst [vmem:[#allocation13_spill] sm:$0xff] %v8234_v37  ;;  %v8248_v39 = vld [vmem:[#allocation3 + $0x90] sm:$0xff]  ;;  %v8256_v40 = vld [vmem:[#allocation3 + $0x8] sm:$0xff] }
  0x32   :  { %5815 = vmatprep.subr.mxu1 %v10568_v11  ;;  %5850 = vmatprep.subr.mxu0 %v10568_v11  ;;  %10626 = vst [vmem:[#allocation14_spill] sm:$0xff] %v8248_v39  ;;  %v8258_v41 = vld [vmem:[#allocation3 + $0x88] sm:$0xff]  ;;  %v8265_v42 = vld [vmem:[#allocation3] sm:$0xff]  ;;  %v8279_v44 = vld [vmem:[#allocation3 + $0x178] sm:$0xff] }
  0x33   :  { %5816 = vmatpush3.msra.mxu1 %v8129_v14  ;;  %5851 = vmatpush3.msra.mxu0 %v8131_v15  ;;  %10627 = vst [vmem:[#allocation15_spill] sm:$0xff] %v8258_v41  ;;  %v8269_v43 = vld [vmem:[#allocation3 + $0x80] sm:$0xff]  ;;  %v8284_v45 = vld [vmem:[#allocation3 + $0x170] sm:$0xff]  ;;  %v8291_v46 = vld [vmem:[#allocation3 + $0x168] sm:$0xff] }
  0x34   :  { %5817 = vmatprep.subr.mxu1 %v10568_v11  ;;  %5852 = vmatprep.subr.mxu0 %v10568_v11  ;;  %10628 = vst [vmem:[#allocation16_spill] sm:$0xff] %v8269_v43  ;;  %v8297_v47 = vld [vmem:[#allocation3 + $0x160] sm:$0xff]  ;;  %v8303_v48 = vld [vmem:[#allocation3 + $0x158] sm:$0xff]  ;;  %v8309_v49 = vld [vmem:[#allocation3 + $0x150] sm:$0xff] }
  0x35   :  { %5818 = vmatpush3.msra.mxu1 %v8137_v16  ;;  %5853 = vmatpush3.msra.mxu0 %v8139_v17  ;;  %v8315_v50 = vld [vmem:[#allocation3 + $0x148] sm:$0xff]  ;;  %v8321_v51 = vld [vmem:[#allocation3 + $0x140] sm:$0xff]  ;;  %v8327_v52 = vld [vmem:[#allocation3 + $0x138] sm:$0xff] }
  0x36   :  { %5819 = vmatprep.subr.mxu1 %v10568_v11  ;;  %5854 = vmatprep.subr.mxu0 %v10568_v11  ;;  %v8333_v53 = vld [vmem:[#allocation3 + $0x130] sm:$0xff]  ;;  %v8339_v54 = vld [vmem:[#allocation3 + $0x128] sm:$0xff]  ;;  %v8345_v55 = vld [vmem:[#allocation3 + $0x120] sm:$0xff] }
  0x37   :  { %5820 = vmatpush3.msra.mxu1 %v8145_v18  ;;  %5855 = vmatpush3.msra.mxu0 %v8147_v19  ;;  %v8351_v56 = vld [vmem:[#allocation3 + $0x118] sm:$0xff]  ;;  %v8357_v57 = vld [vmem:[#allocation3 + $0x110] sm:$0xff]  ;;  %v8363_v58 = vld [vmem:[#allocation3 + $0x108] sm:$0xff] }
  0x38   :  { %5821 = vmatprep.subr.mxu1 %v10568_v11  ;;  %5856 = vmatprep.subr.mxu0 %v10568_v11  ;;  %v8369_v59 = vld [vmem:[#allocation3 + $0x100] sm:$0xff] }
  0x39   :  { %5822 = vmatpush3.msra.mxu1 %v8153_v20  ;;  %5857 = vmatpush3.msra.mxu0 %v8155_v21  ;;  %v4766_v60 = vld [vmem:[%s10561_s3] ss:$0 sm:$0xff] }
  0x3a   :  { %5823 = vmatprep.subr.mxu1 %v10568_v11  ;;  %5858 = vmatprep.subr.mxu0 %v10568_v11 }
  0x3b   :  { %5824 = vmatpush3.msra.mxu1 %v8161_v22  ;;  %5859 = vmatpush3.msra.mxu0 %v8163_v23 }
  0x3c   :  { %5825 = vmatprep.subr.mxu1 %v10568_v11  ;;  %5860 = vmatprep.subr.mxu0 %v10568_v11 }
  0x3d   :  { %5826 = vmatpush3.msra.mxu1 %v8169_v24  ;;  %5861 = vmatpush3.msra.mxu0 %v8171_v25 }
  0x3e   :  { %5827 = vmatprep.subr.mxu1 %v10568_v11  ;;  %5862 = vmatprep.subr.mxu0 %v10568_v11 }
  0x3f   :  { %5828 = vmatpush3.msra.mxu1 %v8177_v26  ;;  %5863 = vmatpush3.msra.mxu0 %v8179_v27 }
  0x40   :  { %5829 = vmatprep.subr.mxu1 %v10568_v11  ;;  %5864 = vmatprep.subr.mxu0 %v10568_v11 }
  0x41   :  { %5830 = vmatpush3.msra.mxu1 %v8185_v28  ;;  %5865 = vmatpush3.msra.mxu0 %v8187_v29 }
  0x42   :  { %5790 = vmatprep.mubr.msk.f32.mxu1 %vm89_vm0, %v8085_v6  ;;  %5831 = vmatprep.subr.mxu1 %v10568_v11 }
  0x43   :  { %5866 = vmatprep.subr.mxu0 %v10568_v11  ;;  %5791 = vmatmul.mubr.msk.f32.gmra.mxu1 %vm89_vm0, %v8106_v9 }
  0x44   :  { %5804 = vmatprep.mubr.msk.f32.mxu0 %vm89_vm0, %v8085_v6  ;;  %5832 = vmatpush3.msra.mxu1 %v8195_v30 }
  0x45   :  { %5867 = vmatpush3.msra.mxu0 %v8200_v31  ;;  %5833 = vmatprep.subr.mxu1 %v10568_v11 }
  0x46   :  { %5805 = vmatmul.mubr.msk.f32.gmra.mxu0 %vm89_vm0, %v8106_v9  ;;  %5868 = vmatprep.subr.mxu0 %v10568_v11  ;;  %v4777_v9 = vld [vmem:[%s10561_s3 + $0x1] ss:$0 sm:$0xff] }
  0x47   :  { %5834 = vmatpush3.msra.mxu1 %v8208_v32  ;;  %5869 = vmatpush3.msra.mxu0 %v8210_v33 }
  0x48   :  { %5793 = vmatprep.mubr.msk.f32.mxu1 %vm89_vm0, %v8069_v2  ;;  %5835 = vmatprep.subr.mxu1 %v10568_v11 }
  0x49   :  { %5870 = vmatprep.subr.mxu0 %v10568_v11  ;;  %5794 = vmatmul.mubr.msk.f32.gmra.mxu1 %vm89_vm0, %v8077_v4 }
  0x4a   :  { %5807 = vmatprep.mubr.msk.f32.mxu0 %vm89_vm0, %v8069_v2  ;;  %5836 = vmatpush3.msra.mxu1 %v8219_v34 }
  0x4b   :  { %5871 = vmatpush3.msra.mxu0 %v8224_v35  ;;  %5837 = vmatprep.subr.mxu1 %v10568_v11 }
  0x4c   :  { %5808 = vmatmul.mubr.msk.f32.gmra.mxu0 %vm89_vm0, %v8077_v4  ;;  %5872 = vmatprep.subr.mxu0 %v10568_v11 }
  0x4d   :  { %5838 = vmatpush3.msra.mxu1 %v8232_v36  ;;  %5873 = vmatpush3.msra.mxu0 %v8234_v37 }
  0x4e   :  { %5796 = vmatprep.mubr.msk.f32.mxu1 %vm89_vm0, %v8093_v7  ;;  %5839 = vmatprep.subr.mxu1 %v10568_v11 }
  0x4f   :  { %5874 = vmatprep.subr.mxu0 %v10568_v11  ;;  %5797 = vmatmul.mubr.msk.f32.gmra.mxu1 %vm89_vm0, %v8111_v10 }
  0x50   :  { %5810 = vmatprep.mubr.msk.f32.mxu0 %vm89_vm0, %v8093_v7  ;;  %5840 = vmatpush3.msra.mxu1 %v8243_v38 }
  0x51   :  { %5875 = vmatpush3.msra.mxu0 %v8248_v39  ;;  %5841 = vmatprep.subr.mxu1 %v10568_v11 }
  0x52   :  { %5811 = vmatmul.mubr.msk.f32.gmra.mxu0 %vm89_vm0, %v8111_v10  ;;  %5876 = vmatprep.subr.mxu0 %v10568_v11 }
  0x53   :  { %5842 = vmatpush3.msra.mxu1 %v8256_v40  ;;  %5877 = vmatpush3.msra.mxu0 %v8258_v41 }
  0x54   :  { %5843 = vmatprep.subr.mxu1 %v10568_v11  ;;  %5878 = vmatprep.subr.mxu0 %v10568_v11 }
  0x55   :  { %5844 = vmatpush3.msra.mxu1 %v8265_v42  ;;  %5845 = vmatprep.mubr.msk.f32.mxu1 %vm8000_vm1, %v10568_v11 }
  0x56   :  { %5879 = vmatpush3.msra.mxu0 %v8269_v43  ;;  %5880 = vmatprep.mubr.msk.f32.mxu0 %vm8000_vm1, %v10568_v11 }
  0x57   :  { %5846 = vmatmul.mubr.f32.vlgmr.msra.gmra.mxu1 %v10568_v11  ;;  %5881 = vmatmul.mubr.f32.vlgmr.msra.gmra.mxu0 %v10568_v11 }
  0x58   :  { %5883 = vmatprep.subr.mxu1 %v10568_v11  ;;  %5915 = vmatprep.mubr.msk.f32.mxu1 %vm8000_vm1, %v10568_v11 }
  0x59   :  { %5884 = vmatpush3.msra.mxu1 %v8279_v44  ;;  %5918 = vmatprep.subr.mxu0 %v10568_v11 }
  0x5a   :  { %5885 = vmatprep.subr.mxu1 %v10568_v11  ;;  %5919 = vmatpush3.msra.mxu0 %v8123_v12 }
  0x5b   :  { %5886 = vmatpush3.msra.mxu1 %v8284_v45  ;;  %5920 = vmatprep.subr.mxu0 %v10568_v11 }
  0x5c   :  { %5887 = vmatprep.subr.mxu1 %v10568_v11  ;;  %5921 = vmatpush3.msra.mxu0 %v8129_v14 }
  0x5d   :  { %5888 = vmatpush3.msra.mxu1 %v8291_v46  ;;  %5922 = vmatprep.subr.mxu0 %v10568_v11 }
  0x5e   :  { %5889 = vmatprep.subr.mxu1 %v10568_v11  ;;  %5923 = vmatpush3.msra.mxu0 %v8137_v16 }
  0x5f   :  { %5890 = vmatpush3.msra.mxu1 %v8297_v47  ;;  %5924 = vmatprep.subr.mxu0 %v10568_v11 }
  0x60   :  { %5891 = vmatprep.subr.mxu1 %v10568_v11  ;;  %5925 = vmatpush3.msra.mxu0 %v8145_v18 }
  0x61   :  { %5892 = vmatpush3.msra.mxu1 %v8303_v48  ;;  %5926 = vmatprep.subr.mxu0 %v10568_v11 }
  0x62   :  { %5893 = vmatprep.subr.mxu1 %v10568_v11  ;;  %5927 = vmatpush3.msra.mxu0 %v8153_v20 }
  0x63   :  { %5894 = vmatpush3.msra.mxu1 %v8309_v49  ;;  %5928 = vmatprep.subr.mxu0 %v10568_v11 }
  0x64   :  { %5895 = vmatprep.subr.mxu1 %v10568_v11  ;;  %5929 = vmatpush3.msra.mxu0 %v8161_v22 }
  0x65   :  { %5896 = vmatpush3.msra.mxu1 %v8315_v50  ;;  %5930 = vmatprep.subr.mxu0 %v10568_v11 }
  0x66   :  { %5897 = vmatprep.subr.mxu1 %v10568_v11  ;;  %5931 = vmatpush3.msra.mxu0 %v8169_v24 }
  0x67   :  { %5898 = vmatpush3.msra.mxu1 %v8321_v51  ;;  %5932 = vmatprep.subr.mxu0 %v10568_v11 }
  0x68   :  { %5899 = vmatprep.subr.mxu1 %v10568_v11  ;;  %5933 = vmatpush3.msra.mxu0 %v8177_v26 }
  0x69   :  { %5900 = vmatpush3.msra.mxu1 %v8327_v52  ;;  %5934 = vmatprep.subr.mxu0 %v10568_v11 }
  0x6a   :  { %5901 = vmatprep.subr.mxu1 %v10568_v11  ;;  %5935 = vmatpush3.msra.mxu0 %v8185_v28 }
  0x6b   :  { %5902 = vmatpush3.msra.mxu1 %v8333_v53  ;;  %5936 = vmatprep.subr.mxu0 %v10568_v11 }
  0x6c   :  { %5903 = vmatprep.subr.mxu1 %v10568_v11  ;;  %5937 = vmatpush3.msra.mxu0 %v8195_v30 }
  0x6d   :  { %5904 = vmatpush3.msra.mxu1 %v8339_v54  ;;  %5938 = vmatprep.subr.mxu0 %v10568_v11 }
  0x6e   :  { %5905 = vmatprep.subr.mxu1 %v10568_v11  ;;  %5939 = vmatpush3.msra.mxu0 %v8208_v32 }
  0x6f   :  { %5906 = vmatpush3.msra.mxu1 %v8345_v55  ;;  %5940 = vmatprep.subr.mxu0 %v10568_v11 }
  0x70   :  { %5907 = vmatprep.subr.mxu1 %v10568_v11  ;;  %5941 = vmatpush3.msra.mxu0 %v8219_v34 }
  0x71   :  { %5908 = vmatpush3.msra.mxu1 %v8351_v56  ;;  %5942 = vmatprep.subr.mxu0 %v10568_v11 }
  0x72   :  { %5909 = vmatprep.subr.mxu1 %v10568_v11  ;;  %5943 = vmatpush3.msra.mxu0 %v8232_v36 }
  0x73   :  { %5910 = vmatpush3.msra.mxu1 %v8357_v57  ;;  %5944 = vmatprep.subr.mxu0 %v10568_v11 }
  0x74   :  { %5911 = vmatprep.subr.mxu1 %v10568_v11  ;;  %5945 = vmatpush3.msra.mxu0 %v8243_v38 }
  0x75   :  { %5912 = vmatpush3.msra.mxu1 %v8363_v58  ;;  %5946 = vmatprep.subr.mxu0 %v10568_v11 }
  0x76   :  { %5913 = vmatprep.subr.mxu1 %v10568_v11  ;;  %5947 = vmatpush3.msra.mxu0 %v8256_v40 }
  0x77   :  { %5914 = vmatpush3.msra.mxu1 %v8369_v59  ;;  %5948 = vmatprep.subr.mxu0 %v10568_v11 }
  0x78   :  { %5916 = vmatmul.mubr.f32.vlgmr.msra.gmra.mxu1 %v10568_v11  ;;  %5953 = vmatprep.subr.mxu1 %v10568_v11 }
  0x79   :  { %5954 = vmatpush3.msra.mxu1 %v8125_v13  ;;  %5949 = vmatpush3.msra.mxu0 %v8265_v42 }
  0x7a   :  { %5955 = vmatprep.subr.mxu1 %v10568_v11  ;;  %5950 = vmatprep.mubr.msk.f32.mxu0 %vm8000_vm1, %v10568_v11 }
  0x7b   :  { %5956 = vmatpush3.msra.mxu1 %v8131_v15  ;;  %5985 = vmatprep.mubr.msk.f32.mxu1 %vm8000_vm1, %v10568_v11 }
  0x7c   :  { %5957 = vmatprep.subr.mxu1 %v10568_v11  ;;  %5988 = vmatprep.subr.mxu0 %v10568_v11 }
  0x7d   :  { %5958 = vmatpush3.msra.mxu1 %v8139_v17 }
  0x7e   :  { %5959 = vmatprep.subr.mxu1 %v10568_v11 }
  0x7f   :  { %5960 = vmatpush3.msra.mxu1 %v8147_v19 }
  0x80   :  { %5961 = vmatprep.subr.mxu1 %v10568_v11 }
  0x81   :  { %5962 = vmatpush3.msra.mxu1 %v8155_v21 }
  0x82   :  { %5963 = vmatprep.subr.mxu1 %v10568_v11 }
  0x83   :  { %5964 = vmatpush3.msra.mxu1 %v8163_v23 }
  0x84   :  { %5965 = vmatprep.subr.mxu1 %v10568_v11 }
  0x85   :  { %5966 = vmatpush3.msra.mxu1 %v8171_v25 }
  0x86   :  { %5967 = vmatprep.subr.mxu1 %v10568_v11 }
  0x87   :  { %5968 = vmatpush3.msra.mxu1 %v8179_v27 }
  0x88   :  { %5969 = vmatprep.subr.mxu1 %v10568_v11 }
  0x89   :  { %5970 = vmatpush3.msra.mxu1 %v8187_v29 }
  0x8a   :  { %5971 = vmatprep.subr.mxu1 %v10568_v11 }
  0x8b   :  { %5972 = vmatpush3.msra.mxu1 %v8200_v31 }
  0x8c   :  { %5973 = vmatprep.subr.mxu1 %v10568_v11 }
  0x8d   :  { %5974 = vmatpush3.msra.mxu1 %v8210_v33 }
  0x8e   :  { %5975 = vmatprep.subr.mxu1 %v10568_v11 }
  0x8f   :  { %5976 = vmatpush3.msra.mxu1 %v8224_v35 }
  0x90   :  { %5977 = vmatprep.subr.mxu1 %v10568_v11 }
  0x91   :  { %5978 = vmatpush3.msra.mxu1 %v8234_v37 }
  0x92   :  { %5979 = vmatprep.subr.mxu1 %v10568_v11 }
  0x93   :  { %5980 = vmatpush3.msra.mxu1 %v8248_v39 }
  0x94   :  { %5981 = vmatprep.subr.mxu1 %v10568_v11 }
  0x95   :  { %5982 = vmatpush3.msra.mxu1 %v8258_v41 }
  0x96   :  { %5983 = vmatprep.subr.mxu1 %v10568_v11 }
  0x97   :  { %5984 = vmatpush3.msra.mxu1 %v8269_v43 }
  0x98   :  { %6023 = vmatprep.subr.mxu1 %v10568_v11 }
  0xe8   :  { %v5781_v61 = vpop.f32.mrf.mxu1  ;;  %v5775_v62 = vpop.f32.mrf.mxu0 }
  0xe9   :  { %v8421_v63 = vadd.f32 %v5781_v61, %v4766_v60  ;;  %v8423_v0 = vadd.f32 %v5775_v62, %v4766_v60  ;;  %v4788_v61 = vld [vmem:[%s10561_s3 + $0x2] ss:$0 sm:$0xff] }
  0xea   :  { %v200_v1 = vpop.f32.mrf.mxu1  ;;  %v180_v2 = vpop.f32.mrf.mxu0 }
  0xeb   :  { %10629 = vst [vmem:[#allocation17_spill] sm:$0xff] %v8421_v63  ;;  %10630 = vst [vmem:[#allocation18_spill] sm:$0xff] %v8423_v0  ;;  %v8425_v3 = vadd.f32 %v4766_v60, %v200_v1 }
  0xec   :  { %v5784_v4 = vpop.f32.mrf.mxu1  ;;  %v5778_v5 = vpop.f32.mrf.mxu0 }
  0xed   :  { %10631 = vst [vmem:[#allocation19_spill] sm:$0xff] %v8425_v3  ;;  %v8427_v6 = vadd.f32 %v5784_v4, %v4766_v60  ;;  %v8429_v7 = vadd.f32 %v5778_v5, %v4766_v60 }
  0xee   :  { %v210_v8 = vpop.f32.mrf.mxu1  ;;  %v190_v10 = vpop.f32.mrf.mxu0 }
  0xef   :  { %10632 = vst [vmem:[#allocation20_spill] sm:$0xff] %v8427_v6  ;;  %10633 = vst [vmem:[#allocation21_spill] sm:$0xff] %v8429_v7  ;;  %v8437_v62 = vadd.f32 %v4766_v60, %v210_v8  ;;  %v8439_v1 = vadd.f32 %v4766_v60, %v190_v10 }
  0xf0   :  { %v5789_v11 = vpop.f32.mrf.mxu1  ;;  %v5803_v63 = vpop.f32.mrf.mxu0 }
  0xf1   :  { %10634 = vst [vmem:[#allocation22_spill] sm:$0xff] %v8437_v62  ;;  %10635 = vst [vmem:[#allocation23_spill] sm:$0xff] %v8439_v1  ;;  %v8441_v4 = vadd.f32 %v5789_v11, %v4777_v9  ;;  %v8443_v5 = vadd.f32 %v5803_v63, %v4788_v61 }
  0xf2   :  { %v295_v6 = vpop.f32.mrf.mxu1  ;;  %v410_v3 = vpop.f32.mrf.mxu0 }
  0xf3   :  { %10636 = vst [vmem:[#allocation24_spill] sm:$0xff] %v8441_v4  ;;  %10637 = vst [vmem:[#allocation25_spill] sm:$0xff] %v8443_v5 }
 0x103   :  { %v5792_v7 = vpop.f32.mrf.mxu1 }
 0x104   :  { %v8445_v0 = vadd.f32 %v5792_v7, %v4777_v9 }
 0x105   :  { %v305_v43 = vpop.f32.mrf.mxu1 }
 0x106   :  { %10638 = vst [vmem:[#allocation26_spill] sm:$0xff] %v8445_v0  ;;  %v5806_v41 = vpop.f32.mrf.mxu0  ;;  %v8447_v39 = vadd.f32 %v4777_v9, %v305_v43 }
 0x107   :  { %v8449_v37 = vadd.f32 %v5806_v41, %v4788_v61 }
 0x108   :  { %10639 = vst [vmem:[#allocation27_spill] sm:$0xff] %v8447_v39  ;;  %v420_v8 = vpop.f32.mrf.mxu0 }
 0x109   :  { %10640 = vst [vmem:[#allocation28_spill] sm:$0xff] %v8449_v37  ;;  %v8451_v10 = vadd.f32 %v4788_v61, %v420_v8  ;;  %v5795_v62 = vpop.f32.mrf.mxu1 }
 0x10a   :  { %v8453_v1 = vadd.f32 %v5795_v62, %v4777_v9 }
 0x10b   :  { %10641 = vst [vmem:[#allocation29_spill] sm:$0xff] %v8451_v10  ;;  %v315_v11 = vpop.f32.mrf.mxu1  ;;  %v181_v10 = vadd.f32 %v4766_v60, %v180_v2 }
 0x10c   :  { %10642 = vst [vmem:[#allocation30_spill] sm:$0xff] %v8453_v1  ;;  %v5809_v63 = vpop.f32.mrf.mxu0  ;;  %v8455_v5 = vadd.f32 %v4777_v9, %v315_v11 }
 0x10d   :  { %v8457_v4 = vadd.f32 %v5809_v63, %v4788_v61 }
 0x10e   :  { %10643 = vst [vmem:[#allocation31_spill] sm:$0xff] %v8455_v5  ;;  %v430_v7 = vpop.f32.mrf.mxu0 }
 0x10f   :  { %10644 = vst [vmem:[#allocation32_spill] sm:$0xff] %v8457_v4  ;;  %v8459_v0 = vadd.f32 %v4788_v61, %v430_v7  ;;  %v5798_v35 = vpop.f32.mrf.mxu1 }
 0x110   :  { %v8461_v43 = vadd.f32 %v5798_v35, %v4777_v9 }
 0x111   :  { %10645 = vst [vmem:[#allocation33_spill] sm:$0xff] %v8459_v0  ;;  %v325_v41 = vpop.f32.mrf.mxu1  ;;  %v296_v0 = vadd.f32 %v4777_v9, %v295_v6 }
 0x112   :  { %10646 = vst [vmem:[#allocation34_spill] sm:$0xff] %v8461_v43  ;;  %v5812_v37 = vpop.f32.mrf.mxu0  ;;  %v8463_v39 = vadd.f32 %v4777_v9, %v325_v41 }
 0x113   :  { %v8465_v8 = vadd.f32 %v5812_v37, %v4788_v61 }
 0x114   :  { %10647 = vst [vmem:[#allocation35_spill] sm:$0xff] %v8463_v39  ;;  %v440_v62 = vpop.f32.mrf.mxu0 }
 0x115   :  { %10648 = vst [vmem:[#allocation36_spill] sm:$0xff] %v8465_v8  ;;  %v8467_v1 = vadd.f32 %v4788_v61, %v440_v62  ;;  %v8472_v62 = vld [vmem:[%s10561_s3 + $0x3] ss:$0 sm:$0xff] }
 0x117   :  { %10649 = vst [vmem:[#allocation37_spill] sm:$0xff] %v8467_v1  ;;  %v567_v11 = vpop.f32.mrf.mxu1  ;;  %v637_v5 = vpop.f32.mrf.mxu0 }
 0x118   :  { %v717_v63 = vadd.f32 %v567_v11, %v181_v10  ;;  %v724_v35 = vadd.f32 %v637_v5, %v296_v0  ;;  %v411_v11 = vadd.f32 %v4788_v61, %v410_v3  ;;  %v10652_v3 = vld [vmem:[#allocation10_spill] sm:$0xff]  ;;  %v10653_v61 = vld [vmem:[#allocation11_spill] sm:$0xff] }
 0x119   :  { %v5847_v4 = vpop.f32.mrf.mxu1  ;;  %v5882_v33 = vpop.f32.mrf.mxu0 }
 0x11a   :  { %v4799_v7 = vmul.f32 -1.442695, %v717_v63  ;;  %v4800_v43 = vmul.f32 -1.442695, %v724_v35  ;;  %v10651_v35 = vmov 0.0  }
 0x11c   :  { %7669 = vpow2.f32 %v4799_v7 }
 0x11d   :  { %7671 = vpow2.f32 %v4800_v43 }
 0x129   :  { %v7670_v31 = vpop.eup %7669 }
 0x12a   :  { %v721_v41 = vadd.f32 1.0, %v7670_v31  ;;  %v7672_v37 = vpop.eup %7671 }
 0x12b   :  { %v728_v60 = vadd.f32 1.0, %v7672_v37  ;;  %v10655_v37 = vld [vmem:[#allocation13_spill] sm:$0xff] }
 0x12c   :  { %7673 = vrcp.f32 %v721_v41  ;;  %v10654_v41 = vld [vmem:[#allocation12_spill] sm:$0xff] }
 0x12d   :  { %7675 = vrcp.f32 %v728_v60  ;;  %v10656_v60 = vld [vmem:[#allocation14_spill] sm:$0xff] }
 0x138   :  { %v713_v2 = vpop.f32.mrf.mxu1 }
 0x139   :  { %v7674_v10 = vpop.eup %7673  ;;  %v714_v33 = vadd.f32 %v8472_v62, %v713_v2  ;;  %v10657_v2 = vld [vmem:[#allocation15_spill] sm:$0xff] }
 0x13a   :  { %v5917_v4 = vpop.f32.mrf.mxu1  ;;  %v7676_v9 = vpop.eup %7675 }
 0x13b   :  { %v731_v0 = vmul.f32 %v7674_v10, %v714_v33  ;;  %v734_v31 = vsub.f32 1.0, %v7676_v9  ;;  %v736_v43 = vmul.f32 0.0, %v7676_v9  ;;  %v10658_v10 = vld [vmem:[#allocation16_spill] sm:$0xff] }
 0x13d   :  { %v732_v6 = vadd.f32 %v731_v0, %v411_v11  ;;  %v10659_v11 = vld [vmem:[#allocation18_spill] sm:$0xff] }
 0x13f   :  { %7677 = vtanh.f32 %v732_v6 }
 0x14c   :  { %v7678_v5 = vpop.eup %7677 }
 0x14d   :  { %v735_v63 = vmul.f32 %v7678_v5, %v734_v31  ;;  %v10660_v5 = vld [vmem:[#allocation24_spill] sm:$0xff] }
 0x14f   :  { %v8475_v7 = vadd.f32 %v736_v43, %v735_v63 }
 0x151   :  { %10650 = vst [vmem:[#allocation38_spill] sm:$0xff] %v8475_v7  ;;  %5951 = vmatmul.mubr.f32.vlgmr.msra.gmra.mxu0 %v8475_v7  ;;  %5986 = vmatmul.mubr.f32.vlgmr.msra.gmra.mxu1 %v8475_v7 }
 0x152   :  { %5989 = vmatpush3.msra.mxu0 %v8279_v44  ;;  %6020 = vmatprep.mubr.msk.f32.mxu0 %vm8000_vm1, %v10651_v35 }
 0x153   :  { %5990 = vmatprep.subr.mxu0 %v10651_v35  ;;  %6024 = vmatpush3.msra.mxu1 %v8123_v12 }
 0x154   :  { %5991 = vmatpush3.msra.mxu0 %v8284_v45  ;;  %6025 = vmatprep.subr.mxu1 %v10651_v35 }
 0x155   :  { %5992 = vmatprep.subr.mxu0 %v10651_v35  ;;  %6026 = vmatpush3.msra.mxu1 %v8129_v14 }
 0x156   :  { %5993 = vmatpush3.msra.mxu0 %v8291_v46  ;;  %6027 = vmatprep.subr.mxu1 %v10651_v35 }
 0x157   :  { %5994 = vmatprep.subr.mxu0 %v10651_v35  ;;  %6028 = vmatpush3.msra.mxu1 %v8137_v16 }
 0x158   :  { %5995 = vmatpush3.msra.mxu0 %v8297_v47  ;;  %6029 = vmatprep.subr.mxu1 %v10651_v35 }
 0x159   :  { %5996 = vmatprep.subr.mxu0 %v10651_v35  ;;  %6030 = vmatpush3.msra.mxu1 %v8145_v18 }
 0x15a   :  { %5997 = vmatpush3.msra.mxu0 %v8303_v48  ;;  %6031 = vmatprep.subr.mxu1 %v10651_v35 }
 0x15b   :  { %5998 = vmatprep.subr.mxu0 %v10651_v35  ;;  %6032 = vmatpush3.msra.mxu1 %v8153_v20 }
 0x15c   :  { %5999 = vmatpush3.msra.mxu0 %v8309_v49  ;;  %6033 = vmatprep.subr.mxu1 %v10651_v35 }
 0x15d   :  { %6000 = vmatprep.subr.mxu0 %v10651_v35  ;;  %6034 = vmatpush3.msra.mxu1 %v8161_v22 }
 0x15e   :  { %6001 = vmatpush3.msra.mxu0 %v8315_v50  ;;  %6035 = vmatprep.subr.mxu1 %v10651_v35 }
 0x15f   :  { %6002 = vmatprep.subr.mxu0 %v10651_v35  ;;  %6036 = vmatpush3.msra.mxu1 %v8169_v24 }
 0x160   :  { %6003 = vmatpush3.msra.mxu0 %v8321_v51  ;;  %6037 = vmatprep.subr.mxu1 %v10651_v35 }
 0x161   :  { %6004 = vmatprep.subr.mxu0 %v10651_v35  ;;  %6038 = vmatpush3.msra.mxu1 %v8177_v26 }
 0x162   :  { %6005 = vmatpush3.msra.mxu0 %v8327_v52  ;;  %6039 = vmatprep.subr.mxu1 %v10651_v35 }
 0x163   :  { %6006 = vmatprep.subr.mxu0 %v10651_v35  ;;  %6040 = vmatpush3.msra.mxu1 %v8185_v28 }
 0x164   :  { %6007 = vmatpush3.msra.mxu0 %v8333_v53  ;;  %6041 = vmatprep.subr.mxu1 %v10651_v35 }
 0x165   :  { %6008 = vmatprep.subr.mxu0 %v10651_v35  ;;  %6042 = vmatpush3.msra.mxu1 %v8195_v30 }
 0x166   :  { %6009 = vmatpush3.msra.mxu0 %v8339_v54  ;;  %6043 = vmatprep.subr.mxu1 %v10651_v35 }
 0x167   :  { %6010 = vmatprep.subr.mxu0 %v10651_v35  ;;  %6044 = vmatpush3.msra.mxu1 %v8208_v32 }
 0x168   :  { %6011 = vmatpush3.msra.mxu0 %v8345_v55  ;;  %6045 = vmatprep.subr.mxu1 %v10651_v35 }
 0x169   :  { %6012 = vmatprep.subr.mxu0 %v10651_v35  ;;  %6046 = vmatpush3.msra.mxu1 %v8219_v34 }
 0x16a   :  { %6013 = vmatpush3.msra.mxu0 %v8351_v56  ;;  %6047 = vmatprep.subr.mxu1 %v10651_v35 }
 0x16b   :  { %6014 = vmatprep.subr.mxu0 %v10651_v35  ;;  %6048 = vmatpush3.msra.mxu1 %v8232_v36 }
 0x16c   :  { %6015 = vmatpush3.msra.mxu0 %v8357_v57  ;;  %6049 = vmatprep.subr.mxu1 %v10651_v35 }
 0x16d   :  { %6016 = vmatprep.subr.mxu0 %v10651_v35  ;;  %6050 = vmatpush3.msra.mxu1 %v8243_v38 }
 0x16e   :  { %6017 = vmatpush3.msra.mxu0 %v8363_v58  ;;  %6051 = vmatprep.subr.mxu1 %v10651_v35 }
 0x16f   :  { %6018 = vmatprep.subr.mxu0 %v10651_v35  ;;  %6052 = vmatpush3.msra.mxu1 %v8256_v40 }
 0x170   :  { %6019 = vmatpush3.msra.mxu0 %v8369_v59  ;;  %6053 = vmatprep.subr.mxu1 %v10651_v35 }
 0x171   :  { %6021 = vmatmul.mubr.f32.vlgmr.msra.gmra.mxu0 %v8475_v7  ;;  %6058 = vmatprep.subr.mxu0 %v10651_v35 }
 0x172   :  { %6059 = vmatpush3.msra.mxu0 %v8125_v13  ;;  %6054 = vmatpush3.msra.mxu1 %v8265_v42 }
 0x173   :  { %6060 = vmatprep.subr.mxu0 %v10651_v35  ;;  %6055 = vmatprep.mubr.msk.f32.mxu1 %vm8000_vm1, %v10651_v35 }
 0x174   :  { %6061 = vmatpush3.msra.mxu0 %v8131_v15  ;;  %6090 = vmatprep.mubr.msk.f32.mxu0 %vm8000_vm1, %v10651_v35 }
 0x175   :  { %6062 = vmatprep.subr.mxu0 %v10651_v35  ;;  %6093 = vmatprep.subr.mxu1 %v10651_v35 }
 0x176   :  { %6063 = vmatpush3.msra.mxu0 %v8139_v17 }
 0x177   :  { %6064 = vmatprep.subr.mxu0 %v10651_v35 }
 0x178   :  { %6065 = vmatpush3.msra.mxu0 %v8147_v19 }
 0x179   :  { %6066 = vmatprep.subr.mxu0 %v10651_v35 }
 0x17a   :  { %6067 = vmatpush3.msra.mxu0 %v8155_v21 }
 0x17b   :  { %6068 = vmatprep.subr.mxu0 %v10651_v35 }
 0x17c   :  { %6069 = vmatpush3.msra.mxu0 %v8163_v23 }
 0x17d   :  { %6070 = vmatprep.subr.mxu0 %v10651_v35 }
 0x17e   :  { %6071 = vmatpush3.msra.mxu0 %v8171_v25 }
 0x17f   :  { %6072 = vmatprep.subr.mxu0 %v10651_v35 }
 0x180   :  { %6073 = vmatpush3.msra.mxu0 %v8179_v27 }
 0x181   :  { %6074 = vmatprep.subr.mxu0 %v10651_v35 }
 0x182   :  { %6075 = vmatpush3.msra.mxu0 %v8187_v29 }
 0x183   :  { %6076 = vmatprep.subr.mxu0 %v10651_v35 }
 0x184   :  { %6077 = vmatpush3.msra.mxu0 %v10652_v3 }
 0x185   :  { %6078 = vmatprep.subr.mxu0 %v10651_v35 }
 0x186   :  { %6079 = vmatpush3.msra.mxu0 %v10653_v61 }
 0x187   :  { %6080 = vmatprep.subr.mxu0 %v10651_v35 }
 0x188   :  { %6081 = vmatpush3.msra.mxu0 %v10654_v41 }
 0x189   :  { %6082 = vmatprep.subr.mxu0 %v10651_v35 }
 0x18a   :  { %6083 = vmatpush3.msra.mxu0 %v10655_v37 }
 0x18b   :  { %6084 = vmatprep.subr.mxu0 %v10651_v35 }
 0x18c   :  { %6085 = vmatpush3.msra.mxu0 %v10656_v60 }
 0x18d   :  { %6086 = vmatprep.subr.mxu0 %v10651_v35 }
 0x18e   :  { %6087 = vmatpush3.msra.mxu0 %v10657_v2 }
 0x18f   :  { %6088 = vmatprep.subr.mxu0 %v10651_v35 }
 0x190   :  { %6089 = vmatpush3.msra.mxu0 %v10658_v10 }
 0x191   :  { %6128 = vmatprep.subr.mxu0 %v10651_v35 }
 0x211   :  { %v805_v33 = vpop.f32.mrf.mxu0  ;;  %v875_v4 = vpop.f32.mrf.mxu1 }
 0x212   :  { %v949_v0 = vadd.f32 %v805_v33, %v10659_v11  ;;  %v956_v43 = vadd.f32 %v875_v4, %v10660_v5  ;;  %v10661_v11 = vld [vmem:[#allocation25_spill] sm:$0xff] }
 0x213   :  { %v5952_v6 = vpop.f32.mrf.mxu0  ;;  %v5987_v9 = vpop.f32.mrf.mxu1 }
 0x214   :  { %v4801_v31 = vmul.f32 -1.442695, %v949_v0  ;;  %v4802_v63 = vmul.f32 -1.442695, %v956_v43  ;;  %v8814_v43 = vld [vmem:[#allocation3 + $0xe8] sm:$0xff] }
 0x216   :  { %7679 = vpow2.f32 %v4801_v31 }
 0x217   :  { %7681 = vpow2.f32 %v4802_v63  ;;  %v8818_v63 = vld [vmem:[#allocation3 + $0xe0] sm:$0xff] }
 0x223   :  { %v7680_v8 = vpop.eup %7679 }
 0x224   :  { %v953_v1 = vadd.f32 1.0, %v7680_v8  ;;  %v7682_v39 = vpop.eup %7681 }
 0x225   :  { %v960_v2 = vadd.f32 1.0, %v7682_v39 }
 0x226   :  { %7683 = vrcp.f32 %v953_v1 }
 0x227   :  { %7685 = vrcp.f32 %v960_v2  ;;  %v8707_v2 = vld [vmem:[#allocation3 + $0x78] sm:$0xff] }
 0x231   :  { %v945_v10 = vpop.f32.mrf.mxu0 }
 0x232   :  { %v946_v60 = vadd.f32 %v8472_v62, %v945_v10  ;;  %v8713_v10 = vld [vmem:[#allocation3 + $0x70] sm:$0xff] }
 0x233   :  { %v7684_v37 = vpop.eup %7683  ;;  %v6022_v41 = vpop.f32.mrf.mxu0 }
 0x234   :  { %v963_v33 = vmul.f32 %v7684_v37, %v946_v60  ;;  %v7686_v0 = vpop.eup %7685 }
 0x235   :  { %v966_v9 = vsub.f32 1.0, %v7686_v0  ;;  %v968_v31 = vmul.f32 %v7686_v0, %v8475_v7  ;;  %v8834_v0 = vld [vmem:[#allocation3 + $0xc0] sm:$0xff] }
 0x236   :  { %v964_v6 = vadd.f32 %v963_v33, %v10661_v11  ;;  %v8822_v33 = vld [vmem:[#allocation3 + $0xd8] sm:$0xff]  ;;  %v8826_v11 = vld [vmem:[#allocation3 + $0xd0] sm:$0xff] }
 0x238   :  { %7687 = vtanh.f32 %v964_v6  ;;  %v8830_v6 = vld [vmem:[#allocation3 + $0xc8] sm:$0xff] }
 0x245   :  { %v7688_v4 = vpop.eup %7687 }
 0x246   :  { %v967_v5 = vmul.f32 %v7688_v4, %v966_v9  ;;  %v8838_v9 = vld [vmem:[#allocation3 + $0xb8] sm:$0xff]  ;;  %v8842_v4 = vld [vmem:[#allocation3 + $0xb0] sm:$0xff] }
 0x248   :  { %v8587_v8 = vadd.f32 %v968_v31, %v967_v5  ;;  %v8846_v31 = vld [vmem:[#allocation3 + $0xa8] sm:$0xff]  ;;  %v8850_v5 = vld [vmem:[#allocation3 + $0xa0] sm:$0xff] }
 0x249   :  { %10672 = vst [vmem:[#allocation18_spill] sm:$0xff] %v8850_v5 }
 0x24a   :  { %10662 = vst [vmem:[#allocation10_spill] sm:$0xff] %v8587_v8  ;;  %6056 = vmatmul.mubr.f32.vlgmr.msra.gmra.mxu1 %v8587_v8  ;;  %6091 = vmatmul.mubr.f32.vlgmr.msra.gmra.mxu0 %v8587_v8 }
 0x24b   :  { %6094 = vmatpush3.msra.mxu1 %v8279_v44  ;;  %6125 = vmatprep.mubr.msk.f32.mxu1 %vm8000_vm1, %v10651_v35 }
 0x24c   :  { %6095 = vmatprep.subr.mxu1 %v10651_v35  ;;  %6129 = vmatpush3.msra.mxu0 %v8123_v12  ;;  %v10663_v12 = vld [vmem:[#allocation12_spill] sm:$0xff] }
 0x24d   :  { %6096 = vmatpush3.msra.mxu1 %v8284_v45  ;;  %6130 = vmatprep.subr.mxu0 %v10651_v35 }
 0x24e   :  { %6097 = vmatprep.subr.mxu1 %v10651_v35  ;;  %6131 = vmatpush3.msra.mxu0 %v8129_v14  ;;  %v10665_v14 = vld [vmem:[#allocation14_spill] sm:$0xff] }
 0x24f   :  { %6098 = vmatpush3.msra.mxu1 %v8291_v46  ;;  %6132 = vmatprep.subr.mxu0 %v10651_v35 }
 0x250   :  { %6099 = vmatprep.subr.mxu1 %v10651_v35  ;;  %6133 = vmatpush3.msra.mxu0 %v8137_v16  ;;  %v10667_v16 = vld [vmem:[#allocation16_spill] sm:$0xff] }
 0x251   :  { %6100 = vmatpush3.msra.mxu1 %v8297_v47  ;;  %6134 = vmatprep.subr.mxu0 %v10651_v35 }
 0x252   :  { %6101 = vmatprep.subr.mxu1 %v10651_v35  ;;  %6135 = vmatpush3.msra.mxu0 %v8145_v18 }
 0x253   :  { %6102 = vmatpush3.msra.mxu1 %v8303_v48  ;;  %6136 = vmatprep.subr.mxu0 %v10651_v35 }
 0x254   :  { %6103 = vmatprep.subr.mxu1 %v10651_v35  ;;  %6137 = vmatpush3.msra.mxu0 %v8153_v20 }
 0x255   :  { %6104 = vmatpush3.msra.mxu1 %v8309_v49  ;;  %6138 = vmatprep.subr.mxu0 %v10651_v35 }
 0x256   :  { %6105 = vmatprep.subr.mxu1 %v10651_v35  ;;  %6139 = vmatpush3.msra.mxu0 %v8161_v22 }
 0x257   :  { %6106 = vmatpush3.msra.mxu1 %v8315_v50  ;;  %6140 = vmatprep.subr.mxu0 %v10651_v35 }
 0x258   :  { %6107 = vmatprep.subr.mxu1 %v10651_v35  ;;  %6141 = vmatpush3.msra.mxu0 %v8169_v24  ;;  %v10669_v24 = vld [vmem:[#allocation27_spill] sm:$0xff] }
 0x259   :  { %6108 = vmatpush3.msra.mxu1 %v8321_v51  ;;  %6142 = vmatprep.subr.mxu0 %v10651_v35 }
 0x25a   :  { %6109 = vmatprep.subr.mxu1 %v10651_v35  ;;  %6143 = vmatpush3.msra.mxu0 %v8177_v26 }
 0x25b   :  { %6110 = vmatpush3.msra.mxu1 %v8327_v52  ;;  %6144 = vmatprep.subr.mxu0 %v10651_v35 }
 0x25c   :  { %6111 = vmatprep.subr.mxu1 %v10651_v35  ;;  %6145 = vmatpush3.msra.mxu0 %v8185_v28 }
 0x25d   :  { %6112 = vmatpush3.msra.mxu1 %v8333_v53  ;;  %6146 = vmatprep.subr.mxu0 %v10651_v35 }
 0x25e   :  { %6113 = vmatprep.subr.mxu1 %v10651_v35  ;;  %6147 = vmatpush3.msra.mxu0 %v8195_v30 }
 0x25f   :  { %6114 = vmatpush3.msra.mxu1 %v8339_v54  ;;  %6148 = vmatprep.subr.mxu0 %v10651_v35 }
 0x260   :  { %6115 = vmatprep.subr.mxu1 %v10651_v35  ;;  %6149 = vmatpush3.msra.mxu0 %v8208_v32 }
 0x261   :  { %6116 = vmatpush3.msra.mxu1 %v8345_v55  ;;  %6150 = vmatprep.subr.mxu0 %v10651_v35 }
 0x262   :  { %6117 = vmatprep.subr.mxu1 %v10651_v35  ;;  %6151 = vmatpush3.msra.mxu0 %v8219_v34 }
 0x263   :  { %6118 = vmatpush3.msra.mxu1 %v8351_v56  ;;  %6152 = vmatprep.subr.mxu0 %v10651_v35 }
 0x264   :  { %6119 = vmatprep.subr.mxu1 %v10651_v35  ;;  %6153 = vmatpush3.msra.mxu0 %v8232_v36 }
 0x265   :  { %6120 = vmatpush3.msra.mxu1 %v8357_v57  ;;  %6154 = vmatprep.subr.mxu0 %v10651_v35 }
 0x266   :  { %6121 = vmatprep.subr.mxu1 %v10651_v35  ;;  %6155 = vmatpush3.msra.mxu0 %v8243_v38 }
 0x267   :  { %6122 = vmatpush3.msra.mxu1 %v8363_v58  ;;  %6156 = vmatprep.subr.mxu0 %v10651_v35 }
 0x268   :  { %6123 = vmatprep.subr.mxu1 %v10651_v35  ;;  %6157 = vmatpush3.msra.mxu0 %v8256_v40  ;;  %v10670_v40 = vld [vmem:[#allocation29_spill] sm:$0xff] }
 0x269   :  { %6124 = vmatpush3.msra.mxu1 %v8369_v59  ;;  %6158 = vmatprep.subr.mxu0 %v10651_v35 }
 0x26a   :  { %6126 = vmatmul.mubr.f32.vlgmr.msra.gmra.mxu1 %v8587_v8  ;;  %6163 = vmatprep.subr.mxu1 %v10651_v35 }
 0x26b   :  { %6164 = vmatpush3.msra.mxu1 %v8125_v13  ;;  %6159 = vmatpush3.msra.mxu0 %v8265_v42  ;;  %v10664_v13 = vld [vmem:[#allocation13_spill] sm:$0xff] }
 0x26c   :  { %6165 = vmatprep.subr.mxu1 %v10651_v35  ;;  %6160 = vmatprep.mubr.msk.f32.mxu0 %vm8000_vm1, %v10651_v35 }
 0x26d   :  { %6166 = vmatpush3.msra.mxu1 %v8131_v15  ;;  %6195 = vmatprep.mubr.msk.f32.mxu1 %vm8000_vm1, %v10651_v35  ;;  %v10666_v15 = vld [vmem:[#allocation15_spill] sm:$0xff] }
 0x26e   :  { %6167 = vmatprep.subr.mxu1 %v10651_v35  ;;  %6198 = vmatprep.subr.mxu0 %v10651_v35 }
 0x26f   :  { %6168 = vmatpush3.msra.mxu1 %v8139_v17 }
 0x270   :  { %6169 = vmatprep.subr.mxu1 %v10651_v35 }
 0x271   :  { %6170 = vmatpush3.msra.mxu1 %v8147_v19  ;;  %v10668_v19 = vld [vmem:[#allocation23_spill] sm:$0xff] }
 0x272   :  { %6171 = vmatprep.subr.mxu1 %v10651_v35 }
 0x273   :  { %6172 = vmatpush3.msra.mxu1 %v8155_v21 }
 0x274   :  { %6173 = vmatprep.subr.mxu1 %v10651_v35 }
 0x275   :  { %6174 = vmatpush3.msra.mxu1 %v8163_v23 }
 0x276   :  { %6175 = vmatprep.subr.mxu1 %v10651_v35 }
 0x277   :  { %6176 = vmatpush3.msra.mxu1 %v8171_v25 }
 0x278   :  { %6177 = vmatprep.subr.mxu1 %v10651_v35 }
 0x279   :  { %6178 = vmatpush3.msra.mxu1 %v8179_v27 }
 0x27a   :  { %6179 = vmatprep.subr.mxu1 %v10651_v35 }
 0x27b   :  { %6180 = vmatpush3.msra.mxu1 %v8187_v29 }
 0x27c   :  { %6181 = vmatprep.subr.mxu1 %v10651_v35 }
 0x27d   :  { %6182 = vmatpush3.msra.mxu1 %v10652_v3 }
 0x27e   :  { %6183 = vmatprep.subr.mxu1 %v10651_v35 }
 0x27f   :  { %6184 = vmatpush3.msra.mxu1 %v10653_v61 }
 0x280   :  { %6185 = vmatprep.subr.mxu1 %v10651_v35 }
 0x281   :  { %6186 = vmatpush3.msra.mxu1 %v10663_v12  ;;  %v8854_v12 = vld [vmem:[#allocation3 + $0x98] sm:$0xff] }
 0x282   :  { %6187 = vmatprep.subr.mxu1 %v10651_v35  ;;  %10673 = vst [vmem:[#allocation24_spill] sm:$0xff] %v8854_v12 }
 0x283   :  { %6188 = vmatpush3.msra.mxu1 %v10664_v13  ;;  %v8858_v13 = vld [vmem:[#allocation3 + $0x90] sm:$0xff] }
 0x284   :  { %6189 = vmatprep.subr.mxu1 %v10651_v35  ;;  %10674 = vst [vmem:[#allocation25_spill] sm:$0xff] %v8858_v13 }
 0x285   :  { %6190 = vmatpush3.msra.mxu1 %v10665_v14  ;;  %v8862_v14 = vld [vmem:[#allocation3 + $0x88] sm:$0xff] }
 0x286   :  { %6191 = vmatprep.subr.mxu1 %v10651_v35  ;;  %10675 = vst [vmem:[#allocation12_spill] sm:$0xff] %v8862_v14 }
 0x287   :  { %6192 = vmatpush3.msra.mxu1 %v10666_v15  ;;  %v8866_v15 = vld [vmem:[#allocation3 + $0x80] sm:$0xff] }
 0x288   :  { %6193 = vmatprep.subr.mxu1 %v10651_v35  ;;  %10676 = vst [vmem:[#allocation13_spill] sm:$0xff] %v8866_v15 }
 0x289   :  { %6194 = vmatpush3.msra.mxu1 %v10667_v16 }
 0x28a   :  { %6233 = vmatprep.subr.mxu1 %v10651_v35 }
 0x30a   :  { %v1037_v17 = vpop.f32.mrf.mxu1  ;;  %v1107_v18 = vpop.f32.mrf.mxu0 }
 0x30b   :  { %v1181_v20 = vadd.f32 %v1037_v17, %v10668_v19  ;;  %v1188_v25 = vadd.f32 %v1107_v18, %v10669_v24  ;;  %v10677_v18 = vld [vmem:[#allocation21_spill] sm:$0xff] }
 0x30c   :  { %v6057_v21 = vpop.f32.mrf.mxu1  ;;  %v6092_v22 = vpop.f32.mrf.mxu0 }
 0x30d   :  { %v4803_v23 = vmul.f32 -1.442695, %v1181_v20  ;;  %v4804_v26 = vmul.f32 -1.442695, %v1188_v25 }
 0x30f   :  { %7689 = vpow2.f32 %v4803_v23  ;;  %v10678_v23 = vld [vmem:[#allocation26_spill] sm:$0xff] }
 0x310   :  { %7691 = vpow2.f32 %v4804_v26 }
 0x31c   :  { %v7690_v27 = vpop.eup %7689 }
 0x31d   :  { %v1185_v28 = vadd.f32 1.0, %v7690_v27  ;;  %v7692_v29 = vpop.eup %7691 }
 0x31e   :  { %v1192_v30 = vadd.f32 1.0, %v7692_v29 }
 0x31f   :  { %7693 = vrcp.f32 %v1185_v28 }
 0x320   :  { %7695 = vrcp.f32 %v1192_v30 }
 0x32a   :  { %v1177_v32 = vpop.f32.mrf.mxu1 }
 0x32b   :  { %v1178_v34 = vadd.f32 %v8472_v62, %v1177_v32 }
 0x32c   :  { %v7694_v36 = vpop.eup %7693  ;;  %v6127_v38 = vpop.f32.mrf.mxu1 }
 0x32d   :  { %v1195_v39 = vmul.f32 %v7694_v36, %v1178_v34  ;;  %v7696_v1 = vpop.eup %7695 }
 0x32e   :  { %v1198_v3 = vsub.f32 1.0, %v7696_v1  ;;  %v1200_v41 = vmul.f32 %v7696_v1, %v8587_v8 }
 0x32f   :  { %v1196_v42 = vadd.f32 %v1195_v39, %v10670_v40  ;;  %v10679_v39 = vld [vmem:[#allocation28_spill] sm:$0xff] }
 0x331   :  { %7697 = vtanh.f32 %v1196_v42 }
 0x33e   :  { %v7698_v61 = vpop.eup %7697 }
 0x33f   :  { %v1199_v37 = vmul.f32 %v7698_v61, %v1198_v3 }
 0x341   :  { %v8699_v60 = vadd.f32 %v1200_v41, %v1199_v37 }
 0x343   :  { %10671 = vst [vmem:[#allocation11_spill] sm:$0xff] %v8699_v60  ;;  %6161 = vmatmul.mubr.f32.vlgmr.msra.gmra.mxu0 %v8699_v60  ;;  %6196 = vmatmul.mubr.f32.vlgmr.msra.gmra.mxu1 %v8699_v60 }
 0x344   :  { %6199 = vmatpush3.msra.mxu0 %v8279_v44  ;;  %6230 = vmatprep.mubr.msk.f32.mxu0 %vm8000_vm1, %v10651_v35  ;;  %v8719_v44 = vld [vmem:[#allocation3 + $0x68] sm:$0xff] }
 0x345   :  { %6200 = vmatprep.subr.mxu0 %v10651_v35  ;;  %6234 = vmatpush3.msra.mxu1 %v8707_v2 }
 0x346   :  { %6201 = vmatpush3.msra.mxu0 %v8284_v45  ;;  %6235 = vmatprep.subr.mxu1 %v10651_v35  ;;  %v8725_v45 = vld [vmem:[#allocation3 + $0x60] sm:$0xff] }
 0x347   :  { %6202 = vmatprep.subr.mxu0 %v10651_v35  ;;  %6236 = vmatpush3.msra.mxu1 %v8713_v10 }
 0x348   :  { %6203 = vmatpush3.msra.mxu0 %v8291_v46  ;;  %6237 = vmatprep.subr.mxu1 %v10651_v35  ;;  %v8731_v46 = vld [vmem:[#allocation3 + $0x58] sm:$0xff] }
 0x349   :  { %6204 = vmatprep.subr.mxu0 %v10651_v35  ;;  %6238 = vmatpush3.msra.mxu1 %v8719_v44 }
 0x34a   :  { %6205 = vmatpush3.msra.mxu0 %v8297_v47  ;;  %6239 = vmatprep.subr.mxu1 %v10651_v35  ;;  %v8737_v47 = vld [vmem:[#allocation3 + $0x50] sm:$0xff] }
 0x34b   :  { %6206 = vmatprep.subr.mxu0 %v10651_v35  ;;  %6240 = vmatpush3.msra.mxu1 %v8725_v45 }
 0x34c   :  { %6207 = vmatpush3.msra.mxu0 %v8303_v48  ;;  %6241 = vmatprep.subr.mxu1 %v10651_v35  ;;  %v8743_v48 = vld [vmem:[#allocation3 + $0x48] sm:$0xff] }
 0x34d   :  { %6208 = vmatprep.subr.mxu0 %v10651_v35  ;;  %6242 = vmatpush3.msra.mxu1 %v8731_v46 }
 0x34e   :  { %6209 = vmatpush3.msra.mxu0 %v8309_v49  ;;  %6243 = vmatprep.subr.mxu1 %v10651_v35  ;;  %v8749_v49 = vld [vmem:[#allocation3 + $0x40] sm:$0xff] }
 0x34f   :  { %6210 = vmatprep.subr.mxu0 %v10651_v35  ;;  %6244 = vmatpush3.msra.mxu1 %v8737_v47 }
 0x350   :  { %6211 = vmatpush3.msra.mxu0 %v8315_v50  ;;  %6245 = vmatprep.subr.mxu1 %v10651_v35  ;;  %v8755_v50 = vld [vmem:[#allocation3 + $0x38] sm:$0xff] }
 0x351   :  { %6212 = vmatprep.subr.mxu0 %v10651_v35  ;;  %6246 = vmatpush3.msra.mxu1 %v8743_v48 }
 0x352   :  { %6213 = vmatpush3.msra.mxu0 %v8321_v51  ;;  %6247 = vmatprep.subr.mxu1 %v10651_v35  ;;  %v8761_v51 = vld [vmem:[#allocation3 + $0x30] sm:$0xff] }
 0x353   :  { %6214 = vmatprep.subr.mxu0 %v10651_v35  ;;  %6248 = vmatpush3.msra.mxu1 %v8749_v49 }
 0x354   :  { %6215 = vmatpush3.msra.mxu0 %v8327_v52  ;;  %6249 = vmatprep.subr.mxu1 %v10651_v35  ;;  %v8767_v52 = vld [vmem:[#allocation3 + $0x28] sm:$0xff] }
 0x355   :  { %6216 = vmatprep.subr.mxu0 %v10651_v35  ;;  %6250 = vmatpush3.msra.mxu1 %v8755_v50 }
 0x356   :  { %6217 = vmatpush3.msra.mxu0 %v8333_v53  ;;  %6251 = vmatprep.subr.mxu1 %v10651_v35  ;;  %v8773_v53 = vld [vmem:[#allocation3 + $0x20] sm:$0xff] }
 0x357   :  { %6218 = vmatprep.subr.mxu0 %v10651_v35  ;;  %6252 = vmatpush3.msra.mxu1 %v8761_v51 }
 0x358   :  { %6219 = vmatpush3.msra.mxu0 %v8339_v54  ;;  %6253 = vmatprep.subr.mxu1 %v10651_v35  ;;  %v8779_v54 = vld [vmem:[#allocation3 + $0x18] sm:$0xff] }
 0x359   :  { %6220 = vmatprep.subr.mxu0 %v10651_v35  ;;  %6254 = vmatpush3.msra.mxu1 %v8767_v52 }
 0x35a   :  { %6221 = vmatpush3.msra.mxu0 %v8345_v55  ;;  %6255 = vmatprep.subr.mxu1 %v10651_v35  ;;  %v8785_v55 = vld [vmem:[#allocation3 + $0x10] sm:$0xff] }
 0x35b   :  { %6222 = vmatprep.subr.mxu0 %v10651_v35  ;;  %6256 = vmatpush3.msra.mxu1 %v8773_v53 }
 0x35c   :  { %6223 = vmatpush3.msra.mxu0 %v8351_v56  ;;  %6257 = vmatprep.subr.mxu1 %v10651_v35  ;;  %v8791_v56 = vld [vmem:[#allocation3 + $0x8] sm:$0xff] }
 0x35d   :  { %6224 = vmatprep.subr.mxu0 %v10651_v35  ;;  %6258 = vmatpush3.msra.mxu1 %v8779_v54 }
 0x35e   :  { %6225 = vmatpush3.msra.mxu0 %v8357_v57  ;;  %6259 = vmatprep.subr.mxu1 %v10651_v35  ;;  %v8798_v57 = vld [vmem:[#allocation3 + $0xf8] sm:$0xff] }
 0x35f   :  { %6226 = vmatprep.subr.mxu0 %v10651_v35  ;;  %6260 = vmatpush3.msra.mxu1 %v8785_v55 }
 0x360   :  { %6227 = vmatpush3.msra.mxu0 %v8363_v58  ;;  %6261 = vmatprep.subr.mxu1 %v10651_v35  ;;  %v8801_v58 = vld [vmem:[#allocation3] sm:$0xff] }
 0x361   :  { %6228 = vmatprep.subr.mxu0 %v10651_v35  ;;  %6262 = vmatpush3.msra.mxu1 %v8791_v56 }
 0x362   :  { %6229 = vmatpush3.msra.mxu0 %v8369_v59  ;;  %6263 = vmatprep.subr.mxu1 %v10651_v35  ;;  %v8807_v59 = vld [vmem:[#allocation3 + $0xf0] sm:$0xff] }
 0x363   :  { %6231 = vmatmul.mubr.f32.vlgmr.msra.gmra.mxu0 %v8699_v60  ;;  %6268 = vmatprep.subr.mxu0 %v10651_v35 }
 0x364   :  { %6269 = vmatpush3.msra.mxu0 %v8798_v57  ;;  %6264 = vmatpush3.msra.mxu1 %v8801_v58 }
 0x365   :  { %6270 = vmatprep.subr.mxu0 %v10651_v35  ;;  %6265 = vmatprep.mubr.msk.f32.mxu1 %vm8000_vm1, %v10651_v35 }
 0x366   :  { %6271 = vmatpush3.msra.mxu0 %v8807_v59  ;;  %6300 = vmatprep.mubr.msk.f32.mxu0 %vm8000_vm1, %v10651_v35 }
 0x367   :  { %6272 = vmatprep.subr.mxu0 %v10651_v35  ;;  %6303 = vmatprep.subr.mxu1 %v10651_v35 }
 0x368   :  { %6273 = vmatpush3.msra.mxu0 %v8814_v43 }
 0x369   :  { %6274 = vmatprep.subr.mxu0 %v10651_v35 }
 0x36a   :  { %6275 = vmatpush3.msra.mxu0 %v8818_v63 }
 0x36b   :  { %6276 = vmatprep.subr.mxu0 %v10651_v35 }
 0x36c   :  { %6277 = vmatpush3.msra.mxu0 %v8822_v33 }
 0x36d   :  { %6278 = vmatprep.subr.mxu0 %v10651_v35 }
 0x36e   :  { %6279 = vmatpush3.msra.mxu0 %v8826_v11 }
 0x36f   :  { %6280 = vmatprep.subr.mxu0 %v10651_v35 }
 0x370   :  { %6281 = vmatpush3.msra.mxu0 %v8830_v6 }
 0x371   :  { %6282 = vmatprep.subr.mxu0 %v10651_v35 }
 0x372   :  { %6283 = vmatpush3.msra.mxu0 %v8834_v0 }
 0x373   :  { %6284 = vmatprep.subr.mxu0 %v10651_v35 }
 0x374   :  { %6285 = vmatpush3.msra.mxu0 %v8838_v9 }
 0x375   :  { %6286 = vmatprep.subr.mxu0 %v10651_v35 }
 0x376   :  { %6287 = vmatpush3.msra.mxu0 %v8842_v4 }
 0x377   :  { %6288 = vmatprep.subr.mxu0 %v10651_v35 }
 0x378   :  { %6289 = vmatpush3.msra.mxu0 %v8846_v31 }
 0x379   :  { %6290 = vmatprep.subr.mxu0 %v10651_v35 }
 0x37a   :  { %6291 = vmatpush3.msra.mxu0 %v8850_v5 }
 0x37b   :  { %6292 = vmatprep.subr.mxu0 %v10651_v35 }
 0x37c   :  { %6293 = vmatpush3.msra.mxu0 %v8854_v12 }
 0x37d   :  { %6294 = vmatprep.subr.mxu0 %v10651_v35 }
 0x37e   :  { %6295 = vmatpush3.msra.mxu0 %v8858_v13 }
 0x37f   :  { %6296 = vmatprep.subr.mxu0 %v10651_v35 }
 0x380   :  { %6297 = vmatpush3.msra.mxu0 %v8862_v14 }
 0x381   :  { %6298 = vmatprep.subr.mxu0 %v10651_v35 }
 0x382   :  { %6299 = vmatpush3.msra.mxu0 %v8866_v15 }
 0x383   :  { %6338 = vmatprep.subr.mxu0 %v10651_v35 }
 0x403   :  { %v1269_v16 = vpop.f32.mrf.mxu0  ;;  %v1339_v17 = vpop.f32.mrf.mxu1 }
 0x404   :  { %v1413_v19 = vadd.f32 %v1269_v16, %v10677_v18  ;;  %v1420_v24 = vadd.f32 %v1339_v17, %v10678_v23  ;;  %v8886_v16 = vld [vmem:[#allocation3 + $0x170] sm:$0xff]  ;;  %v8892_v17 = vld [vmem:[#allocation3 + $0x168] sm:$0xff]  ;;  %v8898_v18 = vld [vmem:[#allocation3 + $0x160] sm:$0xff] }
 0x405   :  { %v6162_v20 = vpop.f32.mrf.mxu0  ;;  %v6197_v21 = vpop.f32.mrf.mxu1  ;;  %v8928_v23 = vld [vmem:[#allocation3 + $0x138] sm:$0xff] }
 0x406   :  { %v4805_v22 = vmul.f32 -1.442695, %v1413_v19  ;;  %v4806_v25 = vmul.f32 -1.442695, %v1420_v24  ;;  %v8904_v19 = vld [vmem:[#allocation3 + $0x158] sm:$0xff]  ;;  %v8910_v20 = vld [vmem:[#allocation3 + $0x150] sm:$0xff] }
 0x407   :  { %v8916_v21 = vld [vmem:[#allocation3 + $0x148] sm:$0xff]  ;;  %v8934_v24 = vld [vmem:[#allocation3 + $0x130] sm:$0xff] }
 0x408   :  { %7699 = vpow2.f32 %v4805_v22  ;;  %v8922_v22 = vld [vmem:[#allocation3 + $0x140] sm:$0xff] }
 0x409   :  { %7701 = vpow2.f32 %v4806_v25  ;;  %v8940_v25 = vld [vmem:[#allocation3 + $0x128] sm:$0xff] }
 0x415   :  { %v7700_v26 = vpop.eup %7699 }
 0x416   :  { %v1417_v27 = vadd.f32 1.0, %v7700_v26  ;;  %v7702_v28 = vpop.eup %7701  ;;  %v8946_v26 = vld [vmem:[#allocation3 + $0x120] sm:$0xff] }
 0x417   :  { %v1424_v29 = vadd.f32 1.0, %v7702_v28  ;;  %v8958_v28 = vld [vmem:[#allocation3 + $0x110] sm:$0xff] }
 0x418   :  { %7703 = vrcp.f32 %v1417_v27  ;;  %v8952_v27 = vld [vmem:[#allocation3 + $0x118] sm:$0xff] }
 0x419   :  { %7705 = vrcp.f32 %v1424_v29  ;;  %v8964_v29 = vld [vmem:[#allocation3 + $0x108] sm:$0xff] }
 0x423   :  { %v1409_v30 = vpop.f32.mrf.mxu0 }
 0x424   :  { %v1410_v32 = vadd.f32 %v8472_v62, %v1409_v30  ;;  %v8879_v62 = vld [vmem:[#allocation3 + $0x178] sm:$0xff]  ;;  %v8970_v30 = vld [vmem:[#allocation3 + $0x100] sm:$0xff] }
 0x425   :  { %v7704_v34 = vpop.eup %7703  ;;  %v6232_v36 = vpop.f32.mrf.mxu0 }
 0x426   :  { %v1427_v38 = vmul.f32 %v7704_v34, %v1410_v32  ;;  %v7706_v42 = vpop.eup %7705  ;;  %v10681_v36 = vld [vmem:[#allocation19_spill] sm:$0xff] }
 0x427   :  { %v1430_v1 = vsub.f32 1.0, %v7706_v42  ;;  %v1432_v61 = vmul.f32 %v7706_v42, %v8699_v60 }
 0x428   :  { %v1428_v40 = vadd.f32 %v1427_v38, %v10679_v39 }
 0x42a   :  { %7707 = vtanh.f32 %v1428_v40 }
 0x437   :  { %v7708_v3 = vpop.eup %7707 }
 0x438   :  { %v1431_v41 = vmul.f32 %v7708_v3, %v1430_v1  ;;  %v10682_v1 = vld [vmem:[#allocation31_spill] sm:$0xff] }
 0x43a   :  { %v8875_v37 = vadd.f32 %v1432_v61, %v1431_v41 }
 0x43c   :  { %10680 = vst [vmem:[#allocation14_spill] sm:$0xff] %v8875_v37  ;;  %6266 = vmatmul.mubr.f32.vlgmr.msra.gmra.mxu1 %v8875_v37  ;;  %6301 = vmatmul.mubr.f32.vlgmr.msra.gmra.mxu0 %v8875_v37 }
 0x43d   :  { %6304 = vmatpush3.msra.mxu1 %v8879_v62  ;;  %6335 = vmatprep.mubr.msk.f32.mxu1 %vm8000_vm1, %v10651_v35 }
 0x43e   :  { %6305 = vmatprep.subr.mxu1 %v10651_v35  ;;  %6339 = vmatpush3.msra.mxu0 %v8707_v2 }
 0x43f   :  { %6306 = vmatpush3.msra.mxu1 %v8886_v16  ;;  %6340 = vmatprep.subr.mxu0 %v10651_v35 }
 0x440   :  { %6307 = vmatprep.subr.mxu1 %v10651_v35  ;;  %6341 = vmatpush3.msra.mxu0 %v8713_v10 }
 0x441   :  { %6308 = vmatpush3.msra.mxu1 %v8892_v17  ;;  %6342 = vmatprep.subr.mxu0 %v10651_v35 }
 0x442   :  { %6309 = vmatprep.subr.mxu1 %v10651_v35  ;;  %6343 = vmatpush3.msra.mxu0 %v8719_v44 }
 0x443   :  { %6310 = vmatpush3.msra.mxu1 %v8898_v18  ;;  %6344 = vmatprep.subr.mxu0 %v10651_v35 }
 0x444   :  { %6311 = vmatprep.subr.mxu1 %v10651_v35  ;;  %6345 = vmatpush3.msra.mxu0 %v8725_v45 }
 0x445   :  { %6312 = vmatpush3.msra.mxu1 %v8904_v19  ;;  %6346 = vmatprep.subr.mxu0 %v10651_v35 }
 0x446   :  { %6313 = vmatprep.subr.mxu1 %v10651_v35  ;;  %6347 = vmatpush3.msra.mxu0 %v8731_v46 }
 0x447   :  { %6314 = vmatpush3.msra.mxu1 %v8910_v20  ;;  %6348 = vmatprep.subr.mxu0 %v10651_v35 }
 0x448   :  { %6315 = vmatprep.subr.mxu1 %v10651_v35  ;;  %6349 = vmatpush3.msra.mxu0 %v8737_v47 }
 0x449   :  { %6316 = vmatpush3.msra.mxu1 %v8916_v21  ;;  %6350 = vmatprep.subr.mxu0 %v10651_v35 }
 0x44a   :  { %6317 = vmatprep.subr.mxu1 %v10651_v35  ;;  %6351 = vmatpush3.msra.mxu0 %v8743_v48 }
 0x44b   :  { %6318 = vmatpush3.msra.mxu1 %v8922_v22  ;;  %6352 = vmatprep.subr.mxu0 %v10651_v35 }
 0x44c   :  { %6319 = vmatprep.subr.mxu1 %v10651_v35  ;;  %6353 = vmatpush3.msra.mxu0 %v8749_v49 }
 0x44d   :  { %6320 = vmatpush3.msra.mxu1 %v8928_v23  ;;  %6354 = vmatprep.subr.mxu0 %v10651_v35 }
 0x44e   :  { %6321 = vmatprep.subr.mxu1 %v10651_v35  ;;  %6355 = vmatpush3.msra.mxu0 %v8755_v50 }
 0x44f   :  { %6322 = vmatpush3.msra.mxu1 %v8934_v24  ;;  %6356 = vmatprep.subr.mxu0 %v10651_v35 }
 0x450   :  { %6323 = vmatprep.subr.mxu1 %v10651_v35  ;;  %6357 = vmatpush3.msra.mxu0 %v8761_v51 }
 0x451   :  { %6324 = vmatpush3.msra.mxu1 %v8940_v25  ;;  %6358 = vmatprep.subr.mxu0 %v10651_v35 }
 0x452   :  { %6325 = vmatprep.subr.mxu1 %v10651_v35  ;;  %6359 = vmatpush3.msra.mxu0 %v8767_v52 }
 0x453   :  { %6326 = vmatpush3.msra.mxu1 %v8946_v26  ;;  %6360 = vmatprep.subr.mxu0 %v10651_v35 }
 0x454   :  { %6327 = vmatprep.subr.mxu1 %v10651_v35  ;;  %6361 = vmatpush3.msra.mxu0 %v8773_v53 }
 0x455   :  { %6328 = vmatpush3.msra.mxu1 %v8952_v27  ;;  %6362 = vmatprep.subr.mxu0 %v10651_v35 }
 0x456   :  { %6329 = vmatprep.subr.mxu1 %v10651_v35  ;;  %6363 = vmatpush3.msra.mxu0 %v8779_v54 }
 0x457   :  { %6330 = vmatpush3.msra.mxu1 %v8958_v28  ;;  %6364 = vmatprep.subr.mxu0 %v10651_v35 }
 0x458   :  { %6331 = vmatprep.subr.mxu1 %v10651_v35  ;;  %6365 = vmatpush3.msra.mxu0 %v8785_v55 }
 0x459   :  { %6332 = vmatpush3.msra.mxu1 %v8964_v29  ;;  %6366 = vmatprep.subr.mxu0 %v10651_v35 }
 0x45a   :  { %6333 = vmatprep.subr.mxu1 %v10651_v35  ;;  %6367 = vmatpush3.msra.mxu0 %v8791_v56 }
 0x45b   :  { %6334 = vmatpush3.msra.mxu1 %v8970_v30  ;;  %6368 = vmatprep.subr.mxu0 %v10651_v35 }
 0x45c   :  { %6336 = vmatmul.mubr.f32.vlgmr.msra.gmra.mxu1 %v8875_v37  ;;  %6373 = vmatprep.subr.mxu1 %v10651_v35 }
 0x45d   :  { %6374 = vmatpush3.msra.mxu1 %v8798_v57  ;;  %6369 = vmatpush3.msra.mxu0 %v8801_v58 }
 0x45e   :  { %6375 = vmatprep.subr.mxu1 %v10651_v35  ;;  %6370 = vmatprep.mubr.msk.f32.mxu0 %vm8000_vm1, %v10651_v35 }
 0x45f   :  { %6376 = vmatpush3.msra.mxu1 %v8807_v59  ;;  %6405 = vmatprep.mubr.msk.f32.mxu1 %vm8000_vm1, %v10651_v35 }
 0x460   :  { %6377 = vmatprep.subr.mxu1 %v10651_v35  ;;  %6408 = vmatprep.subr.mxu0 %v10651_v35 }
 0x461   :  { %6378 = vmatpush3.msra.mxu1 %v8814_v43 }
 0x462   :  { %6379 = vmatprep.subr.mxu1 %v10651_v35 }
 0x463   :  { %6380 = vmatpush3.msra.mxu1 %v8818_v63 }
 0x464   :  { %6381 = vmatprep.subr.mxu1 %v10651_v35 }
 0x465   :  { %6382 = vmatpush3.msra.mxu1 %v8822_v33 }
 0x466   :  { %6383 = vmatprep.subr.mxu1 %v10651_v35 }
 0x467   :  { %6384 = vmatpush3.msra.mxu1 %v8826_v11 }
 0x468   :  { %6385 = vmatprep.subr.mxu1 %v10651_v35 }
 0x469   :  { %6386 = vmatpush3.msra.mxu1 %v8830_v6 }
 0x46a   :  { %6387 = vmatprep.subr.mxu1 %v10651_v35 }
 0x46b   :  { %6388 = vmatpush3.msra.mxu1 %v8834_v0 }
 0x46c   :  { %6389 = vmatprep.subr.mxu1 %v10651_v35 }
 0x46d   :  { %6390 = vmatpush3.msra.mxu1 %v8838_v9 }
 0x46e   :  { %6391 = vmatprep.subr.mxu1 %v10651_v35 }
 0x46f   :  { %6392 = vmatpush3.msra.mxu1 %v8842_v4 }
 0x470   :  { %6393 = vmatprep.subr.mxu1 %v10651_v35 }
 0x471   :  { %6394 = vmatpush3.msra.mxu1 %v8846_v31 }
 0x472   :  { %6395 = vmatprep.subr.mxu1 %v10651_v35 }
 0x473   :  { %6396 = vmatpush3.msra.mxu1 %v8850_v5 }
 0x474   :  { %6397 = vmatprep.subr.mxu1 %v10651_v35 }
 0x475   :  { %6398 = vmatpush3.msra.mxu1 %v8854_v12 }
 0x476   :  { %6399 = vmatprep.subr.mxu1 %v10651_v35 }
 0x477   :  { %6400 = vmatpush3.msra.mxu1 %v8858_v13 }
 0x478   :  { %6401 = vmatprep.subr.mxu1 %v10651_v35 }
 0x479   :  { %6402 = vmatpush3.msra.mxu1 %v8862_v14  ;;  %v9019_v14 = vld [vmem:[%s10561_s3 + $0x3] ss:$0 sm:$0xff] }
 0x47a   :  { %6403 = vmatprep.subr.mxu1 %v10651_v35 }
 0x47b   :  { %6404 = vmatpush3.msra.mxu1 %v8866_v15 }
 0x47c   :  { %6443 = vmatprep.subr.mxu1 %v10651_v35 }
 0x4fc   :  { %v1501_v32 = vpop.f32.mrf.mxu1  ;;  %v1571_v34 = vpop.f32.mrf.mxu0 }
 0x4fd   :  { %v1645_v38 = vadd.f32 %v1501_v32, %v10681_v36  ;;  %v1652_v3 = vadd.f32 %v1571_v34, %v10682_v1  ;;  %v10683_v34 = vld [vmem:[#allocation33_spill] sm:$0xff] }
 0x4fe   :  { %v6267_v39 = vpop.f32.mrf.mxu1  ;;  %v6302_v40 = vpop.f32.mrf.mxu0 }
 0x4ff   :  { %v4807_v42 = vmul.f32 -1.442695, %v1645_v38  ;;  %v4808_v61 = vmul.f32 -1.442695, %v1652_v3 }
 0x501   :  { %7709 = vpow2.f32 %v4807_v42 }
 0x502   :  { %7711 = vpow2.f32 %v4808_v61 }
 0x50e   :  { %v7710_v41 = vpop.eup %7709 }
 0x50f   :  { %v1649_v60 = vadd.f32 1.0, %v7710_v41  ;;  %v7712_v8 = vpop.eup %7711 }
 0x510   :  { %v1656_v7 = vadd.f32 1.0, %v7712_v8 }
 0x511   :  { %7713 = vrcp.f32 %v1649_v60 }
 0x512   :  { %7715 = vrcp.f32 %v1656_v7  ;;  %v10684_v7 = vld [vmem:[#allocation12_spill] sm:$0xff] }
 0x51c   :  { %v1641_v15 = vpop.f32.mrf.mxu1 }
 0x51d   :  { %v1642_v32 = vadd.f32 %v9019_v14, %v1641_v15  ;;  %v10685_v15 = vld [vmem:[#allocation13_spill] sm:$0xff] }
 0x51e   :  { %v7714_v36 = vpop.eup %7713  ;;  %v6337_v38 = vpop.f32.mrf.mxu1 }
 0x51f   :  { %v1659_v39 = vmul.f32 %v7714_v36, %v1642_v32  ;;  %v7716_v42 = vpop.eup %7715  ;;  %v10686_v36 = vld [vmem:[#allocation17_spill] sm:$0xff] }
 0x520   :  { %v1662_v1 = vsub.f32 1.0, %v7716_v42  ;;  %v1664_v8 = vmul.f32 %v7716_v42, %v8875_v37  ;;  %v10687_v42 = vld [vmem:[#allocation30_spill] sm:$0xff] }
 0x521   :  { %v1660_v40 = vadd.f32 %v1659_v39, %v10683_v34 }
 0x523   :  { %7717 = vtanh.f32 %v1660_v40 }
 0x530   :  { %v7718_v60 = vpop.eup %7717 }
 0x531   :  { %v1663_v3 = vmul.f32 %v7718_v60, %v1662_v1 }
 0x533   :  { %v9024_v61 = vadd.f32 %v1664_v8, %v1663_v3 }
 0x535   :  { %6371 = vmatmul.mubr.f32.vlgmr.msra.gmra.mxu0 %v9024_v61  ;;  %6406 = vmatmul.mubr.f32.vlgmr.msra.gmra.mxu1 %v9024_v61 }
 0x536   :  { %6409 = vmatpush3.msra.mxu0 %v8879_v62  ;;  %6440 = vmatprep.mubr.msk.f32.mxu0 %vm8000_vm1, %v10651_v35 }
 0x537   :  { %6410 = vmatprep.subr.mxu0 %v10651_v35  ;;  %6444 = vmatpush3.msra.mxu1 %v8707_v2 }
 0x538   :  { %6411 = vmatpush3.msra.mxu0 %v8886_v16  ;;  %6445 = vmatprep.subr.mxu1 %v10651_v35 }
 0x539   :  { %6412 = vmatprep.subr.mxu0 %v10651_v35  ;;  %6446 = vmatpush3.msra.mxu1 %v8713_v10 }
 0x53a   :  { %6413 = vmatpush3.msra.mxu0 %v8892_v17  ;;  %6447 = vmatprep.subr.mxu1 %v10651_v35 }
 0x53b   :  { %6414 = vmatprep.subr.mxu0 %v10651_v35  ;;  %6448 = vmatpush3.msra.mxu1 %v8719_v44 }
 0x53c   :  { %6415 = vmatpush3.msra.mxu0 %v8898_v18  ;;  %6449 = vmatprep.subr.mxu1 %v10651_v35 }
 0x53d   :  { %6416 = vmatprep.subr.mxu0 %v10651_v35  ;;  %6450 = vmatpush3.msra.mxu1 %v8725_v45 }
 0x53e   :  { %6417 = vmatpush3.msra.mxu0 %v8904_v19  ;;  %6451 = vmatprep.subr.mxu1 %v10651_v35 }
 0x53f   :  { %6418 = vmatprep.subr.mxu0 %v10651_v35  ;;  %6452 = vmatpush3.msra.mxu1 %v8731_v46 }
 0x540   :  { %6419 = vmatpush3.msra.mxu0 %v8910_v20  ;;  %6453 = vmatprep.subr.mxu1 %v10651_v35 }
 0x541   :  { %6420 = vmatprep.subr.mxu0 %v10651_v35  ;;  %6454 = vmatpush3.msra.mxu1 %v8737_v47 }
 0x542   :  { %6421 = vmatpush3.msra.mxu0 %v8916_v21  ;;  %6455 = vmatprep.subr.mxu1 %v10651_v35 }
 0x543   :  { %6422 = vmatprep.subr.mxu0 %v10651_v35  ;;  %6456 = vmatpush3.msra.mxu1 %v8743_v48 }
 0x544   :  { %6423 = vmatpush3.msra.mxu0 %v8922_v22  ;;  %6457 = vmatprep.subr.mxu1 %v10651_v35 }
 0x545   :  { %6424 = vmatprep.subr.mxu0 %v10651_v35  ;;  %6458 = vmatpush3.msra.mxu1 %v8749_v49 }
 0x546   :  { %6425 = vmatpush3.msra.mxu0 %v8928_v23  ;;  %6459 = vmatprep.subr.mxu1 %v10651_v35 }
 0x547   :  { %6426 = vmatprep.subr.mxu0 %v10651_v35  ;;  %6460 = vmatpush3.msra.mxu1 %v8755_v50 }
 0x548   :  { %6427 = vmatpush3.msra.mxu0 %v8934_v24  ;;  %6461 = vmatprep.subr.mxu1 %v10651_v35 }
 0x549   :  { %6428 = vmatprep.subr.mxu0 %v10651_v35  ;;  %6462 = vmatpush3.msra.mxu1 %v8761_v51 }
 0x54a   :  { %6429 = vmatpush3.msra.mxu0 %v8940_v25  ;;  %6463 = vmatprep.subr.mxu1 %v10651_v35 }
 0x54b   :  { %6430 = vmatprep.subr.mxu0 %v10651_v35  ;;  %6464 = vmatpush3.msra.mxu1 %v8767_v52 }
 0x54c   :  { %6431 = vmatpush3.msra.mxu0 %v8946_v26  ;;  %6465 = vmatprep.subr.mxu1 %v10651_v35 }
 0x54d   :  { %6432 = vmatprep.subr.mxu0 %v10651_v35  ;;  %6466 = vmatpush3.msra.mxu1 %v8773_v53 }
 0x54e   :  { %6433 = vmatpush3.msra.mxu0 %v8952_v27  ;;  %6467 = vmatprep.subr.mxu1 %v10651_v35 }
 0x54f   :  { %6434 = vmatprep.subr.mxu0 %v10651_v35  ;;  %6468 = vmatpush3.msra.mxu1 %v8779_v54 }
 0x550   :  { %6435 = vmatpush3.msra.mxu0 %v8958_v28  ;;  %6469 = vmatprep.subr.mxu1 %v10651_v35 }
 0x551   :  { %6436 = vmatprep.subr.mxu0 %v10651_v35  ;;  %6470 = vmatpush3.msra.mxu1 %v8785_v55 }
 0x552   :  { %6437 = vmatpush3.msra.mxu0 %v8964_v29  ;;  %6471 = vmatprep.subr.mxu1 %v10651_v35 }
 0x553   :  { %6438 = vmatprep.subr.mxu0 %v10651_v35  ;;  %6472 = vmatpush3.msra.mxu1 %v8791_v56 }
 0x554   :  { %6439 = vmatpush3.msra.mxu0 %v8970_v30  ;;  %6473 = vmatprep.subr.mxu1 %v10651_v35 }
 0x555   :  { %6441 = vmatmul.mubr.f32.vlgmr.msra.gmra.mxu0 %v9024_v61  ;;  %6478 = vmatprep.subr.mxu0 %v10651_v35 }
 0x556   :  { %6479 = vmatpush3.msra.mxu0 %v8798_v57  ;;  %6474 = vmatpush3.msra.mxu1 %v8801_v58 }
 0x557   :  { %6480 = vmatprep.subr.mxu0 %v10651_v35  ;;  %6475 = vmatprep.mubr.msk.f32.mxu1 %vm8000_vm1, %v10651_v35 }
 0x558   :  { %6481 = vmatpush3.msra.mxu0 %v8807_v59  ;;  %6510 = vmatprep.mubr.msk.f32.mxu0 %vm8000_vm1, %v10651_v35 }
 0x559   :  { %6482 = vmatprep.subr.mxu0 %v10651_v35  ;;  %6513 = vmatprep.subr.mxu1 %v10651_v35 }
 0x55a   :  { %6483 = vmatpush3.msra.mxu0 %v8814_v43 }
 0x55b   :  { %6484 = vmatprep.subr.mxu0 %v10651_v35 }
 0x55c   :  { %6485 = vmatpush3.msra.mxu0 %v8818_v63 }
 0x55d   :  { %6486 = vmatprep.subr.mxu0 %v10651_v35 }
 0x55e   :  { %6487 = vmatpush3.msra.mxu0 %v8822_v33 }
 0x55f   :  { %6488 = vmatprep.subr.mxu0 %v10651_v35 }
 0x560   :  { %6489 = vmatpush3.msra.mxu0 %v8826_v11 }
 0x561   :  { %6490 = vmatprep.subr.mxu0 %v10651_v35 }
 0x562   :  { %6491 = vmatpush3.msra.mxu0 %v8830_v6 }
 0x563   :  { %6492 = vmatprep.subr.mxu0 %v10651_v35 }
 0x564   :  { %6493 = vmatpush3.msra.mxu0 %v8834_v0 }
 0x565   :  { %6494 = vmatprep.subr.mxu0 %v10651_v35 }
 0x566   :  { %6495 = vmatpush3.msra.mxu0 %v8838_v9 }
 0x567   :  { %6496 = vmatprep.subr.mxu0 %v10651_v35 }
 0x568   :  { %6497 = vmatpush3.msra.mxu0 %v8842_v4 }
 0x569   :  { %6498 = vmatprep.subr.mxu0 %v10651_v35 }
 0x56a   :  { %6499 = vmatpush3.msra.mxu0 %v8846_v31 }
 0x56b   :  { %6500 = vmatprep.subr.mxu0 %v10651_v35 }
 0x56c   :  { %6501 = vmatpush3.msra.mxu0 %v8850_v5 }
 0x56d   :  { %6502 = vmatprep.subr.mxu0 %v10651_v35 }
 0x56e   :  { %6503 = vmatpush3.msra.mxu0 %v8854_v12 }
 0x56f   :  { %6504 = vmatprep.subr.mxu0 %v10651_v35 }
 0x570   :  { %6505 = vmatpush3.msra.mxu0 %v8858_v13 }
 0x571   :  { %6506 = vmatprep.subr.mxu0 %v10651_v35 }
 0x572   :  { %6507 = vmatpush3.msra.mxu0 %v10684_v7 }
 0x573   :  { %6508 = vmatprep.subr.mxu0 %v10651_v35 }
 0x574   :  { %6509 = vmatpush3.msra.mxu0 %v10685_v15 }
 0x575   :  { %6548 = vmatprep.subr.mxu0 %v10651_v35 }
 0x5f5   :  { %v1733_v41 = vpop.f32.mrf.mxu0  ;;  %v1803_v32 = vpop.f32.mrf.mxu1 }
 0x5f6   :  { %v1877_v38 = vadd.f32 %v1733_v41, %v10686_v36  ;;  %v1884_v1 = vadd.f32 %v1803_v32, %v10687_v42  ;;  %v10688_v36 = vld [vmem:[#allocation32_spill] sm:$0xff] }
 0x5f7   :  { %v6372_v39 = vpop.f32.mrf.mxu0  ;;  %v6407_v34 = vpop.f32.mrf.mxu1 }
 0x5f8   :  { %v4809_v40 = vmul.f32 -1.442695, %v1877_v38  ;;  %v4810_v60 = vmul.f32 -1.442695, %v1884_v1 }
 0x5fa   :  { %7719 = vpow2.f32 %v4809_v40 }
 0x5fb   :  { %7721 = vpow2.f32 %v4810_v60  ;;  %v2385_v60 = vld [vmem:[#allocation5 + $0x70] sm:$0xff] }
 0x607   :  { %v7720_v8 = vpop.eup %7719 }
 0x608   :  { %v1881_v3 = vadd.f32 1.0, %v7720_v8  ;;  %v7722_v37 = vpop.eup %7721  ;;  %v10697_v8 = vld [vmem:[#allocation38_spill] sm:$0xff] }
 0x609   :  { %v1888_v7 = vadd.f32 1.0, %v7722_v37 }
 0x60a   :  { %7723 = vrcp.f32 %v1881_v3  ;;  %v2383_v3 = vld [vmem:[#allocation5 + $0x60] sm:$0xff] }
 0x60b   :  { %7725 = vrcp.f32 %v1888_v7 }
 0x615   :  { %v1873_v15 = vpop.f32.mrf.mxu0 }
 0x616   :  { %v1874_v13 = vadd.f32 %v9019_v14, %v1873_v15 }
 0x617   :  { %v7724_v12 = vpop.eup %7723  ;;  %v6442_v5 = vpop.f32.mrf.mxu0 }
 0x618   :  { %v1891_v41 = vmul.f32 %v7724_v12, %v1874_v13  ;;  %v7726_v38 = vpop.eup %7725 }
 0x619   :  { %v1894_v34 = vsub.f32 1.0, %v7726_v38  ;;  %v1896_v40 = vmul.f32 %v7726_v38, %v9024_v61  ;;  %v2511_v38 = vld [vmem:[#allocation5 + $0xd8] sm:$0xff] }
 0x61a   :  { %v1892_v39 = vadd.f32 %v1891_v41, %v10688_v36  ;;  %v2381_v41 = vld [vmem:[#allocation5 + $0x50] sm:$0xff]  ;;  %v10699_v36 = vld [vmem:[#allocation11_spill] sm:$0xff] }
 0x61c   :  { %7727 = vtanh.f32 %v1892_v39  ;;  %v2512_v39 = vld [vmem:[#allocation5 + $0xe0] sm:$0xff] }
 0x629   :  { %v7728_v32 = vpop.eup %7727 }
 0x62a   :  { %v1895_v42 = vmul.f32 %v7728_v32, %v1894_v34  ;;  %v2510_v34 = vld [vmem:[#allocation5 + $0xd0] sm:$0xff]  ;;  %v2509_v32 = vld [vmem:[#allocation5 + $0xc8] sm:$0xff] }
 0x62c   :  { %v9136_v1 = vadd.f32 %v1896_v40, %v1895_v42  ;;  %v2508_v40 = vld [vmem:[#allocation5 + $0xc0] sm:$0xff]  ;;  %v2507_v42 = vld [vmem:[#allocation5 + $0xb8] sm:$0xff] }
 0x62e   :  { %6476 = vmatmul.mubr.f32.vlgmr.msra.gmra.mxu1 %v9136_v1  ;;  %6511 = vmatmul.mubr.f32.vlgmr.msra.gmra.mxu0 %v9136_v1 }
 0x62f   :  { %6514 = vmatpush3.msra.mxu1 %v8879_v62  ;;  %6545 = vmatprep.mubr.msk.f32.mxu1 %vm8000_vm1, %v10651_v35 }
 0x630   :  { %6515 = vmatprep.subr.mxu1 %v10651_v35  ;;  %6549 = vmatpush3.msra.mxu0 %v8707_v2  ;;  %v10689_v2 = vld [vmem:[#allocation18_spill] sm:$0xff] }
 0x631   :  { %6516 = vmatpush3.msra.mxu1 %v8886_v16  ;;  %6550 = vmatprep.subr.mxu0 %v10651_v35 }
 0x632   :  { %6517 = vmatprep.subr.mxu1 %v10651_v35  ;;  %6551 = vmatpush3.msra.mxu0 %v8713_v10  ;;  %v10690_v10 = vld [vmem:[#allocation24_spill] sm:$0xff] }
 0x633   :  { %6518 = vmatpush3.msra.mxu1 %v8892_v17  ;;  %6552 = vmatprep.subr.mxu0 %v10651_v35 }
 0x634   :  { %6519 = vmatprep.subr.mxu1 %v10651_v35  ;;  %6553 = vmatpush3.msra.mxu0 %v8719_v44  ;;  %v10691_v44 = vld [vmem:[#allocation25_spill] sm:$0xff] }
 0x635   :  { %6520 = vmatpush3.msra.mxu1 %v8898_v18  ;;  %6554 = vmatprep.subr.mxu0 %v10651_v35 }
 0x636   :  { %6521 = vmatprep.subr.mxu1 %v10651_v35  ;;  %6555 = vmatpush3.msra.mxu0 %v8725_v45  ;;  %v10692_v45 = vld [vmem:[#allocation12_spill] sm:$0xff] }
 0x637   :  { %6522 = vmatpush3.msra.mxu1 %v8904_v19  ;;  %6556 = vmatprep.subr.mxu0 %v10651_v35 }
 0x638   :  { %6523 = vmatprep.subr.mxu1 %v10651_v35  ;;  %6557 = vmatpush3.msra.mxu0 %v8731_v46  ;;  %v10693_v46 = vld [vmem:[#allocation13_spill] sm:$0xff] }
 0x639   :  { %6524 = vmatpush3.msra.mxu1 %v8910_v20  ;;  %6558 = vmatprep.subr.mxu0 %v10651_v35 }
 0x63a   :  { %6525 = vmatprep.subr.mxu1 %v10651_v35  ;;  %6559 = vmatpush3.msra.mxu0 %v8737_v47  ;;  %v2386_v47 = vld [vmem:[#allocation5 + $0x78] sm:$0xff] }
 0x63b   :  { %6526 = vmatpush3.msra.mxu1 %v8916_v21  ;;  %6560 = vmatprep.subr.mxu0 %v10651_v35 }
 0x63c   :  { %6527 = vmatprep.subr.mxu1 %v10651_v35  ;;  %6561 = vmatpush3.msra.mxu0 %v8743_v48 }
 0x63d   :  { %6528 = vmatpush3.msra.mxu1 %v8922_v22  ;;  %6562 = vmatprep.subr.mxu0 %v10651_v35 }
 0x63e   :  { %6529 = vmatprep.subr.mxu1 %v10651_v35  ;;  %6563 = vmatpush3.msra.mxu0 %v8749_v49 }
 0x63f   :  { %6530 = vmatpush3.msra.mxu1 %v8928_v23  ;;  %6564 = vmatprep.subr.mxu0 %v10651_v35 }
 0x640   :  { %6531 = vmatprep.subr.mxu1 %v10651_v35  ;;  %6565 = vmatpush3.msra.mxu0 %v8755_v50  ;;  %v10694_v50 = vld [vmem:[#allocation22_spill] sm:$0xff] }
 0x641   :  { %6532 = vmatpush3.msra.mxu1 %v8934_v24  ;;  %6566 = vmatprep.subr.mxu0 %v10651_v35 }
 0x642   :  { %6533 = vmatprep.subr.mxu1 %v10651_v35  ;;  %6567 = vmatpush3.msra.mxu0 %v8761_v51 }
 0x643   :  { %6534 = vmatpush3.msra.mxu1 %v8940_v25  ;;  %6568 = vmatprep.subr.mxu0 %v10651_v35 }
 0x644   :  { %6535 = vmatprep.subr.mxu1 %v10651_v35  ;;  %6569 = vmatpush3.msra.mxu0 %v8767_v52 }
 0x645   :  { %6536 = vmatpush3.msra.mxu1 %v8946_v26  ;;  %6570 = vmatprep.subr.mxu0 %v10651_v35 }
 0x646   :  { %6537 = vmatprep.subr.mxu1 %v10651_v35  ;;  %6571 = vmatpush3.msra.mxu0 %v8773_v53 }
 0x647   :  { %6538 = vmatpush3.msra.mxu1 %v8952_v27  ;;  %6572 = vmatprep.subr.mxu0 %v10651_v35 }
 0x648   :  { %6539 = vmatprep.subr.mxu1 %v10651_v35  ;;  %6573 = vmatpush3.msra.mxu0 %v8779_v54 }
 0x649   :  { %6540 = vmatpush3.msra.mxu1 %v8958_v28  ;;  %6574 = vmatprep.subr.mxu0 %v10651_v35 }
 0x64a   :  { %6541 = vmatprep.subr.mxu1 %v10651_v35  ;;  %6575 = vmatpush3.msra.mxu0 %v8785_v55  ;;  %v10695_v55 = vld [vmem:[#allocation35_spill] sm:$0xff] }
 0x64b   :  { %6542 = vmatpush3.msra.mxu1 %v8964_v29  ;;  %6576 = vmatprep.subr.mxu0 %v10651_v35 }
 0x64c   :  { %6543 = vmatprep.subr.mxu1 %v10651_v35  ;;  %6577 = vmatpush3.msra.mxu0 %v8791_v56 }
 0x64d   :  { %6544 = vmatpush3.msra.mxu1 %v8970_v30  ;;  %6578 = vmatprep.subr.mxu0 %v10651_v35 }
 0x64e   :  { %6546 = vmatmul.mubr.f32.vlgmr.msra.gmra.mxu1 %v9136_v1  ;;  %6583 = vmatprep.subr.mxu1 %v10651_v35 }
 0x64f   :  { %6584 = vmatpush3.msra.mxu1 %v8798_v57  ;;  %6579 = vmatpush3.msra.mxu0 %v8801_v58 }
 0x650   :  { %6585 = vmatprep.subr.mxu1 %v10651_v35  ;;  %6580 = vmatprep.mubr.msk.f32.mxu0 %vm8000_vm1, %v10651_v35 }
 0x651   :  { %6586 = vmatpush3.msra.mxu1 %v8807_v59  ;;  %6615 = vmatprep.mubr.msk.f32.mxu1 %vm8000_vm1, %v10651_v35 }
 0x652   :  { %6587 = vmatprep.subr.mxu1 %v10651_v35  ;;  %6618 = vmatprep.subr.mxu0 %v10651_v35 }
 0x653   :  { %6588 = vmatpush3.msra.mxu1 %v8814_v43 }
 0x654   :  { %6589 = vmatprep.subr.mxu1 %v10651_v35 }
 0x655   :  { %6590 = vmatpush3.msra.mxu1 %v8818_v63 }
 0x656   :  { %6591 = vmatprep.subr.mxu1 %v10651_v35 }
 0x657   :  { %6592 = vmatpush3.msra.mxu1 %v8822_v33 }
 0x658   :  { %6593 = vmatprep.subr.mxu1 %v10651_v35 }
 0x659   :  { %6594 = vmatpush3.msra.mxu1 %v8826_v11 }
 0x65a   :  { %6595 = vmatprep.subr.mxu1 %v10651_v35 }
 0x65b   :  { %6596 = vmatpush3.msra.mxu1 %v8830_v6 }
 0x65c   :  { %6597 = vmatprep.subr.mxu1 %v10651_v35 }
 0x65d   :  { %6598 = vmatpush3.msra.mxu1 %v8834_v0 }
 0x65e   :  { %6599 = vmatprep.subr.mxu1 %v10651_v35 }
 0x65f   :  { %6600 = vmatpush3.msra.mxu1 %v8838_v9 }
 0x660   :  { %6601 = vmatprep.subr.mxu1 %v10651_v35 }
 0x661   :  { %6602 = vmatpush3.msra.mxu1 %v8842_v4  ;;  %v10696_v4 = vld [vmem:[#allocation37_spill] sm:$0xff] }
 0x662   :  { %6603 = vmatprep.subr.mxu1 %v10651_v35 }
 0x663   :  { %6604 = vmatpush3.msra.mxu1 %v8846_v31 }
 0x664   :  { %6605 = vmatprep.subr.mxu1 %v10651_v35 }
 0x665   :  { %6606 = vmatpush3.msra.mxu1 %v10689_v2  ;;  %v2506_v2 = vld [vmem:[#allocation5 + $0xb0] sm:$0xff] }
 0x666   :  { %6607 = vmatprep.subr.mxu1 %v10651_v35 }
 0x667   :  { %6608 = vmatpush3.msra.mxu1 %v10690_v10  ;;  %v2505_v10 = vld [vmem:[#allocation5 + $0xa8] sm:$0xff] }
 0x668   :  { %6609 = vmatprep.subr.mxu1 %v10651_v35 }
 0x669   :  { %6610 = vmatpush3.msra.mxu1 %v10691_v44  ;;  %v2504_v44 = vld [vmem:[#allocation5 + $0xa0] sm:$0xff] }
 0x66a   :  { %6611 = vmatprep.subr.mxu1 %v10651_v35 }
 0x66b   :  { %6612 = vmatpush3.msra.mxu1 %v10692_v45  ;;  %v2503_v45 = vld [vmem:[#allocation5 + $0x98] sm:$0xff] }
 0x66c   :  { %6613 = vmatprep.subr.mxu1 %v10651_v35 }
 0x66d   :  { %6614 = vmatpush3.msra.mxu1 %v10693_v46  ;;  %v2502_v46 = vld [vmem:[#allocation5 + $0x90] sm:$0xff] }
 0x66e   :  { %6653 = vmatprep.subr.mxu1 %v2386_v47 }
 0x6ee   :  { %v1965_v48 = vpop.f32.mrf.mxu1  ;;  %v2035_v49 = vpop.f32.mrf.mxu0 }
 0x6ef   :  { %v2109_v51 = vadd.f32 %v1965_v48, %v10694_v50  ;;  %v2116_v56 = vadd.f32 %v2035_v49, %v10695_v55  ;;  %v2500_v48 = vld [vmem:[#allocation5 + $0x80] sm:$0xff]  ;;  %v2645_v49 = vld [vmem:[#allocation5 + $0x178] sm:$0xff]  ;;  %v2644_v50 = vld [vmem:[#allocation5 + $0x170] sm:$0xff] }
 0x6f0   :  { %v6477_v52 = vpop.f32.mrf.mxu1  ;;  %v6512_v53 = vpop.f32.mrf.mxu0  ;;  %v9308_v55 = vld [vmem:[#allocation7 + $0x68] sm:$0xff] }
 0x6f1   :  { %v4811_v54 = vmul.f32 -1.442695, %v2109_v51  ;;  %v4812_v57 = vmul.f32 -1.442695, %v2116_v56  ;;  %v9300_v51 = vld [vmem:[#allocation7 + $0x78] sm:$0xff]  ;;  %v2643_v52 = vld [vmem:[#allocation5 + $0x168] sm:$0xff] }
 0x6f2   :  { %v9304_v53 = vld [vmem:[#allocation7 + $0x70] sm:$0xff]  ;;  %v2641_v56 = vld [vmem:[#allocation5 + $0x158] sm:$0xff] }
 0x6f3   :  { %7729 = vpow2.f32 %v4811_v54  ;;  %v2642_v54 = vld [vmem:[#allocation5 + $0x160] sm:$0xff] }
 0x6f4   :  { %7731 = vpow2.f32 %v4812_v57  ;;  %v9312_v57 = vld [vmem:[#allocation7 + $0x60] sm:$0xff] }
 0x700   :  { %v7730_v58 = vpop.eup %7729 }
 0x701   :  { %v2113_v59 = vadd.f32 1.0, %v7730_v58  ;;  %v7732_v43 = vpop.eup %7731  ;;  %v2640_v58 = vld [vmem:[#allocation5 + $0x150] sm:$0xff] }
 0x702   :  { %v2120_v63 = vadd.f32 1.0, %v7732_v43  ;;  %v2639_v43 = vld [vmem:[#allocation5 + $0x148] sm:$0xff] }
 0x703   :  { %7733 = vrcp.f32 %v2113_v59  ;;  %v9316_v59 = vld [vmem:[#allocation7 + $0x58] sm:$0xff] }
 0x704   :  { %7735 = vrcp.f32 %v2120_v63  ;;  %v9320_v63 = vld [vmem:[#allocation7 + $0x50] sm:$0xff] }
 0x70e   :  { %v2105_v33 = vpop.f32.mrf.mxu1 }
 0x70f   :  { %v2106_v11 = vadd.f32 %v9019_v14, %v2105_v33  ;;  %v2384_v14 = vld [vmem:[#allocation5 + $0x68] sm:$0xff]  ;;  %v2638_v33 = vld [vmem:[#allocation5 + $0x140] sm:$0xff] }
 0x710   :  { %v7734_v6 = vpop.eup %7733  ;;  %v6547_v0 = vpop.f32.mrf.mxu1 }
 0x711   :  { %v2123_v9 = vmul.f32 %v7734_v6, %v2106_v11  ;;  %v7736_v5 = vpop.eup %7735  ;;  %v9324_v11 = vld [vmem:[#allocation7 + $0x48] sm:$0xff]  ;;  %v2637_v6 = vld [vmem:[#allocation5 + $0x138] sm:$0xff]  ;;  %v9327_v0 = vld [vmem:[#allocation7 + $0x40] sm:$0xff] }
 0x712   :  { %v2126_v12 = vsub.f32 1.0, %v7736_v5  ;;  %v2128_v37 = vmul.f32 %v7736_v5, %v9136_v1  ;;  %v9334_v5 = vld [vmem:[#allocation7 + $0x30] sm:$0xff] }
 0x713   :  { %v2124_v31 = vadd.f32 %v2123_v9, %v10696_v4  ;;  %v2636_v9 = vld [vmem:[#allocation5 + $0x130] sm:$0xff]  ;;  %v9330_v4 = vld [vmem:[#allocation7 + $0x38] sm:$0xff] }
 0x715   :  { %7737 = vtanh.f32 %v2124_v31  ;;  %v2635_v31 = vld [vmem:[#allocation5 + $0x128] sm:$0xff] }
 0x722   :  { %v7738_v13 = vpop.eup %7737 }
 0x723   :  { %v2127_v7 = vmul.f32 %v7738_v13, %v2126_v12  ;;  %v2634_v12 = vld [vmem:[#allocation5 + $0x120] sm:$0xff]  ;;  %v9338_v13 = vld [vmem:[#allocation7 + $0x28] sm:$0xff] }
 0x725   :  { %v9247_v15 = vadd.f32 %v2128_v37, %v2127_v7  ;;  %v2633_v37 = vld [vmem:[#allocation5 + $0x118] sm:$0xff]  ;;  %v9342_v7 = vld [vmem:[#allocation7 + $0x20] sm:$0xff] }
 0x727   :  { %6581 = vmatmul.mubr.f32.vlgmr.msra.gmra.mxu0 %v9247_v15  ;;  %6616 = vmatmul.mubr.f32.vlgmr.msra.gmra.mxu1 %v9247_v15 }
 0x728   :  { %6619 = vmatpush3.msra.mxu0 %v8879_v62  ;;  %6654 = vmatpush3.msra.mxu1 %v2386_v47  ;;  %v2382_v62 = vld [vmem:[#allocation5 + $0x58] sm:$0xff]  ;;  %v2501_v47 = vld [vmem:[#allocation5 + $0x88] sm:$0xff] }
 0x729   :  { %6620 = vmatprep.subr.mxu0 %v10651_v35  ;;  %6655 = vmatprep.subr.mxu1 %v2385_v60 }
 0x72a   :  { %6685 = vmatprep.mubr.f32.mxu1 %v10697_v8  ;;  %6621 = vmatpush3.msra.mxu0 %v8886_v16  ;;  %v2380_v16 = vld [vmem:[#allocation5 + $0x48] sm:$0xff] }
 0x72b   :  { %6656 = vmatpush3.msra.mxu1 %v2385_v60  ;;  %6622 = vmatprep.subr.mxu0 %v10651_v35  ;;  %v2632_v60 = vld [vmem:[#allocation5 + $0x110] sm:$0xff] }
 0x72c   :  { %6657 = vmatprep.subr.mxu1 %v2384_v14  ;;  %6623 = vmatpush3.msra.mxu0 %v8892_v17  ;;  %v2379_v17 = vld [vmem:[#allocation5 + $0x40] sm:$0xff] }
 0x72d   :  { %6658 = vmatpush3.msra.mxu1 %v2384_v14  ;;  %6624 = vmatprep.subr.mxu0 %v10651_v35  ;;  %v9346_v14 = vld [vmem:[#allocation7 + $0x18] sm:$0xff] }
 0x72e   :  { %6659 = vmatprep.subr.mxu1 %v2383_v3  ;;  %6625 = vmatpush3.msra.mxu0 %v8898_v18  ;;  %v2378_v18 = vld [vmem:[#allocation5 + $0x38] sm:$0xff] }
 0x72f   :  { %6660 = vmatpush3.msra.mxu1 %v2383_v3  ;;  %6626 = vmatprep.subr.mxu0 %v10651_v35  ;;  %v2631_v3 = vld [vmem:[#allocation5 + $0x108] sm:$0xff] }
 0x730   :  { %6661 = vmatprep.subr.mxu1 %v2382_v62  ;;  %6627 = vmatpush3.msra.mxu0 %v8904_v19  ;;  %v2377_v19 = vld [vmem:[#allocation5 + $0x30] sm:$0xff] }
 0x731   :  { %6662 = vmatpush3.msra.mxu1 %v2382_v62  ;;  %6628 = vmatprep.subr.mxu0 %v10651_v35  ;;  %v9350_v62 = vld [vmem:[#allocation7 + $0x10] sm:$0xff] }
 0x732   :  { %6663 = vmatprep.subr.mxu1 %v2381_v41  ;;  %6629 = vmatpush3.msra.mxu0 %v8910_v20  ;;  %v2376_v20 = vld [vmem:[#allocation5 + $0x28] sm:$0xff] }
 0x733   :  { %6664 = vmatpush3.msra.mxu1 %v2381_v41  ;;  %6630 = vmatprep.subr.mxu0 %v10651_v35  ;;  %v2630_v41 = vld [vmem:[#allocation5 + $0x100] sm:$0xff] }
 0x734   :  { %6665 = vmatprep.subr.mxu1 %v2380_v16  ;;  %6631 = vmatpush3.msra.mxu0 %v8916_v21  ;;  %v2375_v21 = vld [vmem:[#allocation5 + $0x20] sm:$0xff] }
 0x735   :  { %6666 = vmatpush3.msra.mxu1 %v2380_v16  ;;  %6632 = vmatprep.subr.mxu0 %v10651_v35  ;;  %v9355_v16 = vld [vmem:[#allocation7 + $0x8] sm:$0xff] }
 0x736   :  { %6667 = vmatprep.subr.mxu1 %v2379_v17  ;;  %6633 = vmatpush3.msra.mxu0 %v8922_v22  ;;  %v2374_v22 = vld [vmem:[#allocation5 + $0x18] sm:$0xff] }
 0x737   :  { %6668 = vmatpush3.msra.mxu1 %v2379_v17  ;;  %6634 = vmatprep.subr.mxu0 %v10651_v35  ;;  %v9358_v17 = vld [vmem:[#allocation7] sm:$0xff] }
 0x738   :  { %6669 = vmatprep.subr.mxu1 %v2378_v18  ;;  %6635 = vmatpush3.msra.mxu0 %v8928_v23  ;;  %v2373_v23 = vld [vmem:[#allocation5 + $0x10] sm:$0xff] }
 0x739   :  { %6670 = vmatpush3.msra.mxu1 %v2378_v18  ;;  %6636 = vmatprep.subr.mxu0 %v10651_v35 }
 0x73a   :  { %6671 = vmatprep.subr.mxu1 %v2377_v19  ;;  %6637 = vmatpush3.msra.mxu0 %v8934_v24  ;;  %v2372_v24 = vld [vmem:[#allocation5 + $0x8] sm:$0xff] }
 0x73b   :  { %6672 = vmatpush3.msra.mxu1 %v2377_v19  ;;  %6638 = vmatprep.subr.mxu0 %v10651_v35 }
 0x73c   :  { %6673 = vmatprep.subr.mxu1 %v2376_v20  ;;  %6639 = vmatpush3.msra.mxu0 %v8940_v25  ;;  %v2371_v25 = vld [vmem:[#allocation5] sm:$0xff] }
 0x73d   :  { %6674 = vmatpush3.msra.mxu1 %v2376_v20  ;;  %6640 = vmatprep.subr.mxu0 %v10651_v35  ;;  %v10701_v20 = vld [vmem:[#allocation20_spill] sm:$0xff] }
 0x73e   :  { %6675 = vmatprep.subr.mxu1 %v2375_v21  ;;  %6641 = vmatpush3.msra.mxu0 %v8946_v26  ;;  %v2515_v26 = vld [vmem:[#allocation5 + $0xf8] sm:$0xff] }
 0x73f   :  { %6676 = vmatpush3.msra.mxu1 %v2375_v21  ;;  %6642 = vmatprep.subr.mxu0 %v10651_v35 }
 0x740   :  { %6677 = vmatprep.subr.mxu1 %v2374_v22  ;;  %6643 = vmatpush3.msra.mxu0 %v8952_v27  ;;  %v10698_v27 = vld [vmem:[#allocation10_spill] sm:$0xff] }
 0x741   :  { %6678 = vmatpush3.msra.mxu1 %v2374_v22  ;;  %6644 = vmatprep.subr.mxu0 %v10651_v35 }
 0x742   :  { %6679 = vmatprep.subr.mxu1 %v2373_v23  ;;  %6645 = vmatpush3.msra.mxu0 %v8958_v28  ;;  %v2514_v28 = vld [vmem:[#allocation5 + $0xf0] sm:$0xff] }
 0x743   :  { %6680 = vmatpush3.msra.mxu1 %v2373_v23  ;;  %6646 = vmatprep.subr.mxu0 %v10651_v35 }
 0x744   :  { %6681 = vmatprep.subr.mxu1 %v2372_v24  ;;  %6647 = vmatpush3.msra.mxu0 %v8964_v29  ;;  %v2513_v29 = vld [vmem:[#allocation5 + $0xe8] sm:$0xff] }
 0x745   :  { %6682 = vmatpush3.msra.mxu1 %v2372_v24  ;;  %6648 = vmatprep.subr.mxu0 %v10651_v35 }
 0x746   :  { %6683 = vmatprep.subr.mxu1 %v2371_v25  ;;  %6649 = vmatpush3.msra.mxu0 %v8970_v30  ;;  %v10700_v30 = vld [vmem:[#allocation14_spill] sm:$0xff] }
 0x747   :  { %6650 = vmatprep.mubr.msk.f32.mxu0 %vm8000_vm1, %v10651_v35  ;;  %6684 = vmatpush3.msra.mxu1 %v2371_v25  ;;  %v10702_v25 = vld [vmem:[#allocation34_spill] sm:$0xff] }
 0x748   :  { %6651 = vmatmul.mubr.f32.vlgmr.msra.gmra.mxu0 %v9247_v15  ;;  %6686 = vmatmul.mubr.f32.vlgmr.msra.gmra.mxu1 %v10698_v27 }
 0x749   :  { %6697 = vmatprep.subr.mxu0 %v2515_v26  ;;  %6688 = vmatprep.mubr.f32.mxu1 %v10699_v36 }
 0x74a   :  { %6698 = vmatpush3.msra.mxu0 %v2515_v26  ;;  %6729 = vmatprep.mubr.f32.mxu0 %v10697_v8 }
 0x74b   :  { %6699 = vmatprep.subr.mxu0 %v2514_v28  ;;  %6741 = vmatprep.subr.mxu1 %v2645_v49 }
 0x74c   :  { %6700 = vmatpush3.msra.mxu0 %v2514_v28  ;;  %6689 = vmatmul.mubr.f32.gmra.mxu1 %v10700_v30 }
 0x74d   :  { %6701 = vmatprep.subr.mxu0 %v2513_v29  ;;  %6691 = vmatprep.mubr.f32.mxu1 %v9024_v61 }
 0x74e   :  { %6702 = vmatpush3.msra.mxu0 %v2513_v29  ;;  %6742 = vmatpush3.msra.mxu1 %v2645_v49 }
 0x74f   :  { %6703 = vmatprep.subr.mxu0 %v2512_v39  ;;  %6743 = vmatprep.subr.mxu1 %v2644_v50 }
 0x750   :  { %6704 = vmatpush3.msra.mxu0 %v2512_v39  ;;  %6692 = vmatmul.mubr.f32.gmra.mxu1 %v9136_v1 }
 0x751   :  { %6705 = vmatprep.subr.mxu0 %v2511_v38  ;;  %6694 = vmatprep.mubr.f32.mxu1 %v9247_v15 }
 0x752   :  { %6706 = vmatpush3.msra.mxu0 %v2511_v38  ;;  %6744 = vmatpush3.msra.mxu1 %v2644_v50 }
 0x753   :  { %6707 = vmatprep.subr.mxu0 %v2510_v34  ;;  %6745 = vmatprep.subr.mxu1 %v2643_v52 }
 0x754   :  { %6708 = vmatpush3.msra.mxu0 %v2510_v34  ;;  %6746 = vmatpush3.msra.mxu1 %v2643_v52 }
 0x755   :  { %6709 = vmatprep.subr.mxu0 %v2509_v32  ;;  %6747 = vmatprep.subr.mxu1 %v2642_v54 }
 0x756   :  { %6710 = vmatpush3.msra.mxu0 %v2509_v32  ;;  %6748 = vmatpush3.msra.mxu1 %v2642_v54 }
 0x757   :  { %6711 = vmatprep.subr.mxu0 %v2508_v40  ;;  %6749 = vmatprep.subr.mxu1 %v2641_v56 }
 0x758   :  { %6712 = vmatpush3.msra.mxu0 %v2508_v40  ;;  %6750 = vmatpush3.msra.mxu1 %v2641_v56  ;;  %v9375_v56 = vld [vmem:[#allocation7 + $0xf8] sm:$0xff] }
 0x759   :  { %6713 = vmatprep.subr.mxu0 %v2507_v42  ;;  %6751 = vmatprep.subr.mxu1 %v2640_v58 }
 0x75a   :  { %6714 = vmatpush3.msra.mxu0 %v2507_v42  ;;  %6752 = vmatpush3.msra.mxu1 %v2640_v58  ;;  %v7878_v42 = vld [vmem:[%s10561_s3 + $0x3] ss:$0 sm:$0xff]  ;;  %v9377_v58 = vld [vmem:[#allocation7 + $0x178] sm:$0xff] }
 0x75b   :  { %6715 = vmatprep.subr.mxu0 %v2506_v2  ;;  %6753 = vmatprep.subr.mxu1 %v2639_v43 }
 0x75c   :  { %6716 = vmatpush3.msra.mxu0 %v2506_v2  ;;  %6754 = vmatpush3.msra.mxu1 %v2639_v43  ;;  %v9381_v43 = vld [vmem:[#allocation7 + $0xf0] sm:$0xff] }
 0x75d   :  { %6717 = vmatprep.subr.mxu0 %v2505_v10  ;;  %6755 = vmatprep.subr.mxu1 %v2638_v33 }
 0x75e   :  { %6718 = vmatpush3.msra.mxu0 %v2505_v10  ;;  %6756 = vmatpush3.msra.mxu1 %v2638_v33  ;;  %v9385_v33 = vld [vmem:[#allocation7 + $0x170] sm:$0xff] }
 0x75f   :  { %6719 = vmatprep.subr.mxu0 %v2504_v44  ;;  %6757 = vmatprep.subr.mxu1 %v2637_v6 }
 0x760   :  { %6720 = vmatpush3.msra.mxu0 %v2504_v44  ;;  %6758 = vmatpush3.msra.mxu1 %v2637_v6  ;;  %v9403_v6 = vld [vmem:[#allocation7 + $0x160] sm:$0xff] }
 0x761   :  { %6721 = vmatprep.subr.mxu0 %v2503_v45  ;;  %6759 = vmatprep.subr.mxu1 %v2636_v9 }
 0x762   :  { %6722 = vmatpush3.msra.mxu0 %v2503_v45  ;;  %6760 = vmatpush3.msra.mxu1 %v2636_v9  ;;  %v10703_v45 = vld [vmem:[#allocation36_spill] sm:$0xff]  ;;  %v9409_v9 = vld [vmem:[#allocation7 + $0xd8] sm:$0xff] }
 0x763   :  { %6723 = vmatprep.subr.mxu0 %v2502_v46  ;;  %6761 = vmatprep.subr.mxu1 %v2635_v31 }
 0x764   :  { %6724 = vmatpush3.msra.mxu0 %v2502_v46  ;;  %6762 = vmatpush3.msra.mxu1 %v2635_v31  ;;  %v9421_v31 = vld [vmem:[#allocation7 + $0x150] sm:$0xff] }
 0x765   :  { %6725 = vmatprep.subr.mxu0 %v2501_v47  ;;  %6763 = vmatprep.subr.mxu1 %v2634_v12 }
 0x766   :  { %6726 = vmatpush3.msra.mxu0 %v2501_v47  ;;  %6764 = vmatpush3.msra.mxu1 %v2634_v12  ;;  %v9427_v12 = vld [vmem:[#allocation7 + $0xc8] sm:$0xff] }
 0x767   :  { %6727 = vmatprep.subr.mxu0 %v2500_v48  ;;  %6765 = vmatprep.subr.mxu1 %v2633_v37 }
 0x768   :  { %6728 = vmatpush3.msra.mxu0 %v2500_v48  ;;  %6766 = vmatpush3.msra.mxu1 %v2633_v37  ;;  %v9436_v37 = vld [vmem:[#allocation7 + $0x140] sm:$0xff] }
 0x769   :  { %6730 = vmatmul.mubr.f32.vlgmr.msra.gmra.mxu0 %v10698_v27  ;;  %6785 = vmatprep.subr.mxu0 %v10651_v35 }
 0x76a   :  { %6732 = vmatprep.mubr.f32.mxu0 %v10699_v36  ;;  %6786 = vmatpush3.msra.mxu0 %v9300_v51 }
 0x76b   :  { %6787 = vmatprep.subr.mxu0 %v10651_v35  ;;  %6767 = vmatprep.subr.mxu1 %v2632_v60 }
 0x76c   :  { %6788 = vmatpush3.msra.mxu0 %v9304_v53  ;;  %6768 = vmatpush3.msra.mxu1 %v2632_v60  ;;  %v9442_v60 = vld [vmem:[#allocation7 + $0xb8] sm:$0xff] }
 0x76d   :  { %6733 = vmatmul.mubr.f32.gmra.mxu0 %v10700_v30  ;;  %6789 = vmatprep.subr.mxu0 %v10651_v35 }
 0x76e   :  { %6735 = vmatprep.mubr.f32.mxu0 %v9024_v61  ;;  %6790 = vmatpush3.msra.mxu0 %v9308_v55 }
 0x76f   :  { %6791 = vmatprep.subr.mxu0 %v10651_v35  ;;  %6769 = vmatprep.subr.mxu1 %v2631_v3 }
 0x770   :  { %6792 = vmatpush3.msra.mxu0 %v9312_v57  ;;  %6770 = vmatpush3.msra.mxu1 %v2631_v3  ;;  %v9444_v3 = vld [vmem:[#allocation7 + $0x138] sm:$0xff] }
 0x771   :  { %6736 = vmatmul.mubr.f32.gmra.mxu0 %v9136_v1  ;;  %6793 = vmatprep.subr.mxu0 %v10651_v35 }
 0x772   :  { %6738 = vmatprep.mubr.f32.mxu0 %v9247_v15  ;;  %6794 = vmatpush3.msra.mxu0 %v9316_v59 }
 0x773   :  { %6795 = vmatprep.subr.mxu0 %v10651_v35  ;;  %6771 = vmatprep.subr.mxu1 %v2630_v41 }
 0x774   :  { %6796 = vmatpush3.msra.mxu0 %v9320_v63  ;;  %6772 = vmatpush3.msra.mxu1 %v2630_v41  ;;  %v9450_v41 = vld [vmem:[#allocation7 + $0xb0] sm:$0xff] }
 0x775   :  { %6797 = vmatprep.subr.mxu0 %v10651_v35  ;;  %6820 = vmatprep.subr.mxu1 %v10651_v35 }
 0x776   :  { %6798 = vmatpush3.msra.mxu0 %v9324_v11 }
 0x777   :  { %6799 = vmatprep.subr.mxu0 %v10651_v35 }
 0x778   :  { %6800 = vmatpush3.msra.mxu0 %v9327_v0 }
 0x779   :  { %6801 = vmatprep.subr.mxu0 %v10651_v35 }
 0x77a   :  { %6802 = vmatpush3.msra.mxu0 %v9330_v4 }
 0x77b   :  { %6803 = vmatprep.subr.mxu0 %v10651_v35 }
 0x77c   :  { %6804 = vmatpush3.msra.mxu0 %v9334_v5 }
 0x77d   :  { %6805 = vmatprep.subr.mxu0 %v10651_v35 }
 0x77e   :  { %6806 = vmatpush3.msra.mxu0 %v9338_v13 }
 0x77f   :  { %6807 = vmatprep.subr.mxu0 %v10651_v35 }
 0x780   :  { %6808 = vmatpush3.msra.mxu0 %v9342_v7 }
 0x781   :  { %6809 = vmatprep.subr.mxu0 %v10651_v35 }
 0x782   :  { %6810 = vmatpush3.msra.mxu0 %v9346_v14 }
 0x783   :  { %6811 = vmatprep.subr.mxu0 %v10651_v35 }
 0x784   :  { %6812 = vmatpush3.msra.mxu0 %v9350_v62 }
 0x785   :  { %6813 = vmatprep.subr.mxu0 %v10651_v35 }
 0x786   :  { %6814 = vmatpush3.msra.mxu0 %v9355_v16 }
 0x787   :  { %6815 = vmatprep.subr.mxu0 %v10651_v35 }
 0x788   :  { %6816 = vmatpush3.msra.mxu0 %v9358_v17 }
 0x789   :  { %6855 = vmatprep.subr.mxu0 %v10651_v35 }
 0x7e7   :  { %v2197_v18 = vpop.f32.mrf.mxu0  ;;  %v2267_v19 = vpop.f32.mrf.mxu1 }
 0x7e8   :  { %v2341_v21 = vadd.f32 %v2197_v18, %v10701_v20  ;;  %v2348_v26 = vadd.f32 %v2267_v19, %v10702_v25  ;;  %v9452_v18 = vld [vmem:[#allocation7 + $0x130] sm:$0xff]  ;;  %v9458_v19 = vld [vmem:[#allocation7 + $0xa8] sm:$0xff] }
 0x7e9   :  { %v6582_v22 = vpop.f32.mrf.mxu0  ;;  %v6617_v23 = vpop.f32.mrf.mxu1  ;;  %10704 = vst [vmem:[#allocation15_spill] sm:$0xff] %v9458_v19  ;;  %v9460_v20 = vld [vmem:[#allocation7 + $0x128] sm:$0xff]  ;;  %v9482_v25 = vld [vmem:[#allocation7 + $0x90] sm:$0xff] }
 0x7ea   :  { %v4813_v24 = vmul.f32 -1.442695, %v2341_v21  ;;  %v4814_v28 = vmul.f32 -1.442695, %v2348_v26  ;;  %v9466_v21 = vld [vmem:[#allocation7 + $0xa0] sm:$0xff]  ;;  %v9474_v23 = vld [vmem:[#allocation7 + $0x98] sm:$0xff] }
 0x7eb   :  { %10705 = vst [vmem:[#allocation16_spill] sm:$0xff] %v9466_v21  ;;  %v9468_v22 = vld [vmem:[#allocation7 + $0x120] sm:$0xff]  ;;  %10706 = vst [vmem:[#allocation23_spill] sm:$0xff] %v9474_v23  ;;  %v9484_v26 = vld [vmem:[#allocation7 + $0x110] sm:$0xff] }
 0x7ec   :  { %7739 = vpow2.f32 %v4813_v24  ;;  %v9476_v24 = vld [vmem:[#allocation7 + $0x118] sm:$0xff]  ;;  %10707 = vst [vmem:[#allocation27_spill] sm:$0xff] %v9482_v25 }
 0x7ed   :  { %7741 = vpow2.f32 %v4814_v28  ;;  %v9490_v28 = vld [vmem:[#allocation7 + $0x88] sm:$0xff] }
 0x7ee   :  { %10708 = vst [vmem:[#allocation29_spill] sm:$0xff] %v9490_v28 }
 0x7f9   :  { %v7740_v29 = vpop.eup %7739 }
 0x7fa   :  { %v2345_v39 = vadd.f32 1.0, %v7740_v29  ;;  %v7742_v38 = vpop.eup %7741  ;;  %v9492_v29 = vld [vmem:[#allocation7 + $0x108] sm:$0xff] }
 0x7fb   :  { %v2352_v34 = vadd.f32 1.0, %v7742_v38  ;;  %v9502_v38 = vld [vmem:[#allocation7 + $0x100] sm:$0xff] }
 0x7fc   :  { %7743 = vrcp.f32 %v2345_v39  ;;  %v9498_v39 = vld [vmem:[#allocation7 + $0x80] sm:$0xff] }
 0x7fd   :  { %7745 = vrcp.f32 %v2352_v34  ;;  %10709 = vst [vmem:[#allocation21_spill] sm:$0xff] %v9498_v39 }
 0x808   :  { %v2337_v32 = vpop.f32.mrf.mxu0  ;;  %v9584_v34 = vpop.f32.mrf.mxu1 }
 0x809   :  { %v7744_v40 = vpop.eup %7743  ;;  %v2338_v2 = vadd.f32 %v7878_v42, %v2337_v32  ;;  %10710 = vst [vmem:[#allocation26_spill] sm:$0xff] %v9584_v34 }
 0x80a   :  { %v6652_v10 = vpop.f32.mrf.mxu0  ;;  %v7746_v47 = vpop.eup %7745 }
 0x80b   :  { %v2355_v44 = vmul.f32 %v7744_v40, %v2338_v2  ;;  %v2358_v48 = vsub.f32 1.0, %v7746_v47  ;;  %v2360_v52 = vmul.f32 %v7746_v47, %v9247_v15  ;;  %v2460_v40 = vpop.f32.mrf.mxu1 }
 0x80d   :  { %v2356_v46 = vadd.f32 %v2355_v44, %v10703_v45  ;;  %v9588_v2 = vpop.f32.mrf.mxu1 }
 0x80e   :  { %10712 = vst [vmem:[#allocation19_spill] sm:$0xff] %v9588_v2 }
 0x80f   :  { %7747 = vtanh.f32 %v2356_v46  ;;  %v9592_v44 = vpop.f32.mrf.mxu1 }
 0x810   :  { %10714 = vst [vmem:[#allocation33_spill] sm:$0xff] %v9592_v44 }
 0x811   :  { %v9596_v46 = vpop.f32.mrf.mxu1 }
 0x812   :  { %10716 = vst [vmem:[#allocation30_spill] sm:$0xff] %v9596_v46 }
 0x81c   :  { %v7748_v49 = vpop.eup %7747 }
 0x81d   :  { %v2359_v50 = vmul.f32 %v7748_v49, %v2358_v48  ;;  %v9600_v48 = vpop.f32.mrf.mxu1 }
 0x81e   :  { %10718 = vst [vmem:[#allocation18_spill] sm:$0xff] %v9600_v48 }
 0x81f   :  { %v2361_v54 = vadd.f32 %v2360_v52, %v2359_v50 }
 0x821   :  { %6695 = vmatmul.mubr.f32.gmra.mxu1 %v2361_v54  ;;  %6739 = vmatmul.mubr.f32.gmra.mxu0 %v2361_v54 }
 0x822   :  { %6773 = vmatprep.mubr.f32.mxu1 %v10697_v8  ;;  %6817 = vmatprep.mubr.msk.f32.mxu0 %vm8000_vm1, %v10651_v35  ;;  %v9391_v8 = vld [vmem:[#allocation7 + $0xe8] sm:$0xff] }
 0x825   :  { %6774 = vmatmul.mubr.f32.vlgmr.msra.gmra.mxu1 %v10698_v27  ;;  %6818 = vmatmul.mubr.f32.vlgmr.msra.gmra.mxu0 %v10651_v35  ;;  %v9395_v27 = vld [vmem:[#allocation7 + $0x168] sm:$0xff] }
 0x826   :  { %6821 = vmatpush3.msra.mxu1 %v9375_v56  ;;  %6776 = vmatprep.mubr.f32.mxu1 %v10699_v36  ;;  %v9399_v36 = vld [vmem:[#allocation7 + $0xe0] sm:$0xff] }
 0x827   :  { %6822 = vmatprep.subr.mxu1 %v10651_v35  ;;  %6856 = vmatpush3.msra.mxu0 %v9377_v58 }
 0x828   :  { %6823 = vmatpush3.msra.mxu1 %v9381_v43  ;;  %6857 = vmatprep.subr.mxu0 %v10651_v35 }
 0x829   :  { %6824 = vmatprep.subr.mxu1 %v10651_v35  ;;  %6858 = vmatpush3.msra.mxu0 %v9385_v33  ;;  %v9586_v32 = vpop.f32.mrf.mxu0 }
 0x82a   :  { %6777 = vmatmul.mubr.f32.gmra.mxu1 %v10700_v30  ;;  %6859 = vmatprep.subr.mxu0 %v10651_v35  ;;  %v9413_v30 = vld [vmem:[#allocation7 + $0x158] sm:$0xff]  ;;  %10711 = vst [vmem:[#allocation28_spill] sm:$0xff] %v9586_v32 }
 0x82b   :  { %6825 = vmatpush3.msra.mxu1 %v9391_v8  ;;  %6779 = vmatprep.mubr.f32.mxu1 %v9024_v61  ;;  %v9417_v61 = vld [vmem:[#allocation7 + $0xd0] sm:$0xff]  ;;  %v2590_v42 = vpop.f32.mrf.mxu0 }
 0x82c   :  { %6826 = vmatprep.subr.mxu1 %v10651_v35  ;;  %6860 = vmatpush3.msra.mxu0 %v9395_v27 }
 0x82d   :  { %6827 = vmatpush3.msra.mxu1 %v9399_v36  ;;  %6861 = vmatprep.subr.mxu0 %v10651_v35  ;;  %v9590_v10 = vpop.f32.mrf.mxu0 }
 0x82e   :  { %6828 = vmatprep.subr.mxu1 %v10651_v35  ;;  %6862 = vmatpush3.msra.mxu0 %v9403_v6  ;;  %10713 = vst [vmem:[#allocation31_spill] sm:$0xff] %v9590_v10  ;;  %v4819_v10 = vld [vmem:[%s10564_s6 + $0x2] ss:$0 sm:$0xff] }
 0x82f   :  { %6780 = vmatmul.mubr.f32.gmra.mxu1 %v9136_v1  ;;  %6863 = vmatprep.subr.mxu0 %v10651_v35  ;;  %v9429_v1 = vld [vmem:[#allocation7 + $0x148] sm:$0xff]  ;;  %v9594_v45 = vpop.f32.mrf.mxu0 }
 0x830   :  { %6829 = vmatpush3.msra.mxu1 %v9409_v9  ;;  %6782 = vmatprep.mubr.f32.mxu1 %v9247_v15  ;;  %v9434_v15 = vld [vmem:[#allocation7 + $0xc0] sm:$0xff]  ;;  %10715 = vst [vmem:[#allocation17_spill] sm:$0xff] %v9594_v45 }
 0x831   :  { %6830 = vmatprep.subr.mxu1 %v10651_v35  ;;  %6864 = vmatpush3.msra.mxu0 %v9413_v30  ;;  %v9598_v47 = vpop.f32.mrf.mxu0 }
 0x832   :  { %6831 = vmatpush3.msra.mxu1 %v9417_v61  ;;  %6865 = vmatprep.subr.mxu0 %v10651_v35  ;;  %10717 = vst [vmem:[#allocation32_spill] sm:$0xff] %v9598_v47 }
 0x833   :  { %6832 = vmatprep.subr.mxu1 %v10651_v35  ;;  %6866 = vmatpush3.msra.mxu0 %v9421_v31  ;;  %v9602_v49 = vpop.f32.mrf.mxu0 }
 0x834   :  { %6783 = vmatmul.mubr.f32.gmra.mxu1 %v2361_v54  ;;  %6867 = vmatprep.subr.mxu0 %v10651_v35  ;;  %10719 = vst [vmem:[#allocation24_spill] sm:$0xff] %v9602_v49 }
 0x835   :  { %6833 = vmatpush3.msra.mxu1 %v9427_v12  ;;  %6868 = vmatpush3.msra.mxu0 %v9429_v1 }
 0x836   :  { %6834 = vmatprep.subr.mxu1 %v10651_v35  ;;  %6869 = vmatprep.subr.mxu0 %v10651_v35 }
 0x837   :  { %6835 = vmatpush3.msra.mxu1 %v9434_v15  ;;  %6870 = vmatpush3.msra.mxu0 %v9436_v37 }
 0x838   :  { %6836 = vmatprep.subr.mxu1 %v10651_v35  ;;  %6871 = vmatprep.subr.mxu0 %v10651_v35 }
 0x839   :  { %6837 = vmatpush3.msra.mxu1 %v9442_v60  ;;  %6872 = vmatpush3.msra.mxu0 %v9444_v3 }
 0x83a   :  { %6838 = vmatprep.subr.mxu1 %v10651_v35  ;;  %6873 = vmatprep.subr.mxu0 %v10651_v35 }
 0x83b   :  { %6839 = vmatpush3.msra.mxu1 %v9450_v41  ;;  %6874 = vmatpush3.msra.mxu0 %v9452_v18 }
 0x83c   :  { %6840 = vmatprep.subr.mxu1 %v10651_v35  ;;  %6875 = vmatprep.subr.mxu0 %v10651_v35 }
 0x83d   :  { %6841 = vmatpush3.msra.mxu1 %v9458_v19  ;;  %6876 = vmatpush3.msra.mxu0 %v9460_v20 }
 0x83e   :  { %6842 = vmatprep.subr.mxu1 %v10651_v35  ;;  %6877 = vmatprep.subr.mxu0 %v10651_v35 }
 0x83f   :  { %6843 = vmatpush3.msra.mxu1 %v9466_v21  ;;  %6878 = vmatpush3.msra.mxu0 %v9468_v22 }
 0x840   :  { %6844 = vmatprep.subr.mxu1 %v10651_v35  ;;  %6879 = vmatprep.subr.mxu0 %v10651_v35 }
 0x841   :  { %6845 = vmatpush3.msra.mxu1 %v9474_v23  ;;  %6880 = vmatpush3.msra.mxu0 %v9476_v24 }
 0x842   :  { %6846 = vmatprep.subr.mxu1 %v10651_v35  ;;  %6881 = vmatprep.subr.mxu0 %v10651_v35 }
 0x843   :  { %6847 = vmatpush3.msra.mxu1 %v9482_v25  ;;  %6882 = vmatpush3.msra.mxu0 %v9484_v26 }
 0x844   :  { %6848 = vmatprep.subr.mxu1 %v10651_v35  ;;  %6883 = vmatprep.subr.mxu0 %v10651_v35 }
 0x845   :  { %6849 = vmatpush3.msra.mxu1 %v9490_v28  ;;  %6884 = vmatpush3.msra.mxu0 %v9492_v29 }
 0x846   :  { %6850 = vmatprep.subr.mxu1 %v10651_v35  ;;  %6852 = vmatprep.mubr.msk.f32.mxu1 %vm8000_vm1, %v10651_v35 }
 0x847   :  { %6851 = vmatpush3.msra.mxu1 %v9498_v39  ;;  %6885 = vmatprep.subr.mxu0 %v10651_v35 }
 0x848   :  { %6853 = vmatmul.mubr.f32.vlgmr.msra.gmra.mxu1 %v10651_v35  ;;  %6886 = vmatpush3.msra.mxu0 %v9502_v38 }
 0x849   :  { %6887 = vmatprep.mubr.msk.f32.mxu0 %vm8000_vm1, %v10651_v35  ;;  %6890 = vmatprep.subr.mxu1 %v10651_v35 }
 0x84a   :  { %6888 = vmatmul.mubr.f32.vlgmr.msra.gmra.mxu0 %v10651_v35  ;;  %6891 = vmatpush3.msra.mxu1 %v9300_v51 }
 0x84b   :  { %6925 = vmatprep.subr.mxu0 %v10651_v35  ;;  %6892 = vmatprep.subr.mxu1 %v10651_v35 }
 0x84c   :  { %6926 = vmatpush3.msra.mxu0 %v9375_v56  ;;  %6893 = vmatpush3.msra.mxu1 %v9304_v53 }
 0x84d   :  { %6927 = vmatprep.subr.mxu0 %v10651_v35  ;;  %6894 = vmatprep.subr.mxu1 %v10651_v35 }
 0x84e   :  { %6928 = vmatpush3.msra.mxu0 %v9381_v43  ;;  %6895 = vmatpush3.msra.mxu1 %v9308_v55 }
 0x84f   :  { %6929 = vmatprep.subr.mxu0 %v10651_v35  ;;  %6896 = vmatprep.subr.mxu1 %v10651_v35 }
 0x850   :  { %6930 = vmatpush3.msra.mxu0 %v9391_v8  ;;  %6897 = vmatpush3.msra.mxu1 %v9312_v57 }
 0x851   :  { %6931 = vmatprep.subr.mxu0 %v10651_v35  ;;  %6898 = vmatprep.subr.mxu1 %v10651_v35 }
 0x852   :  { %6932 = vmatpush3.msra.mxu0 %v9399_v36  ;;  %6899 = vmatpush3.msra.mxu1 %v9316_v59 }
 0x853   :  { %6933 = vmatprep.subr.mxu0 %v10651_v35  ;;  %6900 = vmatprep.subr.mxu1 %v10651_v35 }
 0x854   :  { %6934 = vmatpush3.msra.mxu0 %v9409_v9  ;;  %6901 = vmatpush3.msra.mxu1 %v9320_v63 }
 0x855   :  { %6935 = vmatprep.subr.mxu0 %v10651_v35  ;;  %6902 = vmatprep.subr.mxu1 %v10651_v35 }
 0x856   :  { %6936 = vmatpush3.msra.mxu0 %v9417_v61  ;;  %6903 = vmatpush3.msra.mxu1 %v9324_v11 }
 0x857   :  { %6937 = vmatprep.subr.mxu0 %v10651_v35  ;;  %6904 = vmatprep.subr.mxu1 %v10651_v35 }
 0x858   :  { %6938 = vmatpush3.msra.mxu0 %v9427_v12  ;;  %6905 = vmatpush3.msra.mxu1 %v9327_v0 }
 0x859   :  { %6939 = vmatprep.subr.mxu0 %v10651_v35  ;;  %6906 = vmatprep.subr.mxu1 %v10651_v35 }
 0x85a   :  { %6940 = vmatpush3.msra.mxu0 %v9434_v15  ;;  %6907 = vmatpush3.msra.mxu1 %v9330_v4 }
 0x85b   :  { %6941 = vmatprep.subr.mxu0 %v10651_v35  ;;  %6908 = vmatprep.subr.mxu1 %v10651_v35 }
 0x85c   :  { %6942 = vmatpush3.msra.mxu0 %v9442_v60  ;;  %6909 = vmatpush3.msra.mxu1 %v9334_v5 }
 0x85d   :  { %6943 = vmatprep.subr.mxu0 %v10651_v35  ;;  %6910 = vmatprep.subr.mxu1 %v10651_v35 }
 0x85e   :  { %6944 = vmatpush3.msra.mxu0 %v9450_v41  ;;  %6911 = vmatpush3.msra.mxu1 %v9338_v13 }
 0x85f   :  { %6945 = vmatprep.subr.mxu0 %v10651_v35  ;;  %6912 = vmatprep.subr.mxu1 %v10651_v35 }
 0x860   :  { %6946 = vmatpush3.msra.mxu0 %v9458_v19  ;;  %6913 = vmatpush3.msra.mxu1 %v9342_v7 }
 0x861   :  { %6947 = vmatprep.subr.mxu0 %v10651_v35  ;;  %6914 = vmatprep.subr.mxu1 %v10651_v35 }
 0x862   :  { %6948 = vmatpush3.msra.mxu0 %v9466_v21  ;;  %6915 = vmatpush3.msra.mxu1 %v9346_v14 }
 0x863   :  { %6949 = vmatprep.subr.mxu0 %v10651_v35  ;;  %6916 = vmatprep.subr.mxu1 %v10651_v35 }
 0x864   :  { %6950 = vmatpush3.msra.mxu0 %v9474_v23  ;;  %6917 = vmatpush3.msra.mxu1 %v9350_v62 }
 0x865   :  { %6951 = vmatprep.subr.mxu0 %v10651_v35  ;;  %6918 = vmatprep.subr.mxu1 %v10651_v35 }
 0x866   :  { %6952 = vmatpush3.msra.mxu0 %v9482_v25  ;;  %6919 = vmatpush3.msra.mxu1 %v9355_v16 }
 0x867   :  { %6953 = vmatprep.subr.mxu0 %v10651_v35  ;;  %6920 = vmatprep.subr.mxu1 %v10651_v35 }
 0x868   :  { %6954 = vmatpush3.msra.mxu0 %v9490_v28  ;;  %6921 = vmatpush3.msra.mxu1 %v9358_v17 }
 0x869   :  { %6955 = vmatprep.subr.mxu0 %v10651_v35  ;;  %6922 = vmatprep.mubr.msk.f32.mxu1 %vm8000_vm1, %v10651_v35 }
 0x86a   :  { %6956 = vmatpush3.msra.mxu0 %v9498_v39  ;;  %6957 = vmatprep.mubr.msk.f32.mxu0 %vm8000_vm1, %v10651_v35 }
 0x86b   :  { %6960 = vmatprep.subr.mxu1 %v10651_v35  ;;  %6995 = vmatprep.subr.mxu0 %v10651_v35 }
 0x8e1   :  { %v9604_v50 = vpop.f32.mrf.mxu1  ;;  %v9606_v52 = vpop.f32.mrf.mxu0 }
 0x8e2   :  { %10720 = vst [vmem:[#allocation25_spill] sm:$0xff] %v9604_v50  ;;  %10721 = vst [vmem:[#allocation12_spill] sm:$0xff] %v9606_v52  ;;  %v9620_v50 = vld [vmem:[%s10564_s6] ss:$0 sm:$0xff] }
 0x8e3   :  { %v9608_v54 = vpop.f32.mrf.mxu1  ;;  %v9610_v2 = vpop.f32.mrf.mxu0  ;;  %10725 = vst [vmem:[#allocation37_spill] sm:$0xff] %v9620_v50  ;;  %v2461_v52 = vadd.f32 %v9620_v50, %v2460_v40 }
 0x8e4   :  { %10722 = vst [vmem:[#allocation13_spill] sm:$0xff] %v9608_v54  ;;  %10723 = vst [vmem:[#allocation22_spill] sm:$0xff] %v9610_v2 }
 0x8e5   :  { %v6775_v45 = vpop.f32.mrf.mxu1  ;;  %v2877_v46 = vpop.f32.mrf.mxu0 }
 0x8e6   :  { %v9615_v44 = vadd.f32 %v6775_v45, %v4819_v10  ;;  %v3027_v49 = vadd.f32 %v2877_v46, %v2461_v52 }
 0x8e7   :  { %v2720_v47 = vpop.f32.mrf.mxu1  ;;  %v6819_v48 = vpop.f32.mrf.mxu0 }
 0x8e8   :  { %10724 = vst [vmem:[#allocation35_spill] sm:$0xff] %v9615_v44  ;;  %v4822_v39 = vmul.f32 -1.442695, %v3027_v49 }
 0x8ea   :  { %v6778_v54 = vpop.f32.mrf.mxu1  ;;  %7749 = vpow2.f32 %v4822_v39 }
 0x8eb   :  { %v9623_v2 = vadd.f32 %v6778_v54, %v4819_v10 }
 0x8ec   :  { %v2730_v32 = vpop.f32.mrf.mxu1 }
 0x8ed   :  { %10726 = vst [vmem:[#allocation38_spill] sm:$0xff] %v9623_v2  ;;  %v9625_v34 = vadd.f32 %v4819_v10, %v2730_v32  ;;  %v9638_v32 = vld [vmem:[%s10564_s6 + $0x1] ss:$0 sm:$0xff] }
 0x8ef   :  { %10727 = vst [vmem:[#allocation10_spill] sm:$0xff] %v9625_v34  ;;  %v6781_v28 = vpop.f32.mrf.mxu1 }
 0x8f0   :  { %v9627_v45 = vadd.f32 %v6781_v28, %v4819_v10  ;;  %v2591_v28 = vadd.f32 %v9638_v32, %v2590_v42 }
 0x8f1   :  { %v2740_v44 = vpop.f32.mrf.mxu1 }
 0x8f2   :  { %10728 = vst [vmem:[#allocation11_spill] sm:$0xff] %v9627_v45  ;;  %v9629_v48 = vadd.f32 %v4819_v10, %v2740_v44 }
 0x8f4   :  { %10729 = vst [vmem:[#allocation14_spill] sm:$0xff] %v9629_v48  ;;  %v6784_v25 = vpop.f32.mrf.mxu1  ;;  %v2721_v48 = vadd.f32 %v4819_v10, %v2720_v47  ;;  %v10735_v47 = vld [vmem:[#allocation29_spill] sm:$0xff] }
 0x8f5   :  { %v9631_v23 = vadd.f32 %v6784_v25, %v4819_v10 }
 0x8f6   :  { %v2750_v21 = vpop.f32.mrf.mxu1 }
 0x8f7   :  { %10730 = vst [vmem:[#allocation20_spill] sm:$0xff] %v9631_v23  ;;  %v9633_v40 = vadd.f32 %v4819_v10, %v2750_v21  ;;  %v7750_v46 = vpop.eup %7749  ;;  %v9644_v21 = vld [vmem:[%s10564_s6 + $0x3] ss:$0 sm:$0xff]  ;;  %v10734_v10 = vld [vmem:[#allocation27_spill] sm:$0xff] }
 0x8f8   :  { %v3031_v52 = vadd.f32 1.0, %v7750_v46 }
 0x8f9   :  { %10731 = vst [vmem:[#allocation34_spill] sm:$0xff] %v9633_v40 }
 0x8fa   :  { %7751 = vrcp.f32 %v3031_v52 }
 0x907   :  { %v7752_v23 = vpop.eup %7751 }
 0x908   :  { %v2947_v49 = vpop.f32.mrf.mxu1 }
 0x909   :  { %v3034_v44 = vadd.f32 %v2947_v49, %v2591_v28 }
 0x90a   :  { %v3023_v54 = vpop.f32.mrf.mxu0  ;;  %v6854_v39 = vpop.f32.mrf.mxu1 }
 0x90b   :  { %v4823_v45 = vmul.f32 -1.442695, %v3034_v44  ;;  %v3024_v46 = vadd.f32 %v9644_v21, %v3023_v54 }
 0x90c   :  { %v6889_v25 = vpop.f32.mrf.mxu0 }
 0x90d   :  { %7753 = vpow2.f32 %v4823_v45  ;;  %v3041_v40 = vmul.f32 %v7752_v23, %v3024_v46  ;;  %v10732_v23 = vld [vmem:[#allocation16_spill] sm:$0xff] }
 0x90f   :  { %v3042_v52 = vadd.f32 %v3041_v40, %v2721_v48  ;;  %v10736_v48 = vld [vmem:[#allocation21_spill] sm:$0xff]  ;;  %v10737_v40 = vld [vmem:[#allocation26_spill] sm:$0xff] }
 0x910   :  { %v2466_v54 = vadd.f32 %v10737_v40, %v9620_v50 }
 0x91a   :  { %v7754_v2 = vpop.eup %7753 }
 0x91b   :  { %v3038_v42 = vadd.f32 1.0, %v7754_v2  ;;  %v10733_v2 = vld [vmem:[#allocation23_spill] sm:$0xff] }
 0x91d   :  { %7755 = vrcp.f32 %v3038_v42 }
 0x91e   :  { %7757 = vtanh.f32 %v3042_v52 }
 0x92a   :  { %v7756_v28 = vpop.eup %7755 }
 0x92b   :  { %v3044_v49 = vsub.f32 1.0, %v7756_v28  ;;  %v7758_v44 = vpop.eup %7757  ;;  %v3046_v45 = vmul.f32 0.0, %v7756_v28 }
 0x92d   :  { %v3045_v39 = vmul.f32 %v7758_v44, %v3044_v49 }
 0x92f   :  { %v9647_v25 = vadd.f32 %v3046_v45, %v3045_v39  ;;  %v10738_v39 = vld [vmem:[#allocation28_spill] sm:$0xff] }
 0x930   :  { %v2596_v45 = vadd.f32 %v10738_v39, %v9638_v32 }
 0x931   :  { %6923 = vmatmul.mubr.f32.vlgmr.msra.gmra.mxu1 %v9647_v25  ;;  %6958 = vmatmul.mubr.f32.vlgmr.msra.gmra.mxu0 %v9647_v25 }
 0x932   :  { %6961 = vmatpush3.msra.mxu1 %v9377_v58  ;;  %6992 = vmatprep.mubr.msk.f32.mxu1 %vm8000_vm1, %v10651_v35 }
 0x933   :  { %6962 = vmatprep.subr.mxu1 %v10651_v35  ;;  %6996 = vmatpush3.msra.mxu0 %v9300_v51 }
 0x934   :  { %6963 = vmatpush3.msra.mxu1 %v9385_v33  ;;  %6997 = vmatprep.subr.mxu0 %v10651_v35 }
 0x935   :  { %6964 = vmatprep.subr.mxu1 %v10651_v35  ;;  %6998 = vmatpush3.msra.mxu0 %v9304_v53 }
 0x936   :  { %6965 = vmatpush3.msra.mxu1 %v9395_v27  ;;  %6999 = vmatprep.subr.mxu0 %v10651_v35 }
 0x937   :  { %6966 = vmatprep.subr.mxu1 %v10651_v35  ;;  %7000 = vmatpush3.msra.mxu0 %v9308_v55 }
 0x938   :  { %6967 = vmatpush3.msra.mxu1 %v9403_v6  ;;  %7001 = vmatprep.subr.mxu0 %v10651_v35 }
 0x939   :  { %6968 = vmatprep.subr.mxu1 %v10651_v35  ;;  %7002 = vmatpush3.msra.mxu0 %v9312_v57 }
 0x93a   :  { %6969 = vmatpush3.msra.mxu1 %v9413_v30  ;;  %7003 = vmatprep.subr.mxu0 %v10651_v35 }
 0x93b   :  { %6970 = vmatprep.subr.mxu1 %v10651_v35  ;;  %7004 = vmatpush3.msra.mxu0 %v9316_v59 }
 0x93c   :  { %6971 = vmatpush3.msra.mxu1 %v9421_v31  ;;  %7005 = vmatprep.subr.mxu0 %v10651_v35 }
 0x93d   :  { %6972 = vmatprep.subr.mxu1 %v10651_v35  ;;  %7006 = vmatpush3.msra.mxu0 %v9320_v63 }
 0x93e   :  { %6973 = vmatpush3.msra.mxu1 %v9429_v1  ;;  %7007 = vmatprep.subr.mxu0 %v10651_v35 }
 0x93f   :  { %6974 = vmatprep.subr.mxu1 %v10651_v35  ;;  %7008 = vmatpush3.msra.mxu0 %v9324_v11 }
 0x940   :  { %6975 = vmatpush3.msra.mxu1 %v9436_v37  ;;  %7009 = vmatprep.subr.mxu0 %v10651_v35 }
 0x941   :  { %6976 = vmatprep.subr.mxu1 %v10651_v35  ;;  %7010 = vmatpush3.msra.mxu0 %v9327_v0 }
 0x942   :  { %6977 = vmatpush3.msra.mxu1 %v9444_v3  ;;  %7011 = vmatprep.subr.mxu0 %v10651_v35 }
 0x943   :  { %6978 = vmatprep.subr.mxu1 %v10651_v35  ;;  %7012 = vmatpush3.msra.mxu0 %v9330_v4 }
 0x944   :  { %6979 = vmatpush3.msra.mxu1 %v9452_v18  ;;  %7013 = vmatprep.subr.mxu0 %v10651_v35 }
 0x945   :  { %6980 = vmatprep.subr.mxu1 %v10651_v35  ;;  %7014 = vmatpush3.msra.mxu0 %v9334_v5 }
 0x946   :  { %6981 = vmatpush3.msra.mxu1 %v9460_v20  ;;  %7015 = vmatprep.subr.mxu0 %v10651_v35 }
 0x947   :  { %6982 = vmatprep.subr.mxu1 %v10651_v35  ;;  %7016 = vmatpush3.msra.mxu0 %v9338_v13 }
 0x948   :  { %6983 = vmatpush3.msra.mxu1 %v9468_v22  ;;  %7017 = vmatprep.subr.mxu0 %v10651_v35 }
 0x949   :  { %6984 = vmatprep.subr.mxu1 %v10651_v35  ;;  %7018 = vmatpush3.msra.mxu0 %v9342_v7 }
 0x94a   :  { %6985 = vmatpush3.msra.mxu1 %v9476_v24  ;;  %7019 = vmatprep.subr.mxu0 %v10651_v35 }
 0x94b   :  { %6986 = vmatprep.subr.mxu1 %v10651_v35  ;;  %7020 = vmatpush3.msra.mxu0 %v9346_v14 }
 0x94c   :  { %6987 = vmatpush3.msra.mxu1 %v9484_v26  ;;  %7021 = vmatprep.subr.mxu0 %v10651_v35 }
 0x94d   :  { %6988 = vmatprep.subr.mxu1 %v10651_v35  ;;  %7022 = vmatpush3.msra.mxu0 %v9350_v62 }
 0x94e   :  { %6989 = vmatpush3.msra.mxu1 %v9492_v29  ;;  %7023 = vmatprep.subr.mxu0 %v10651_v35 }
 0x94f   :  { %6990 = vmatprep.subr.mxu1 %v10651_v35  ;;  %7024 = vmatpush3.msra.mxu0 %v9355_v16 }
 0x950   :  { %6991 = vmatpush3.msra.mxu1 %v9502_v38  ;;  %7025 = vmatprep.subr.mxu0 %v10651_v35 }
 0x951   :  { %6993 = vmatmul.mubr.f32.vlgmr.msra.gmra.mxu1 %v9647_v25  ;;  %7030 = vmatprep.subr.mxu1 %v10651_v35 }
 0x952   :  { %7031 = vmatpush3.msra.mxu1 %v9375_v56  ;;  %7026 = vmatpush3.msra.mxu0 %v9358_v17 }
 0x953   :  { %7032 = vmatprep.subr.mxu1 %v10651_v35  ;;  %7027 = vmatprep.mubr.msk.f32.mxu0 %vm8000_vm1, %v10651_v35 }
 0x954   :  { %7033 = vmatpush3.msra.mxu1 %v9381_v43  ;;  %7062 = vmatprep.mubr.msk.f32.mxu1 %vm8000_vm1, %v10651_v35 }
 0x955   :  { %7034 = vmatprep.subr.mxu1 %v10651_v35  ;;  %7065 = vmatprep.subr.mxu0 %v10651_v35 }
 0x956   :  { %7035 = vmatpush3.msra.mxu1 %v9391_v8 }
 0x957   :  { %7036 = vmatprep.subr.mxu1 %v10651_v35 }
 0x958   :  { %7037 = vmatpush3.msra.mxu1 %v9399_v36 }
 0x959   :  { %7038 = vmatprep.subr.mxu1 %v10651_v35 }
 0x95a   :  { %7039 = vmatpush3.msra.mxu1 %v9409_v9 }
 0x95b   :  { %7040 = vmatprep.subr.mxu1 %v10651_v35 }
 0x95c   :  { %7041 = vmatpush3.msra.mxu1 %v9417_v61 }
 0x95d   :  { %7042 = vmatprep.subr.mxu1 %v10651_v35 }
 0x95e   :  { %7043 = vmatpush3.msra.mxu1 %v9427_v12 }
 0x95f   :  { %7044 = vmatprep.subr.mxu1 %v10651_v35 }
 0x960   :  { %7045 = vmatpush3.msra.mxu1 %v9434_v15 }
 0x961   :  { %7046 = vmatprep.subr.mxu1 %v10651_v35 }
 0x962   :  { %7047 = vmatpush3.msra.mxu1 %v9442_v60 }
 0x963   :  { %7048 = vmatprep.subr.mxu1 %v10651_v35 }
 0x964   :  { %7049 = vmatpush3.msra.mxu1 %v9450_v41 }
 0x965   :  { %7050 = vmatprep.subr.mxu1 %v10651_v35 }
 0x966   :  { %7051 = vmatpush3.msra.mxu1 %v9458_v19 }
 0x967   :  { %7052 = vmatprep.subr.mxu1 %v10651_v35 }
 0x968   :  { %7053 = vmatpush3.msra.mxu1 %v10732_v23 }
 0x969   :  { %7054 = vmatprep.subr.mxu1 %v10651_v35 }
 0x96a   :  { %7055 = vmatpush3.msra.mxu1 %v10733_v2 }
 0x96b   :  { %7056 = vmatprep.subr.mxu1 %v10651_v35 }
 0x96c   :  { %7057 = vmatpush3.msra.mxu1 %v10734_v10 }
 0x96d   :  { %7058 = vmatprep.subr.mxu1 %v10651_v35 }
 0x96e   :  { %7059 = vmatpush3.msra.mxu1 %v10735_v47 }
 0x96f   :  { %7060 = vmatprep.subr.mxu1 %v10651_v35 }
 0x970   :  { %7061 = vmatpush3.msra.mxu1 %v10736_v48 }
 0x971   :  { %7100 = vmatprep.subr.mxu1 %v10651_v35 }
 0x9f1   :  { %v3114_v46 = vpop.f32.mrf.mxu1  ;;  %v3184_v42 = vpop.f32.mrf.mxu0 }
 0x9f2   :  { %v3258_v52 = vadd.f32 %v3114_v46, %v2466_v54  ;;  %v3265_v34 = vadd.f32 %v3184_v42, %v2596_v45 }
 0x9f3   :  { %v6924_v28 = vpop.f32.mrf.mxu1  ;;  %v6959_v49 = vpop.f32.mrf.mxu0 }
 0x9f4   :  { %v4824_v44 = vmul.f32 -1.442695, %v3258_v52  ;;  %v4825_v47 = vmul.f32 -1.442695, %v3265_v34  ;;  %v10739_v52 = vld [vmem:[#allocation35_spill] sm:$0xff] }
 0x9f6   :  { %7759 = vpow2.f32 %v4824_v44 }
 0x9f7   :  { %7761 = vpow2.f32 %v4825_v47 }
 0xa03   :  { %v7760_v10 = vpop.eup %7759 }
 0xa04   :  { %v3262_v48 = vadd.f32 1.0, %v7760_v10  ;;  %v7762_v2 = vpop.eup %7761 }
 0xa05   :  { %v3269_v23 = vadd.f32 1.0, %v7762_v2 }
 0xa06   :  { %7763 = vrcp.f32 %v3262_v48 }
 0xa07   :  { %7765 = vrcp.f32 %v3269_v23 }
 0xa11   :  { %v3254_v19 = vpop.f32.mrf.mxu1 }
 0xa12   :  { %v3255_v40 = vadd.f32 %v9644_v21, %v3254_v19 }
 0xa13   :  { %v7764_v50 = vpop.eup %7763  ;;  %v6994_v54 = vpop.f32.mrf.mxu1 }
 0xa14   :  { %v3272_v46 = vmul.f32 %v7764_v50, %v3255_v40  ;;  %v7766_v49 = vpop.eup %7765 }
 0xa15   :  { %v3275_v44 = vsub.f32 1.0, %v7766_v49  ;;  %v3277_v47 = vmul.f32 %v7766_v49, %v9647_v25  ;;  %v10749_v25 = vld [vmem:[#allocation10_spill] sm:$0xff] }
 0xa16   :  { %v3273_v28 = vadd.f32 %v3272_v46, %v10739_v52  ;;  %v9883_v46 = vld [vmem:[#allocation7 + $0x78] sm:$0xff]  ;;  %v9889_v52 = vld [vmem:[#allocation7 + $0x70] sm:$0xff]  ;;  %v9994_v49 = vld [vmem:[#allocation7 + $0xe0] sm:$0xff] }
 0xa18   :  { %7767 = vtanh.f32 %v3273_v28  ;;  %v9990_v28 = vld [vmem:[#allocation7 + $0xe8] sm:$0xff] }
 0xa25   :  { %v7768_v42 = vpop.eup %7767 }
 0xa26   :  { %v3276_v34 = vmul.f32 %v7768_v42, %v3275_v44  ;;  %v9998_v44 = vld [vmem:[#allocation7 + $0xd8] sm:$0xff]  ;;  %v10002_v42 = vld [vmem:[#allocation7 + $0xd0] sm:$0xff] }
 0xa28   :  { %v9761_v10 = vadd.f32 %v3277_v47, %v3276_v34  ;;  %v10006_v34 = vld [vmem:[#allocation7 + $0xc8] sm:$0xff]  ;;  %v10010_v47 = vld [vmem:[#allocation7 + $0xc0] sm:$0xff] }
 0xa2a   :  { %7028 = vmatmul.mubr.f32.vlgmr.msra.gmra.mxu0 %v9761_v10  ;;  %7063 = vmatmul.mubr.f32.vlgmr.msra.gmra.mxu1 %v9761_v10 }
 0xa2b   :  { %7066 = vmatpush3.msra.mxu0 %v9377_v58  ;;  %7097 = vmatprep.mubr.msk.f32.mxu0 %vm8000_vm1, %v10651_v35 }
 0xa2c   :  { %7067 = vmatprep.subr.mxu0 %v10651_v35  ;;  %7101 = vmatpush3.msra.mxu1 %v9300_v51  ;;  %v10740_v51 = vld [vmem:[#allocation15_spill] sm:$0xff] }
 0xa2d   :  { %7068 = vmatpush3.msra.mxu0 %v9385_v33  ;;  %7102 = vmatprep.subr.mxu1 %v10651_v35 }
 0xa2e   :  { %7069 = vmatprep.subr.mxu0 %v10651_v35  ;;  %7103 = vmatpush3.msra.mxu1 %v9304_v53  ;;  %v10741_v53 = vld [vmem:[#allocation16_spill] sm:$0xff] }
 0xa2f   :  { %7070 = vmatpush3.msra.mxu0 %v9395_v27  ;;  %7104 = vmatprep.subr.mxu1 %v10651_v35 }
 0xa30   :  { %7071 = vmatprep.subr.mxu0 %v10651_v35  ;;  %7105 = vmatpush3.msra.mxu1 %v9308_v55  ;;  %v10742_v55 = vld [vmem:[#allocation23_spill] sm:$0xff] }
 0xa31   :  { %7072 = vmatpush3.msra.mxu0 %v9403_v6  ;;  %7106 = vmatprep.subr.mxu1 %v10651_v35 }
 0xa32   :  { %7073 = vmatprep.subr.mxu0 %v10651_v35  ;;  %7107 = vmatpush3.msra.mxu1 %v9312_v57  ;;  %v10743_v57 = vld [vmem:[#allocation27_spill] sm:$0xff] }
 0xa33   :  { %7074 = vmatpush3.msra.mxu0 %v9413_v30  ;;  %7108 = vmatprep.subr.mxu1 %v10651_v35 }
 0xa34   :  { %7075 = vmatprep.subr.mxu0 %v10651_v35  ;;  %7109 = vmatpush3.msra.mxu1 %v9316_v59  ;;  %v10744_v59 = vld [vmem:[#allocation29_spill] sm:$0xff] }
 0xa35   :  { %7076 = vmatpush3.msra.mxu0 %v9421_v31  ;;  %7110 = vmatprep.subr.mxu1 %v10651_v35 }
 0xa36   :  { %7077 = vmatprep.subr.mxu0 %v10651_v35  ;;  %7111 = vmatpush3.msra.mxu1 %v9320_v63  ;;  %v10745_v63 = vld [vmem:[#allocation21_spill] sm:$0xff] }
 0xa37   :  { %7078 = vmatpush3.msra.mxu0 %v9429_v1  ;;  %7112 = vmatprep.subr.mxu1 %v10651_v35 }
 0xa38   :  { %7079 = vmatprep.subr.mxu0 %v10651_v35  ;;  %7113 = vmatpush3.msra.mxu1 %v9324_v11  ;;  %v10746_v11 = vld [vmem:[#allocation33_spill] sm:$0xff] }
 0xa39   :  { %7080 = vmatpush3.msra.mxu0 %v9436_v37  ;;  %7114 = vmatprep.subr.mxu1 %v10651_v35 }
 0xa3a   :  { %7081 = vmatprep.subr.mxu0 %v10651_v35  ;;  %7115 = vmatpush3.msra.mxu1 %v9327_v0  ;;  %v10747_v0 = vld [vmem:[#allocation37_spill] sm:$0xff] }
 0xa3b   :  { %7082 = vmatpush3.msra.mxu0 %v9444_v3  ;;  %7116 = vmatprep.subr.mxu1 %v10651_v35 }
 0xa3c   :  { %7083 = vmatprep.subr.mxu0 %v10651_v35  ;;  %7117 = vmatpush3.msra.mxu1 %v9330_v4  ;;  %v2471_v4 = vadd.f32 %v10747_v0, %v10746_v11  ;;  %v10042_v11 = vld [vmem:[#allocation7 + $0x80] sm:$0xff] }
 0xa3d   :  { %7084 = vmatpush3.msra.mxu0 %v9452_v18  ;;  %7118 = vmatprep.subr.mxu1 %v10651_v35  ;;  %10755 = vst [vmem:[#allocation16_spill] sm:$0xff] %v10042_v11 }
 0xa3e   :  { %7085 = vmatprep.subr.mxu0 %v10651_v35  ;;  %7119 = vmatpush3.msra.mxu1 %v9334_v5 }
 0xa3f   :  { %7086 = vmatpush3.msra.mxu0 %v9460_v20  ;;  %7120 = vmatprep.subr.mxu1 %v10651_v35 }
 0xa40   :  { %7087 = vmatprep.subr.mxu0 %v10651_v35  ;;  %7121 = vmatpush3.msra.mxu1 %v9338_v13 }
 0xa41   :  { %7088 = vmatpush3.msra.mxu0 %v9468_v22  ;;  %7122 = vmatprep.subr.mxu1 %v10651_v35 }
 0xa42   :  { %7089 = vmatprep.subr.mxu0 %v10651_v35  ;;  %7123 = vmatpush3.msra.mxu1 %v9342_v7 }
 0xa43   :  { %7090 = vmatpush3.msra.mxu0 %v9476_v24  ;;  %7124 = vmatprep.subr.mxu1 %v10651_v35 }
 0xa44   :  { %7091 = vmatprep.subr.mxu0 %v10651_v35  ;;  %7125 = vmatpush3.msra.mxu1 %v9346_v14 }
 0xa45   :  { %7092 = vmatpush3.msra.mxu0 %v9484_v26  ;;  %7126 = vmatprep.subr.mxu1 %v10651_v35 }
 0xa46   :  { %7093 = vmatprep.subr.mxu0 %v10651_v35  ;;  %7127 = vmatpush3.msra.mxu1 %v9350_v62 }
 0xa47   :  { %7094 = vmatpush3.msra.mxu0 %v9492_v29  ;;  %7128 = vmatprep.subr.mxu1 %v10651_v35 }
 0xa48   :  { %7095 = vmatprep.subr.mxu0 %v10651_v35  ;;  %7129 = vmatpush3.msra.mxu1 %v9355_v16 }
 0xa49   :  { %7096 = vmatpush3.msra.mxu0 %v9502_v38  ;;  %7130 = vmatprep.subr.mxu1 %v10651_v35 }
 0xa4a   :  { %7098 = vmatmul.mubr.f32.vlgmr.msra.gmra.mxu0 %v9761_v10  ;;  %7135 = vmatprep.subr.mxu0 %v10651_v35 }
 0xa4b   :  { %7136 = vmatpush3.msra.mxu0 %v9375_v56  ;;  %7131 = vmatpush3.msra.mxu1 %v9358_v17  ;;  %v10748_v17 = vld [vmem:[#allocation17_spill] sm:$0xff] }
 0xa4c   :  { %7137 = vmatprep.subr.mxu0 %v10651_v35  ;;  %7132 = vmatprep.mubr.msk.f32.mxu1 %vm8000_vm1, %v10651_v35  ;;  %v2601_v56 = vadd.f32 %v9638_v32, %v10748_v17 }
 0xa4d   :  { %7138 = vmatpush3.msra.mxu0 %v9381_v43  ;;  %7167 = vmatprep.mubr.msk.f32.mxu0 %vm8000_vm1, %v10651_v35 }
 0xa4e   :  { %7139 = vmatprep.subr.mxu0 %v10651_v35  ;;  %7170 = vmatprep.subr.mxu1 %v10651_v35 }
 0xa4f   :  { %7140 = vmatpush3.msra.mxu0 %v9391_v8 }
 0xa50   :  { %7141 = vmatprep.subr.mxu0 %v10651_v35 }
 0xa51   :  { %7142 = vmatpush3.msra.mxu0 %v9399_v36 }
 0xa52   :  { %7143 = vmatprep.subr.mxu0 %v10651_v35 }
 0xa53   :  { %7144 = vmatpush3.msra.mxu0 %v9409_v9 }
 0xa54   :  { %7145 = vmatprep.subr.mxu0 %v10651_v35 }
 0xa55   :  { %7146 = vmatpush3.msra.mxu0 %v9417_v61 }
 0xa56   :  { %7147 = vmatprep.subr.mxu0 %v10651_v35 }
 0xa57   :  { %7148 = vmatpush3.msra.mxu0 %v9427_v12 }
 0xa58   :  { %7149 = vmatprep.subr.mxu0 %v10651_v35 }
 0xa59   :  { %7150 = vmatpush3.msra.mxu0 %v9434_v15 }
 0xa5a   :  { %7151 = vmatprep.subr.mxu0 %v10651_v35 }
 0xa5b   :  { %7152 = vmatpush3.msra.mxu0 %v9442_v60 }
 0xa5c   :  { %7153 = vmatprep.subr.mxu0 %v10651_v35 }
 0xa5d   :  { %7154 = vmatpush3.msra.mxu0 %v9450_v41 }
 0xa5e   :  { %7155 = vmatprep.subr.mxu0 %v10651_v35 }
 0xa5f   :  { %7156 = vmatpush3.msra.mxu0 %v10740_v51  ;;  %v10018_v51 = vld [vmem:[#allocation7 + $0xb0] sm:$0xff] }
 0xa60   :  { %7157 = vmatprep.subr.mxu0 %v10651_v35 }
 0xa61   :  { %7158 = vmatpush3.msra.mxu0 %v10741_v53  ;;  %v10022_v53 = vld [vmem:[#allocation7 + $0xa8] sm:$0xff] }
 0xa62   :  { %7159 = vmatprep.subr.mxu0 %v10651_v35  ;;  %10750 = vst [vmem:[#allocation36_spill] sm:$0xff] %v10022_v53 }
 0xa63   :  { %7160 = vmatpush3.msra.mxu0 %v10742_v55  ;;  %v10026_v55 = vld [vmem:[#allocation7 + $0xa0] sm:$0xff] }
 0xa64   :  { %7161 = vmatprep.subr.mxu0 %v10651_v35  ;;  %10751 = vst [vmem:[#allocation26_spill] sm:$0xff] %v10026_v55 }
 0xa65   :  { %7162 = vmatpush3.msra.mxu0 %v10743_v57  ;;  %v10030_v57 = vld [vmem:[#allocation7 + $0x98] sm:$0xff] }
 0xa66   :  { %7163 = vmatprep.subr.mxu0 %v10651_v35  ;;  %10752 = vst [vmem:[#allocation28_spill] sm:$0xff] %v10030_v57 }
 0xa67   :  { %7164 = vmatpush3.msra.mxu0 %v10744_v59  ;;  %v10034_v59 = vld [vmem:[#allocation7 + $0x90] sm:$0xff] }
 0xa68   :  { %7165 = vmatprep.subr.mxu0 %v10651_v35  ;;  %10753 = vst [vmem:[#allocation35_spill] sm:$0xff] %v10034_v59 }
 0xa69   :  { %7166 = vmatpush3.msra.mxu0 %v10745_v63  ;;  %v10038_v63 = vld [vmem:[#allocation7 + $0x88] sm:$0xff] }
 0xa6a   :  { %7205 = vmatprep.subr.mxu0 %v10651_v35  ;;  %10754 = vst [vmem:[#allocation15_spill] sm:$0xff] %v10038_v63 }
 0xaea   :  { %v3345_v5 = vpop.f32.mrf.mxu0  ;;  %v3415_v13 = vpop.f32.mrf.mxu1 }
 0xaeb   :  { %v3489_v7 = vadd.f32 %v3345_v5, %v2471_v4  ;;  %v3496_v43 = vadd.f32 %v3415_v13, %v2601_v56  ;;  %v10756_v4 = vld [vmem:[#allocation19_spill] sm:$0xff] }
 0xaec   :  { %v7029_v14 = vpop.f32.mrf.mxu0  ;;  %v7064_v62 = vpop.f32.mrf.mxu1  ;;  %v2476_v5 = vadd.f32 %v10756_v4, %v10747_v0  ;;  %v10757_v56 = vld [vmem:[#allocation31_spill] sm:$0xff]  ;;  %v10064_v4 = vld [vmem:[#allocation7 + $0x170] sm:$0xff] }
 0xaed   :  { %v4826_v16 = vmul.f32 -1.442695, %v3489_v7  ;;  %v4827_v8 = vmul.f32 -1.442695, %v3496_v43  ;;  %v2606_v43 = vadd.f32 %v10757_v56, %v9638_v32  ;;  %v10118_v56 = vld [vmem:[#allocation7 + $0x128] sm:$0xff] }
 0xaef   :  { %7769 = vpow2.f32 %v4826_v16 }
 0xaf0   :  { %7771 = vpow2.f32 %v4827_v8 }
 0xafc   :  { %v7770_v36 = vpop.eup %7769 }
 0xafd   :  { %v3493_v9 = vadd.f32 1.0, %v7770_v36  ;;  %v7772_v61 = vpop.eup %7771 }
 0xafe   :  { %v3500_v12 = vadd.f32 1.0, %v7772_v61 }
 0xaff   :  { %7773 = vrcp.f32 %v3493_v9 }
 0xb00   :  { %7775 = vrcp.f32 %v3500_v12 }
 0xb0a   :  { %v3485_v15 = vpop.f32.mrf.mxu0 }
 0xb0b   :  { %v3486_v60 = vadd.f32 %v9644_v21, %v3485_v15 }
 0xb0c   :  { %v7774_v41 = vpop.eup %7773  ;;  %v7099_v19 = vpop.f32.mrf.mxu0 }
 0xb0d   :  { %v3503_v50 = vmul.f32 %v7774_v41, %v3486_v60  ;;  %v7776_v2 = vpop.eup %7775 }
 0xb0e   :  { %v3506_v48 = vsub.f32 1.0, %v7776_v2  ;;  %v3508_v40 = vmul.f32 %v7776_v2, %v9761_v10  ;;  %v10014_v10 = vld [vmem:[#allocation7 + $0xb8] sm:$0xff] }
 0xb0f   :  { %v3504_v23 = vadd.f32 %v3503_v50, %v10749_v25  ;;  %v10758_v25 = vld [vmem:[#allocation38_spill] sm:$0xff] }
 0xb11   :  { %7777 = vtanh.f32 %v3504_v23 }
 0xb1e   :  { %v7778_v39 = vpop.eup %7777 }
 0xb1f   :  { %v3507_v45 = vmul.f32 %v7778_v39, %v3506_v48 }
 0xb21   :  { %v9875_v54 = vadd.f32 %v3508_v40, %v3507_v45 }
 0xb23   :  { %7133 = vmatmul.mubr.f32.vlgmr.msra.gmra.mxu1 %v9875_v54  ;;  %7168 = vmatmul.mubr.f32.vlgmr.msra.gmra.mxu0 %v9875_v54 }
 0xb24   :  { %7171 = vmatpush3.msra.mxu1 %v9377_v58  ;;  %7202 = vmatprep.mubr.msk.f32.mxu1 %vm8000_vm1, %v10651_v35  ;;  %v9895_v58 = vld [vmem:[#allocation7 + $0x68] sm:$0xff] }
 0xb25   :  { %7172 = vmatprep.subr.mxu1 %v10651_v35  ;;  %7206 = vmatpush3.msra.mxu0 %v9883_v46 }
 0xb26   :  { %7173 = vmatpush3.msra.mxu1 %v9385_v33  ;;  %7207 = vmatprep.subr.mxu0 %v10651_v35  ;;  %v9901_v33 = vld [vmem:[#allocation7 + $0x60] sm:$0xff] }
 0xb27   :  { %7174 = vmatprep.subr.mxu1 %v10651_v35  ;;  %7208 = vmatpush3.msra.mxu0 %v9889_v52 }
 0xb28   :  { %7175 = vmatpush3.msra.mxu1 %v9395_v27  ;;  %7209 = vmatprep.subr.mxu0 %v10651_v35  ;;  %v9907_v27 = vld [vmem:[#allocation7 + $0x58] sm:$0xff] }
 0xb29   :  { %7176 = vmatprep.subr.mxu1 %v10651_v35  ;;  %7210 = vmatpush3.msra.mxu0 %v9895_v58 }
 0xb2a   :  { %7177 = vmatpush3.msra.mxu1 %v9403_v6  ;;  %7211 = vmatprep.subr.mxu0 %v10651_v35  ;;  %v9913_v6 = vld [vmem:[#allocation7 + $0x50] sm:$0xff] }
 0xb2b   :  { %7178 = vmatprep.subr.mxu1 %v10651_v35  ;;  %7212 = vmatpush3.msra.mxu0 %v9901_v33 }
 0xb2c   :  { %7179 = vmatpush3.msra.mxu1 %v9413_v30  ;;  %7213 = vmatprep.subr.mxu0 %v10651_v35  ;;  %v9919_v30 = vld [vmem:[#allocation7 + $0x48] sm:$0xff] }
 0xb2d   :  { %7180 = vmatprep.subr.mxu1 %v10651_v35  ;;  %7214 = vmatpush3.msra.mxu0 %v9907_v27 }
 0xb2e   :  { %7181 = vmatpush3.msra.mxu1 %v9421_v31  ;;  %7215 = vmatprep.subr.mxu0 %v10651_v35  ;;  %v9925_v31 = vld [vmem:[#allocation7 + $0x40] sm:$0xff] }
 0xb2f   :  { %7182 = vmatprep.subr.mxu1 %v10651_v35  ;;  %7216 = vmatpush3.msra.mxu0 %v9913_v6 }
 0xb30   :  { %7183 = vmatpush3.msra.mxu1 %v9429_v1  ;;  %7217 = vmatprep.subr.mxu0 %v10651_v35  ;;  %v9931_v1 = vld [vmem:[#allocation7 + $0x38] sm:$0xff] }
 0xb31   :  { %7184 = vmatprep.subr.mxu1 %v10651_v35  ;;  %7218 = vmatpush3.msra.mxu0 %v9919_v30 }
 0xb32   :  { %7185 = vmatpush3.msra.mxu1 %v9436_v37  ;;  %7219 = vmatprep.subr.mxu0 %v10651_v35  ;;  %v9937_v37 = vld [vmem:[#allocation7 + $0x30] sm:$0xff] }
 0xb33   :  { %7186 = vmatprep.subr.mxu1 %v10651_v35  ;;  %7220 = vmatpush3.msra.mxu0 %v9925_v31 }
 0xb34   :  { %7187 = vmatpush3.msra.mxu1 %v9444_v3  ;;  %7221 = vmatprep.subr.mxu0 %v10651_v35  ;;  %v9943_v3 = vld [vmem:[#allocation7 + $0x28] sm:$0xff] }
 0xb35   :  { %7188 = vmatprep.subr.mxu1 %v10651_v35  ;;  %7222 = vmatpush3.msra.mxu0 %v9931_v1 }
 0xb36   :  { %7189 = vmatpush3.msra.mxu1 %v9452_v18  ;;  %7223 = vmatprep.subr.mxu0 %v10651_v35  ;;  %v9949_v18 = vld [vmem:[#allocation7 + $0x20] sm:$0xff] }
 0xb37   :  { %7190 = vmatprep.subr.mxu1 %v10651_v35  ;;  %7224 = vmatpush3.msra.mxu0 %v9937_v37 }
 0xb38   :  { %7191 = vmatpush3.msra.mxu1 %v9460_v20  ;;  %7225 = vmatprep.subr.mxu0 %v10651_v35  ;;  %v9955_v20 = vld [vmem:[#allocation7 + $0x18] sm:$0xff] }
 0xb39   :  { %7192 = vmatprep.subr.mxu1 %v10651_v35  ;;  %7226 = vmatpush3.msra.mxu0 %v9943_v3 }
 0xb3a   :  { %7193 = vmatpush3.msra.mxu1 %v9468_v22  ;;  %7227 = vmatprep.subr.mxu0 %v10651_v35  ;;  %v9961_v22 = vld [vmem:[#allocation7 + $0x10] sm:$0xff] }
 0xb3b   :  { %7194 = vmatprep.subr.mxu1 %v10651_v35  ;;  %7228 = vmatpush3.msra.mxu0 %v9949_v18 }
 0xb3c   :  { %7195 = vmatpush3.msra.mxu1 %v9476_v24  ;;  %7229 = vmatprep.subr.mxu0 %v10651_v35  ;;  %v9967_v24 = vld [vmem:[#allocation7 + $0x8] sm:$0xff] }
 0xb3d   :  { %7196 = vmatprep.subr.mxu1 %v10651_v35  ;;  %7230 = vmatpush3.msra.mxu0 %v9955_v20 }
 0xb3e   :  { %7197 = vmatpush3.msra.mxu1 %v9484_v26  ;;  %7231 = vmatprep.subr.mxu0 %v10651_v35  ;;  %v9974_v26 = vld [vmem:[#allocation7 + $0xf8] sm:$0xff] }
 0xb3f   :  { %7198 = vmatprep.subr.mxu1 %v10651_v35  ;;  %7232 = vmatpush3.msra.mxu0 %v9961_v22 }
 0xb40   :  { %7199 = vmatpush3.msra.mxu1 %v9492_v29  ;;  %7233 = vmatprep.subr.mxu0 %v10651_v35  ;;  %v9977_v29 = vld [vmem:[#allocation7] sm:$0xff] }
 0xb41   :  { %7200 = vmatprep.subr.mxu1 %v10651_v35  ;;  %7234 = vmatpush3.msra.mxu0 %v9967_v24 }
 0xb42   :  { %7201 = vmatpush3.msra.mxu1 %v9502_v38  ;;  %7235 = vmatprep.subr.mxu0 %v10651_v35  ;;  %v9983_v38 = vld [vmem:[#allocation7 + $0xf0] sm:$0xff] }
 0xb43   :  { %7203 = vmatmul.mubr.f32.vlgmr.msra.gmra.mxu1 %v9875_v54  ;;  %7240 = vmatprep.subr.mxu1 %v10651_v35 }
 0xb44   :  { %7241 = vmatpush3.msra.mxu1 %v9974_v26  ;;  %7236 = vmatpush3.msra.mxu0 %v9977_v29 }
 0xb45   :  { %7242 = vmatprep.subr.mxu1 %v10651_v35  ;;  %7237 = vmatprep.mubr.msk.f32.mxu0 %vm8000_vm1, %v10651_v35 }
 0xb46   :  { %7243 = vmatpush3.msra.mxu1 %v9983_v38  ;;  %7272 = vmatprep.mubr.msk.f32.mxu1 %vm8000_vm1, %v10651_v35 }
 0xb47   :  { %7244 = vmatprep.subr.mxu1 %v10651_v35  ;;  %7275 = vmatprep.subr.mxu0 %v10651_v35 }
 0xb48   :  { %7245 = vmatpush3.msra.mxu1 %v9990_v28 }
 0xb49   :  { %7246 = vmatprep.subr.mxu1 %v10651_v35 }
 0xb4a   :  { %7247 = vmatpush3.msra.mxu1 %v9994_v49 }
 0xb4b   :  { %7248 = vmatprep.subr.mxu1 %v10651_v35 }
 0xb4c   :  { %7249 = vmatpush3.msra.mxu1 %v9998_v44 }
 0xb4d   :  { %7250 = vmatprep.subr.mxu1 %v10651_v35 }
 0xb4e   :  { %7251 = vmatpush3.msra.mxu1 %v10002_v42 }
 0xb4f   :  { %7252 = vmatprep.subr.mxu1 %v10651_v35 }
 0xb50   :  { %7253 = vmatpush3.msra.mxu1 %v10006_v34 }
 0xb51   :  { %7254 = vmatprep.subr.mxu1 %v10651_v35 }
 0xb52   :  { %7255 = vmatpush3.msra.mxu1 %v10010_v47 }
 0xb53   :  { %7256 = vmatprep.subr.mxu1 %v10651_v35 }
 0xb54   :  { %7257 = vmatpush3.msra.mxu1 %v10014_v10 }
 0xb55   :  { %7258 = vmatprep.subr.mxu1 %v10651_v35 }
 0xb56   :  { %7259 = vmatpush3.msra.mxu1 %v10018_v51 }
 0xb57   :  { %7260 = vmatprep.subr.mxu1 %v10651_v35 }
 0xb58   :  { %7261 = vmatpush3.msra.mxu1 %v10022_v53 }
 0xb59   :  { %7262 = vmatprep.subr.mxu1 %v10651_v35 }
 0xb5a   :  { %7263 = vmatpush3.msra.mxu1 %v10026_v55 }
 0xb5b   :  { %7264 = vmatprep.subr.mxu1 %v10651_v35 }
 0xb5c   :  { %7265 = vmatpush3.msra.mxu1 %v10030_v57 }
 0xb5d   :  { %7266 = vmatprep.subr.mxu1 %v10651_v35 }
 0xb5e   :  { %7267 = vmatpush3.msra.mxu1 %v10034_v59 }
 0xb5f   :  { %7268 = vmatprep.subr.mxu1 %v10651_v35 }
 0xb60   :  { %7269 = vmatpush3.msra.mxu1 %v10038_v63 }
 0xb61   :  { %7270 = vmatprep.subr.mxu1 %v10651_v35 }
 0xb62   :  { %7271 = vmatpush3.msra.mxu1 %v10042_v11 }
 0xb63   :  { %7310 = vmatprep.subr.mxu1 %v10651_v35 }
 0xbe3   :  { %v3576_v13 = vpop.f32.mrf.mxu1  ;;  %v3646_v7 = vpop.f32.mrf.mxu0 }
 0xbe4   :  { %v3720_v14 = vadd.f32 %v3576_v13, %v2476_v5  ;;  %v3727_v8 = vadd.f32 %v3646_v7, %v2606_v43  ;;  %v10076_v5 = vld [vmem:[#allocation7 + $0x160] sm:$0xff]  ;;  %v10082_v13 = vld [vmem:[#allocation7 + $0x158] sm:$0xff]  ;;  %v10088_v7 = vld [vmem:[#allocation7 + $0x150] sm:$0xff] }
 0xbe5   :  { %v7134_v62 = vpop.f32.mrf.mxu1  ;;  %v7169_v16 = vpop.f32.mrf.mxu0  ;;  %v10124_v43 = vld [vmem:[#allocation7 + $0x120] sm:$0xff] }
 0xbe6   :  { %v4828_v17 = vmul.f32 -1.442695, %v3720_v14  ;;  %v4829_v36 = vmul.f32 -1.442695, %v3727_v8  ;;  %v10094_v14 = vld [vmem:[#allocation7 + $0x148] sm:$0xff]  ;;  %v10100_v62 = vld [vmem:[#allocation7 + $0x140] sm:$0xff] }
 0xbe7   :  { %v10106_v16 = vld [vmem:[#allocation7 + $0x138] sm:$0xff] }
 0xbe8   :  { %7779 = vpow2.f32 %v4828_v17  ;;  %v10112_v17 = vld [vmem:[#allocation7 + $0x130] sm:$0xff]  ;;  %v10130_v8 = vld [vmem:[#allocation7 + $0x118] sm:$0xff] }
 0xbe9   :  { %7781 = vpow2.f32 %v4829_v36  ;;  %v10136_v36 = vld [vmem:[#allocation7 + $0x110] sm:$0xff] }
 0xbf5   :  { %v7780_v9 = vpop.eup %7779 }
 0xbf6   :  { %v3724_v61 = vadd.f32 1.0, %v7780_v9  ;;  %v7782_v12 = vpop.eup %7781  ;;  %v10142_v9 = vld [vmem:[#allocation7 + $0x108] sm:$0xff] }
 0xbf7   :  { %v3731_v15 = vadd.f32 1.0, %v7782_v12  ;;  %v10195_v12 = vld [vmem:[%s10564_s6] ss:$0 sm:$0xff] }
 0xbf8   :  { %7783 = vrcp.f32 %v3724_v61  ;;  %v10148_v61 = vld [vmem:[#allocation7 + $0x100] sm:$0xff]  ;;  %10759 = vst [vmem:[#allocation23_spill] sm:$0xff] %v10195_v12 }
 0xbf9   :  { %7785 = vrcp.f32 %v3731_v15  ;;  %v10760_v15 = vld [vmem:[#allocation18_spill] sm:$0xff] }
 0xc03   :  { %v3716_v60 = vpop.f32.mrf.mxu1 }
 0xc04   :  { %v3717_v0 = vadd.f32 %v9644_v21, %v3716_v60  ;;  %v10057_v21 = vld [vmem:[#allocation7 + $0x178] sm:$0xff]  ;;  %v2481_v60 = vadd.f32 %v10195_v12, %v10760_v15 }
 0xc05   :  { %v7784_v41 = vpop.eup %7783  ;;  %v7204_v19 = vpop.f32.mrf.mxu1 }
 0xc06   :  { %v3734_v50 = vmul.f32 %v7784_v41, %v3717_v0  ;;  %v7786_v32 = vpop.eup %7785 }
 0xc07   :  { %v3737_v2 = vsub.f32 1.0, %v7786_v32  ;;  %v3739_v45 = vmul.f32 %v7786_v32, %v9875_v54  ;;  %v10070_v54 = vld [vmem:[#allocation7 + $0x168] sm:$0xff]  ;;  %v10202_v32 = vld [vmem:[%s10564_s6 + $0x1] ss:$0 sm:$0xff] }
 0xc08   :  { %v3735_v23 = vadd.f32 %v3734_v50, %v10758_v25 }
 0xc0a   :  { %7787 = vtanh.f32 %v3735_v23 }
 0xc17   :  { %v7788_v48 = vpop.eup %7787 }
 0xc18   :  { %v3738_v39 = vmul.f32 %v7788_v48, %v3737_v2  ;;  %v10761_v2 = vld [vmem:[#allocation24_spill] sm:$0xff] }
 0xc19   :  { %v2611_v48 = vadd.f32 %v10202_v32, %v10761_v2 }
 0xc1a   :  { %v10053_v40 = vadd.f32 %v3739_v45, %v3738_v39 }
 0xc1c   :  { %7238 = vmatmul.mubr.f32.vlgmr.msra.gmra.mxu0 %v10053_v40  ;;  %7273 = vmatmul.mubr.f32.vlgmr.msra.gmra.mxu1 %v10053_v40 }
 0xc1d   :  { %7276 = vmatpush3.msra.mxu0 %v10057_v21  ;;  %7307 = vmatprep.mubr.msk.f32.mxu0 %vm8000_vm1, %v10651_v35 }
 0xc1e   :  { %7277 = vmatprep.subr.mxu0 %v10651_v35  ;;  %7311 = vmatpush3.msra.mxu1 %v9883_v46 }
 0xc1f   :  { %7278 = vmatpush3.msra.mxu0 %v10064_v4  ;;  %7312 = vmatprep.subr.mxu1 %v10651_v35 }
 0xc20   :  { %7279 = vmatprep.subr.mxu0 %v10651_v35  ;;  %7313 = vmatpush3.msra.mxu1 %v9889_v52 }
 0xc21   :  { %7280 = vmatpush3.msra.mxu0 %v10070_v54  ;;  %7314 = vmatprep.subr.mxu1 %v10651_v35 }
 0xc22   :  { %7281 = vmatprep.subr.mxu0 %v10651_v35  ;;  %7315 = vmatpush3.msra.mxu1 %v9895_v58 }
 0xc23   :  { %7282 = vmatpush3.msra.mxu0 %v10076_v5  ;;  %7316 = vmatprep.subr.mxu1 %v10651_v35 }
 0xc24   :  { %7283 = vmatprep.subr.mxu0 %v10651_v35  ;;  %7317 = vmatpush3.msra.mxu1 %v9901_v33 }
 0xc25   :  { %7284 = vmatpush3.msra.mxu0 %v10082_v13  ;;  %7318 = vmatprep.subr.mxu1 %v10651_v35 }
 0xc26   :  { %7285 = vmatprep.subr.mxu0 %v10651_v35  ;;  %7319 = vmatpush3.msra.mxu1 %v9907_v27 }
 0xc27   :  { %7286 = vmatpush3.msra.mxu0 %v10088_v7  ;;  %7320 = vmatprep.subr.mxu1 %v10651_v35 }
 0xc28   :  { %7287 = vmatprep.subr.mxu0 %v10651_v35  ;;  %7321 = vmatpush3.msra.mxu1 %v9913_v6 }
 0xc29   :  { %7288 = vmatpush3.msra.mxu0 %v10094_v14  ;;  %7322 = vmatprep.subr.mxu1 %v10651_v35 }
 0xc2a   :  { %7289 = vmatprep.subr.mxu0 %v10651_v35  ;;  %7323 = vmatpush3.msra.mxu1 %v9919_v30 }
 0xc2b   :  { %7290 = vmatpush3.msra.mxu0 %v10100_v62  ;;  %7324 = vmatprep.subr.mxu1 %v10651_v35 }
 0xc2c   :  { %7291 = vmatprep.subr.mxu0 %v10651_v35  ;;  %7325 = vmatpush3.msra.mxu1 %v9925_v31 }
 0xc2d   :  { %7292 = vmatpush3.msra.mxu0 %v10106_v16  ;;  %7326 = vmatprep.subr.mxu1 %v10651_v35 }
 0xc2e   :  { %7293 = vmatprep.subr.mxu0 %v10651_v35  ;;  %7327 = vmatpush3.msra.mxu1 %v9931_v1 }
 0xc2f   :  { %7294 = vmatpush3.msra.mxu0 %v10112_v17  ;;  %7328 = vmatprep.subr.mxu1 %v10651_v35 }
 0xc30   :  { %7295 = vmatprep.subr.mxu0 %v10651_v35  ;;  %7329 = vmatpush3.msra.mxu1 %v9937_v37 }
 0xc31   :  { %7296 = vmatpush3.msra.mxu0 %v10118_v56  ;;  %7330 = vmatprep.subr.mxu1 %v10651_v35 }
 0xc32   :  { %7297 = vmatprep.subr.mxu0 %v10651_v35  ;;  %7331 = vmatpush3.msra.mxu1 %v9943_v3 }
 0xc33   :  { %7298 = vmatpush3.msra.mxu0 %v10124_v43  ;;  %7332 = vmatprep.subr.mxu1 %v10651_v35 }
 0xc34   :  { %7299 = vmatprep.subr.mxu0 %v10651_v35  ;;  %7333 = vmatpush3.msra.mxu1 %v9949_v18 }
 0xc35   :  { %7300 = vmatpush3.msra.mxu0 %v10130_v8  ;;  %7334 = vmatprep.subr.mxu1 %v10651_v35 }
 0xc36   :  { %7301 = vmatprep.subr.mxu0 %v10651_v35  ;;  %7335 = vmatpush3.msra.mxu1 %v9955_v20 }
 0xc37   :  { %7302 = vmatpush3.msra.mxu0 %v10136_v36  ;;  %7336 = vmatprep.subr.mxu1 %v10651_v35 }
 0xc38   :  { %7303 = vmatprep.subr.mxu0 %v10651_v35  ;;  %7337 = vmatpush3.msra.mxu1 %v9961_v22 }
 0xc39   :  { %7304 = vmatpush3.msra.mxu0 %v10142_v9  ;;  %7338 = vmatprep.subr.mxu1 %v10651_v35 }
 0xc3a   :  { %7305 = vmatprep.subr.mxu0 %v10651_v35  ;;  %7339 = vmatpush3.msra.mxu1 %v9967_v24 }
 0xc3b   :  { %7306 = vmatpush3.msra.mxu0 %v10148_v61  ;;  %7340 = vmatprep.subr.mxu1 %v10651_v35 }
 0xc3c   :  { %7308 = vmatmul.mubr.f32.vlgmr.msra.gmra.mxu0 %v10053_v40  ;;  %7345 = vmatprep.subr.mxu0 %v10651_v35 }
 0xc3d   :  { %7346 = vmatpush3.msra.mxu0 %v9974_v26  ;;  %7341 = vmatpush3.msra.mxu1 %v9977_v29 }
 0xc3e   :  { %7347 = vmatprep.subr.mxu0 %v10651_v35  ;;  %7342 = vmatprep.mubr.msk.f32.mxu1 %vm8000_vm1, %v10651_v35 }
 0xc3f   :  { %7348 = vmatpush3.msra.mxu0 %v9983_v38  ;;  %7377 = vmatprep.mubr.msk.f32.mxu0 %vm8000_vm1, %v10651_v35 }
 0xc40   :  { %7349 = vmatprep.subr.mxu0 %v10651_v35  ;;  %7380 = vmatprep.subr.mxu1 %v10651_v35 }
 0xc41   :  { %7350 = vmatpush3.msra.mxu0 %v9990_v28 }
 0xc42   :  { %7351 = vmatprep.subr.mxu0 %v10651_v35 }
 0xc43   :  { %7352 = vmatpush3.msra.mxu0 %v9994_v49 }
 0xc44   :  { %7353 = vmatprep.subr.mxu0 %v10651_v35 }
 0xc45   :  { %7354 = vmatpush3.msra.mxu0 %v9998_v44 }
 0xc46   :  { %7355 = vmatprep.subr.mxu0 %v10651_v35 }
 0xc47   :  { %7356 = vmatpush3.msra.mxu0 %v10002_v42 }
 0xc48   :  { %7357 = vmatprep.subr.mxu0 %v10651_v35 }
 0xc49   :  { %7358 = vmatpush3.msra.mxu0 %v10006_v34 }
 0xc4a   :  { %7359 = vmatprep.subr.mxu0 %v10651_v35 }
 0xc4b   :  { %7360 = vmatpush3.msra.mxu0 %v10010_v47 }
 0xc4c   :  { %7361 = vmatprep.subr.mxu0 %v10651_v35 }
 0xc4d   :  { %7362 = vmatpush3.msra.mxu0 %v10014_v10 }
 0xc4e   :  { %7363 = vmatprep.subr.mxu0 %v10651_v35 }
 0xc4f   :  { %7364 = vmatpush3.msra.mxu0 %v10018_v51 }
 0xc50   :  { %7365 = vmatprep.subr.mxu0 %v10651_v35 }
 0xc51   :  { %7366 = vmatpush3.msra.mxu0 %v10022_v53 }
 0xc52   :  { %7367 = vmatprep.subr.mxu0 %v10651_v35 }
 0xc53   :  { %7368 = vmatpush3.msra.mxu0 %v10026_v55 }
 0xc54   :  { %7369 = vmatprep.subr.mxu0 %v10651_v35 }
 0xc55   :  { %7370 = vmatpush3.msra.mxu0 %v10030_v57 }
 0xc56   :  { %7371 = vmatprep.subr.mxu0 %v10651_v35 }
 0xc57   :  { %7372 = vmatpush3.msra.mxu0 %v10034_v59 }
 0xc58   :  { %7373 = vmatprep.subr.mxu0 %v10651_v35 }
 0xc59   :  { %7374 = vmatpush3.msra.mxu0 %v10038_v63 }
 0xc5a   :  { %7375 = vmatprep.subr.mxu0 %v10651_v35 }
 0xc5b   :  { %7376 = vmatpush3.msra.mxu0 %v10042_v11 }
 0xc5c   :  { %7415 = vmatprep.subr.mxu0 %v10651_v35 }
 0xcdc   :  { %v3807_v0 = vpop.f32.mrf.mxu0  ;;  %v3877_v41 = vpop.f32.mrf.mxu1 }
 0xcdd   :  { %v3951_v19 = vadd.f32 %v3807_v0, %v2481_v60  ;;  %v3958_v39 = vadd.f32 %v3877_v41, %v2611_v48  ;;  %v10762_v41 = vld [vmem:[#allocation14_spill] sm:$0xff] }
 0xcde   :  { %v7239_v50 = vpop.f32.mrf.mxu0  ;;  %v7274_v25 = vpop.f32.mrf.mxu1 }
 0xcdf   :  { %v4830_v23 = vmul.f32 -1.442695, %v3951_v19  ;;  %v4831_v45 = vmul.f32 -1.442695, %v3958_v39  ;;  %v10209_v19 = vld [vmem:[%s10564_s6 + $0x3] ss:$0 sm:$0xff] }
 0xce1   :  { %7789 = vpow2.f32 %v4830_v23 }
 0xce2   :  { %7791 = vpow2.f32 %v4831_v45 }
 0xcee   :  { %v7790_v11 = vpop.eup %7789 }
 0xcef   :  { %v3955_v15 = vadd.f32 1.0, %v7790_v11  ;;  %v7792_v12 = vpop.eup %7791 }
 0xcf0   :  { %v3962_v60 = vadd.f32 1.0, %v7792_v12 }
 0xcf1   :  { %7793 = vrcp.f32 %v3955_v15 }
 0xcf2   :  { %7795 = vrcp.f32 %v3962_v60  ;;  %v10765_v60 = vld [vmem:[#allocation30_spill] sm:$0xff] }
 0xcfc   :  { %v3947_v0 = vpop.f32.mrf.mxu0 }
 0xcfd   :  { %v3948_v50 = vadd.f32 %v10209_v19, %v3947_v0  ;;  %v10766_v0 = vld [vmem:[#allocation23_spill] sm:$0xff] }
 0xcfe   :  { %v7794_v25 = vpop.eup %7793  ;;  %v7309_v63 = vpop.f32.mrf.mxu0 }
 0xcff   :  { %v3965_v23 = vmul.f32 %v7794_v25, %v3948_v50  ;;  %v7796_v48 = vpop.eup %7795  ;;  %v10763_v63 = vld [vmem:[#allocation15_spill] sm:$0xff]  ;;  %v2486_v50 = vadd.f32 %v10766_v0, %v10765_v60 }
 0xd00   :  { %v3968_v11 = vsub.f32 1.0, %v7796_v48  ;;  %v3970_v12 = vmul.f32 %v7796_v48, %v10053_v40  ;;  %v10764_v40 = vld [vmem:[#allocation16_spill] sm:$0xff] }
 0xd01   :  { %v3966_v2 = vadd.f32 %v3965_v23, %v10762_v41 }
 0xd03   :  { %7797 = vtanh.f32 %v3966_v2 }
 0xd10   :  { %v7798_v39 = vpop.eup %7797 }
 0xd11   :  { %v3969_v45 = vmul.f32 %v7798_v39, %v3968_v11  ;;  %v10767_v39 = vld [vmem:[#allocation32_spill] sm:$0xff] }
 0xd13   :  { %v10214_v15 = vadd.f32 %v3970_v12, %v3969_v45  ;;  %v2616_v45 = vadd.f32 %v10202_v32, %v10767_v39 }
 0xd15   :  { %7343 = vmatmul.mubr.f32.vlgmr.msra.gmra.mxu1 %v10214_v15  ;;  %7378 = vmatmul.mubr.f32.vlgmr.msra.gmra.mxu0 %v10214_v15 }
 0xd16   :  { %7381 = vmatpush3.msra.mxu1 %v10057_v21  ;;  %7412 = vmatprep.mubr.msk.f32.mxu1 %vm8000_vm1, %v10651_v35 }
 0xd17   :  { %7382 = vmatprep.subr.mxu1 %v10651_v35  ;;  %7416 = vmatpush3.msra.mxu0 %v9883_v46 }
 0xd18   :  { %7383 = vmatpush3.msra.mxu1 %v10064_v4  ;;  %7417 = vmatprep.subr.mxu0 %v10651_v35 }
 0xd19   :  { %7384 = vmatprep.subr.mxu1 %v10651_v35  ;;  %7418 = vmatpush3.msra.mxu0 %v9889_v52 }
 0xd1a   :  { %7385 = vmatpush3.msra.mxu1 %v10070_v54  ;;  %7419 = vmatprep.subr.mxu0 %v10651_v35 }
 0xd1b   :  { %7386 = vmatprep.subr.mxu1 %v10651_v35  ;;  %7420 = vmatpush3.msra.mxu0 %v9895_v58 }
 0xd1c   :  { %7387 = vmatpush3.msra.mxu1 %v10076_v5  ;;  %7421 = vmatprep.subr.mxu0 %v10651_v35 }
 0xd1d   :  { %7388 = vmatprep.subr.mxu1 %v10651_v35  ;;  %7422 = vmatpush3.msra.mxu0 %v9901_v33 }
 0xd1e   :  { %7389 = vmatpush3.msra.mxu1 %v10082_v13  ;;  %7423 = vmatprep.subr.mxu0 %v10651_v35 }
 0xd1f   :  { %7390 = vmatprep.subr.mxu1 %v10651_v35  ;;  %7424 = vmatpush3.msra.mxu0 %v9907_v27 }
 0xd20   :  { %7391 = vmatpush3.msra.mxu1 %v10088_v7  ;;  %7425 = vmatprep.subr.mxu0 %v10651_v35 }
 0xd21   :  { %7392 = vmatprep.subr.mxu1 %v10651_v35  ;;  %7426 = vmatpush3.msra.mxu0 %v9913_v6 }
 0xd22   :  { %7393 = vmatpush3.msra.mxu1 %v10094_v14  ;;  %7427 = vmatprep.subr.mxu0 %v10651_v35 }
 0xd23   :  { %7394 = vmatprep.subr.mxu1 %v10651_v35  ;;  %7428 = vmatpush3.msra.mxu0 %v9919_v30 }
 0xd24   :  { %7395 = vmatpush3.msra.mxu1 %v10100_v62  ;;  %7429 = vmatprep.subr.mxu0 %v10651_v35 }
 0xd25   :  { %7396 = vmatprep.subr.mxu1 %v10651_v35  ;;  %7430 = vmatpush3.msra.mxu0 %v9925_v31 }
 0xd26   :  { %7397 = vmatpush3.msra.mxu1 %v10106_v16  ;;  %7431 = vmatprep.subr.mxu0 %v10651_v35 }
 0xd27   :  { %7398 = vmatprep.subr.mxu1 %v10651_v35  ;;  %7432 = vmatpush3.msra.mxu0 %v9931_v1 }
 0xd28   :  { %7399 = vmatpush3.msra.mxu1 %v10112_v17  ;;  %7433 = vmatprep.subr.mxu0 %v10651_v35 }
 0xd29   :  { %7400 = vmatprep.subr.mxu1 %v10651_v35  ;;  %7434 = vmatpush3.msra.mxu0 %v9937_v37 }
 0xd2a   :  { %7401 = vmatpush3.msra.mxu1 %v10118_v56  ;;  %7435 = vmatprep.subr.mxu0 %v10651_v35 }
 0xd2b   :  { %7402 = vmatprep.subr.mxu1 %v10651_v35  ;;  %7436 = vmatpush3.msra.mxu0 %v9943_v3 }
 0xd2c   :  { %7403 = vmatpush3.msra.mxu1 %v10124_v43  ;;  %7437 = vmatprep.subr.mxu0 %v10651_v35 }
 0xd2d   :  { %7404 = vmatprep.subr.mxu1 %v10651_v35  ;;  %7438 = vmatpush3.msra.mxu0 %v9949_v18 }
 0xd2e   :  { %7405 = vmatpush3.msra.mxu1 %v10130_v8  ;;  %7439 = vmatprep.subr.mxu0 %v10651_v35 }
 0xd2f   :  { %7406 = vmatprep.subr.mxu1 %v10651_v35  ;;  %7440 = vmatpush3.msra.mxu0 %v9955_v20 }
 0xd30   :  { %7407 = vmatpush3.msra.mxu1 %v10136_v36  ;;  %7441 = vmatprep.subr.mxu0 %v10651_v35 }
 0xd31   :  { %7408 = vmatprep.subr.mxu1 %v10651_v35  ;;  %7442 = vmatpush3.msra.mxu0 %v9961_v22 }
 0xd32   :  { %7409 = vmatpush3.msra.mxu1 %v10142_v9  ;;  %7443 = vmatprep.subr.mxu0 %v10651_v35 }
 0xd33   :  { %7410 = vmatprep.subr.mxu1 %v10651_v35  ;;  %7444 = vmatpush3.msra.mxu0 %v9967_v24 }
 0xd34   :  { %7411 = vmatpush3.msra.mxu1 %v10148_v61  ;;  %7445 = vmatprep.subr.mxu0 %v10651_v35 }
 0xd35   :  { %7413 = vmatmul.mubr.f32.vlgmr.msra.gmra.mxu1 %v10214_v15  ;;  %7450 = vmatprep.subr.mxu1 %v10651_v35 }
 0xd36   :  { %7451 = vmatpush3.msra.mxu1 %v9974_v26  ;;  %7446 = vmatpush3.msra.mxu0 %v9977_v29 }
 0xd37   :  { %7452 = vmatprep.subr.mxu1 %v10651_v35  ;;  %7447 = vmatprep.mubr.msk.f32.mxu0 %vm8000_vm1, %v10651_v35 }
 0xd38   :  { %7453 = vmatpush3.msra.mxu1 %v9983_v38  ;;  %7482 = vmatprep.mubr.msk.f32.mxu1 %vm8000_vm1, %v10651_v35 }
 0xd39   :  { %7454 = vmatprep.subr.mxu1 %v10651_v35  ;;  %7485 = vmatprep.subr.mxu0 %v10651_v35 }
 0xd3a   :  { %7455 = vmatpush3.msra.mxu1 %v9990_v28 }
 0xd3b   :  { %7456 = vmatprep.subr.mxu1 %v10651_v35 }
 0xd3c   :  { %7457 = vmatpush3.msra.mxu1 %v9994_v49 }
 0xd3d   :  { %7458 = vmatprep.subr.mxu1 %v10651_v35 }
 0xd3e   :  { %7459 = vmatpush3.msra.mxu1 %v9998_v44 }
 0xd3f   :  { %7460 = vmatprep.subr.mxu1 %v10651_v35 }
 0xd40   :  { %7461 = vmatpush3.msra.mxu1 %v10002_v42 }
 0xd41   :  { %7462 = vmatprep.subr.mxu1 %v10651_v35 }
 0xd42   :  { %7463 = vmatpush3.msra.mxu1 %v10006_v34 }
 0xd43   :  { %7464 = vmatprep.subr.mxu1 %v10651_v35 }
 0xd44   :  { %7465 = vmatpush3.msra.mxu1 %v10010_v47 }
 0xd45   :  { %7466 = vmatprep.subr.mxu1 %v10651_v35 }
 0xd46   :  { %7467 = vmatpush3.msra.mxu1 %v10014_v10 }
 0xd47   :  { %7468 = vmatprep.subr.mxu1 %v10651_v35 }
 0xd48   :  { %7469 = vmatpush3.msra.mxu1 %v10018_v51 }
 0xd49   :  { %7470 = vmatprep.subr.mxu1 %v10651_v35 }
 0xd4a   :  { %7471 = vmatpush3.msra.mxu1 %v10022_v53 }
 0xd4b   :  { %7472 = vmatprep.subr.mxu1 %v10651_v35 }
 0xd4c   :  { %7473 = vmatpush3.msra.mxu1 %v10026_v55 }
 0xd4d   :  { %7474 = vmatprep.subr.mxu1 %v10651_v35 }
 0xd4e   :  { %7475 = vmatpush3.msra.mxu1 %v10030_v57 }
 0xd4f   :  { %7476 = vmatprep.subr.mxu1 %v10651_v35 }
 0xd50   :  { %7477 = vmatpush3.msra.mxu1 %v10034_v59 }
 0xd51   :  { %7478 = vmatprep.subr.mxu1 %v10651_v35 }
 0xd52   :  { %7479 = vmatpush3.msra.mxu1 %v10763_v63 }
 0xd53   :  { %7480 = vmatprep.subr.mxu1 %v10651_v35 }
 0xd54   :  { %7481 = vmatpush3.msra.mxu1 %v10764_v40 }
 0xd55   :  { %7520 = vmatprep.subr.mxu1 %v10651_v35 }
 0xdd5   :  { %v4038_v25 = vpop.f32.mrf.mxu1  ;;  %v4108_v23 = vpop.f32.mrf.mxu0 }
 0xdd6   :  { %v4182_v41 = vadd.f32 %v4038_v25, %v2486_v50  ;;  %v4189_v12 = vadd.f32 %v4108_v23, %v2616_v45 }
 0xdd7   :  { %v7344_v2 = vpop.f32.mrf.mxu1  ;;  %v7379_v48 = vpop.f32.mrf.mxu0 }
 0xdd8   :  { %v4832_v11 = vmul.f32 -1.442695, %v4182_v41  ;;  %v4833_v63 = vmul.f32 -1.442695, %v4189_v12  ;;  %v10768_v41 = vld [vmem:[#allocation11_spill] sm:$0xff] }
 0xdda   :  { %7799 = vpow2.f32 %v4832_v11 }
 0xddb   :  { %7801 = vpow2.f32 %v4833_v63 }
 0xde7   :  { %v7800_v59 = vpop.eup %7799 }
 0xde8   :  { %v4186_v40 = vadd.f32 1.0, %v7800_v59  ;;  %v7802_v57 = vpop.eup %7801 }
 0xde9   :  { %v4193_v55 = vadd.f32 1.0, %v7802_v57  ;;  %v10778_v57 = vld [vmem:[#allocation34_spill] sm:$0xff] }
 0xdea   :  { %7803 = vrcp.f32 %v4186_v40 }
 0xdeb   :  { %7805 = vrcp.f32 %v4193_v55 }
 0xdf5   :  { %v4178_v53 = vpop.f32.mrf.mxu1 }
 0xdf6   :  { %v4179_v60 = vadd.f32 %v10209_v19, %v4178_v53 }
 0xdf7   :  { %v7804_v0 = vpop.eup %7803  ;;  %v7414_v50 = vpop.f32.mrf.mxu1 }
 0xdf8   :  { %v4196_v25 = vmul.f32 %v7804_v0, %v4179_v60  ;;  %v7806_v48 = vpop.eup %7805 }
 0xdf9   :  { %v4199_v11 = vsub.f32 1.0, %v7806_v48  ;;  %v4201_v63 = vmul.f32 %v7806_v48, %v10214_v15 }
 0xdfa   :  { %v4197_v2 = vadd.f32 %v4196_v25, %v10768_v41  ;;  %v10779_v25 = vld [vmem:[#allocation25_spill] sm:$0xff] }
 0xdfc   :  { %7807 = vtanh.f32 %v4197_v2 }
 0xe09   :  { %v7808_v23 = vpop.eup %7807 }
 0xe0a   :  { %v4200_v39 = vmul.f32 %v7808_v23, %v4199_v11 }
 0xe0c   :  { %v10328_v59 = vadd.f32 %v4201_v63, %v4200_v39 }
 0xe0e   :  { %7448 = vmatmul.mubr.f32.vlgmr.msra.gmra.mxu0 %v10328_v59  ;;  %7483 = vmatmul.mubr.f32.vlgmr.msra.gmra.mxu1 %v10328_v59 }
 0xe0f   :  { %7486 = vmatpush3.msra.mxu0 %v10057_v21  ;;  %7517 = vmatprep.mubr.msk.f32.mxu0 %vm8000_vm1, %v10651_v35 }
 0xe10   :  { %7487 = vmatprep.subr.mxu0 %v10651_v35  ;;  %7521 = vmatpush3.msra.mxu1 %v9883_v46  ;;  %v10769_v46 = vld [vmem:[#allocation36_spill] sm:$0xff] }
 0xe11   :  { %7488 = vmatpush3.msra.mxu0 %v10064_v4  ;;  %7522 = vmatprep.subr.mxu1 %v10651_v35 }
 0xe12   :  { %7489 = vmatprep.subr.mxu0 %v10651_v35  ;;  %7523 = vmatpush3.msra.mxu1 %v9889_v52  ;;  %v10770_v52 = vld [vmem:[#allocation26_spill] sm:$0xff] }
 0xe13   :  { %7490 = vmatpush3.msra.mxu0 %v10070_v54  ;;  %7524 = vmatprep.subr.mxu1 %v10651_v35 }
 0xe14   :  { %7491 = vmatprep.subr.mxu0 %v10651_v35  ;;  %7525 = vmatpush3.msra.mxu1 %v9895_v58  ;;  %v10771_v58 = vld [vmem:[#allocation28_spill] sm:$0xff] }
 0xe15   :  { %7492 = vmatpush3.msra.mxu0 %v10076_v5  ;;  %7526 = vmatprep.subr.mxu1 %v10651_v35 }
 0xe16   :  { %7493 = vmatprep.subr.mxu0 %v10651_v35  ;;  %7527 = vmatpush3.msra.mxu1 %v9901_v33  ;;  %v10772_v33 = vld [vmem:[#allocation35_spill] sm:$0xff] }
 0xe17   :  { %7494 = vmatpush3.msra.mxu0 %v10082_v13  ;;  %7528 = vmatprep.subr.mxu1 %v10651_v35 }
 0xe18   :  { %7495 = vmatprep.subr.mxu0 %v10651_v35  ;;  %7529 = vmatpush3.msra.mxu1 %v9907_v27  ;;  %v10773_v27 = vld [vmem:[#allocation15_spill] sm:$0xff] }
 0xe19   :  { %7496 = vmatpush3.msra.mxu0 %v10088_v7  ;;  %7530 = vmatprep.subr.mxu1 %v10651_v35 }
 0xe1a   :  { %7497 = vmatprep.subr.mxu0 %v10651_v35  ;;  %7531 = vmatpush3.msra.mxu1 %v9913_v6  ;;  %v10774_v6 = vld [vmem:[#allocation16_spill] sm:$0xff] }
 0xe1b   :  { %7498 = vmatpush3.msra.mxu0 %v10094_v14  ;;  %7532 = vmatprep.subr.mxu1 %v10651_v35 }
 0xe1c   :  { %7499 = vmatprep.subr.mxu0 %v10651_v35  ;;  %7533 = vmatpush3.msra.mxu1 %v9919_v30  ;;  %v10775_v30 = vld [vmem:[#allocation13_spill] sm:$0xff] }
 0xe1d   :  { %7500 = vmatpush3.msra.mxu0 %v10100_v62  ;;  %7534 = vmatprep.subr.mxu1 %v10651_v35 }
 0xe1e   :  { %7501 = vmatprep.subr.mxu0 %v10651_v35  ;;  %7535 = vmatpush3.msra.mxu1 %v9925_v31  ;;  %v10776_v31 = vld [vmem:[#allocation23_spill] sm:$0xff] }
 0xe1f   :  { %7502 = vmatpush3.msra.mxu0 %v10106_v16  ;;  %7536 = vmatprep.subr.mxu1 %v10651_v35  ;;  %v2496_v41 = vadd.f32 %v10776_v31, %v10779_v25 }
 0xe20   :  { %7503 = vmatprep.subr.mxu0 %v10651_v35  ;;  %7537 = vmatpush3.msra.mxu1 %v9931_v1  ;;  %v2491_v1 = vadd.f32 %v10776_v31, %v10775_v30 }
 0xe21   :  { %7504 = vmatpush3.msra.mxu0 %v10112_v17  ;;  %7538 = vmatprep.subr.mxu1 %v10651_v35 }
 0xe22   :  { %7505 = vmatprep.subr.mxu0 %v10651_v35  ;;  %7539 = vmatpush3.msra.mxu1 %v9937_v37 }
 0xe23   :  { %7506 = vmatpush3.msra.mxu0 %v10118_v56  ;;  %7540 = vmatprep.subr.mxu1 %v10651_v35 }
 0xe24   :  { %7507 = vmatprep.subr.mxu0 %v10651_v35  ;;  %7541 = vmatpush3.msra.mxu1 %v9943_v3 }
 0xe25   :  { %7508 = vmatpush3.msra.mxu0 %v10124_v43  ;;  %7542 = vmatprep.subr.mxu1 %v10651_v35 }
 0xe26   :  { %7509 = vmatprep.subr.mxu0 %v10651_v35  ;;  %7543 = vmatpush3.msra.mxu1 %v9949_v18 }
 0xe27   :  { %7510 = vmatpush3.msra.mxu0 %v10130_v8  ;;  %7544 = vmatprep.subr.mxu1 %v10651_v35 }
 0xe28   :  { %7511 = vmatprep.subr.mxu0 %v10651_v35  ;;  %7545 = vmatpush3.msra.mxu1 %v9955_v20 }
 0xe29   :  { %7512 = vmatpush3.msra.mxu0 %v10136_v36  ;;  %7546 = vmatprep.subr.mxu1 %v10651_v35 }
 0xe2a   :  { %7513 = vmatprep.subr.mxu0 %v10651_v35  ;;  %7547 = vmatpush3.msra.mxu1 %v9961_v22 }
 0xe2b   :  { %7514 = vmatpush3.msra.mxu0 %v10142_v9  ;;  %7548 = vmatprep.subr.mxu1 %v10651_v35 }
 0xe2c   :  { %7515 = vmatprep.subr.mxu0 %v10651_v35  ;;  %7549 = vmatpush3.msra.mxu1 %v9967_v24 }
 0xe2d   :  { %7516 = vmatpush3.msra.mxu0 %v10148_v61  ;;  %7550 = vmatprep.subr.mxu1 %v10651_v35 }
 0xe2e   :  { %7518 = vmatmul.mubr.f32.vlgmr.msra.gmra.mxu0 %v10328_v59  ;;  %7555 = vmatprep.subr.mxu0 %v10651_v35 }
 0xe2f   :  { %7556 = vmatpush3.msra.mxu0 %v9974_v26  ;;  %7551 = vmatpush3.msra.mxu1 %v9977_v29  ;;  %v10777_v26 = vld [vmem:[#allocation22_spill] sm:$0xff] }
 0xe30   :  { %7557 = vmatprep.subr.mxu0 %v10651_v35  ;;  %7552 = vmatprep.mubr.msk.f32.mxu1 %vm8000_vm1, %v10651_v35  ;;  %v2621_v29 = vadd.f32 %v10202_v32, %v10777_v26 }
 0xe31   :  { %7558 = vmatpush3.msra.mxu0 %v9983_v38  ;;  %7587 = vmatprep.mubr.msk.f32.mxu0 %vm8000_vm1, %v10651_v35 }
 0xe32   :  { %7559 = vmatprep.subr.mxu0 %v10651_v35  ;;  %7590 = vmatprep.subr.mxu1 %v10651_v35 }
 0xe33   :  { %7560 = vmatpush3.msra.mxu0 %v9990_v28 }
 0xe34   :  { %7561 = vmatprep.subr.mxu0 %v10651_v35 }
 0xe35   :  { %7562 = vmatpush3.msra.mxu0 %v9994_v49 }
 0xe36   :  { %7563 = vmatprep.subr.mxu0 %v10651_v35 }
 0xe37   :  { %7564 = vmatpush3.msra.mxu0 %v9998_v44 }
 0xe38   :  { %7565 = vmatprep.subr.mxu0 %v10651_v35 }
 0xe39   :  { %7566 = vmatpush3.msra.mxu0 %v10002_v42 }
 0xe3a   :  { %7567 = vmatprep.subr.mxu0 %v10651_v35 }
 0xe3b   :  { %7568 = vmatpush3.msra.mxu0 %v10006_v34 }
 0xe3c   :  { %7569 = vmatprep.subr.mxu0 %v10651_v35 }
 0xe3d   :  { %7570 = vmatpush3.msra.mxu0 %v10010_v47 }
 0xe3e   :  { %7571 = vmatprep.subr.mxu0 %v10651_v35 }
 0xe3f   :  { %7572 = vmatpush3.msra.mxu0 %v10014_v10 }
 0xe40   :  { %7573 = vmatprep.subr.mxu0 %v10651_v35 }
 0xe41   :  { %7574 = vmatpush3.msra.mxu0 %v10018_v51 }
 0xe42   :  { %7575 = vmatprep.subr.mxu0 %v10651_v35 }
 0xe43   :  { %7576 = vmatpush3.msra.mxu0 %v10769_v46 }
 0xe44   :  { %7577 = vmatprep.subr.mxu0 %v10651_v35 }
 0xe45   :  { %7578 = vmatpush3.msra.mxu0 %v10770_v52 }
 0xe46   :  { %7579 = vmatprep.subr.mxu0 %v10651_v35 }
 0xe47   :  { %7580 = vmatpush3.msra.mxu0 %v10771_v58 }
 0xe48   :  { %7581 = vmatprep.subr.mxu0 %v10651_v35 }
 0xe49   :  { %7582 = vmatpush3.msra.mxu0 %v10772_v33 }
 0xe4a   :  { %7583 = vmatprep.subr.mxu0 %v10651_v35 }
 0xe4b   :  { %7584 = vmatpush3.msra.mxu0 %v10773_v27 }
 0xe4c   :  { %7585 = vmatprep.subr.mxu0 %v10651_v35 }
 0xe4d   :  { %7586 = vmatpush3.msra.mxu0 %v10774_v6 }
 0xe4e   :  { %7625 = vmatprep.subr.mxu0 %v10651_v35 }
 0xece   :  { %v4269_v37 = vpop.f32.mrf.mxu0  ;;  %v4339_v3 = vpop.f32.mrf.mxu1 }
 0xecf   :  { %v4413_v18 = vadd.f32 %v4269_v37, %v2491_v1  ;;  %v4420_v38 = vadd.f32 %v4339_v3, %v2621_v29 }
 0xed0   :  { %v7449_v20 = vpop.f32.mrf.mxu0  ;;  %v7484_v22 = vpop.f32.mrf.mxu1 }
 0xed1   :  { %v4834_v24 = vmul.f32 -1.442695, %v4413_v18  ;;  %v4835_v28 = vmul.f32 -1.442695, %v4420_v38  ;;  %v10781_v18 = vld [vmem:[#allocation20_spill] sm:$0xff] }
 0xed3   :  { %7809 = vpow2.f32 %v4834_v24 }
 0xed4   :  { %7811 = vpow2.f32 %v4835_v28  ;;  %v4838_v28 = vld [vmem:[%s10566_s8] ss:$0 sm:$0xff] }
 0xee0   :  { %v7810_v49 = vpop.eup %7809 }
 0xee1   :  { %v4417_v44 = vadd.f32 1.0, %v7810_v49  ;;  %v7812_v42 = vpop.eup %7811 }
 0xee2   :  { %v4424_v34 = vadd.f32 1.0, %v7812_v42 }
 0xee3   :  { %7813 = vrcp.f32 %v4417_v44 }
 0xee4   :  { %7815 = vrcp.f32 %v4424_v34 }
 0xeee   :  { %v4409_v47 = vpop.f32.mrf.mxu0 }
 0xeef   :  { %v4410_v10 = vadd.f32 %v10209_v19, %v4409_v47 }
 0xef0   :  { %v7814_v51 = vpop.eup %7813  ;;  %v7519_v53 = vpop.f32.mrf.mxu0 }
 0xef1   :  { %v4427_v55 = vmul.f32 %v7814_v51, %v4410_v10  ;;  %v7816_v40 = vpop.eup %7815 }
 0xef2   :  { %v4430_v0 = vsub.f32 1.0, %v7816_v40  ;;  %v4432_v60 = vmul.f32 %v7816_v40, %v10328_v59  ;;  %v10780_v59 = vld [vmem:[#allocation12_spill] sm:$0xff] }
 0xef3   :  { %v4428_v15 = vadd.f32 %v4427_v55, %v10778_v57  ;;  %v2626_v46 = vadd.f32 %v10202_v32, %v10780_v59 }
 0xef5   :  { %7817 = vtanh.f32 %v4428_v15 }
 0xf02   :  { %v7818_v45 = vpop.eup %7817 }
 0xf03   :  { %v4431_v12 = vmul.f32 %v7818_v45, %v4430_v0 }
 0xf05   :  { %v10442_v50 = vadd.f32 %v4432_v60, %v4431_v12 }
 0xf07   :  { %7553 = vmatmul.mubr.f32.vlgmr.msra.gmra.mxu1 %v10442_v50  ;;  %7588 = vmatmul.mubr.f32.vlgmr.msra.gmra.mxu0 %v10442_v50 }
 0xf08   :  { %7591 = vmatpush3.msra.mxu1 %v10057_v21  ;;  %7622 = vmatprep.mubr.msk.f32.mxu1 %vm8000_vm1, %v10651_v35  ;;  %v4680_v21 = vld [vmem:[%s10565_s7 + $0x78] sm:$0xff] }
 0xf09   :  { %7592 = vmatprep.subr.mxu1 %v10651_v35  ;;  %7657 = vmatprep.mubr.msk.f32.mxu0 %vm8000_vm1, %v10651_v35 }
 0xf0a   :  { %7593 = vmatpush3.msra.mxu1 %v10064_v4  ;;  %v4679_v4 = vld [vmem:[%s10565_s7 + $0x70] sm:$0xff]  ;;  %7626 = vmatpush3.msra.mxu0 %v4680_v21 }
 0xf0b   :  { %7594 = vmatprep.subr.mxu1 %v10651_v35  ;;  %7627 = vmatprep.subr.mxu0 %v10651_v35 }
 0xf0c   :  { %7595 = vmatpush3.msra.mxu1 %v10070_v54  ;;  %v4678_v54 = vld [vmem:[%s10565_s7 + $0x68] sm:$0xff]  ;;  %7628 = vmatpush3.msra.mxu0 %v4679_v4 }
 0xf0d   :  { %7596 = vmatprep.subr.mxu1 %v10651_v35  ;;  %7629 = vmatprep.subr.mxu0 %v10651_v35 }
 0xf0e   :  { %7597 = vmatpush3.msra.mxu1 %v10076_v5  ;;  %7630 = vmatpush3.msra.mxu0 %v4678_v54  ;;  %v4677_v5 = vld [vmem:[%s10565_s7 + $0x60] sm:$0xff] }
 0xf0f   :  { %7598 = vmatprep.subr.mxu1 %v10651_v35  ;;  %7631 = vmatprep.subr.mxu0 %v10651_v35 }
 0xf10   :  { %7599 = vmatpush3.msra.mxu1 %v10082_v13  ;;  %7632 = vmatpush3.msra.mxu0 %v4677_v5  ;;  %v4676_v13 = vld [vmem:[%s10565_s7 + $0x58] sm:$0xff] }
 0xf11   :  { %7600 = vmatprep.subr.mxu1 %v10651_v35  ;;  %7633 = vmatprep.subr.mxu0 %v10651_v35 }
 0xf12   :  { %7601 = vmatpush3.msra.mxu1 %v10088_v7  ;;  %7634 = vmatpush3.msra.mxu0 %v4676_v13  ;;  %v4675_v7 = vld [vmem:[%s10565_s7 + $0x50] sm:$0xff] }
 0xf13   :  { %7602 = vmatprep.subr.mxu1 %v10651_v35  ;;  %7635 = vmatprep.subr.mxu0 %v10651_v35 }
 0xf14   :  { %7603 = vmatpush3.msra.mxu1 %v10094_v14  ;;  %7636 = vmatpush3.msra.mxu0 %v4675_v7  ;;  %v4674_v14 = vld [vmem:[%s10565_s7 + $0x48] sm:$0xff] }
 0xf15   :  { %7604 = vmatprep.subr.mxu1 %v10651_v35  ;;  %7637 = vmatprep.subr.mxu0 %v10651_v35 }
 0xf16   :  { %7605 = vmatpush3.msra.mxu1 %v10100_v62  ;;  %7638 = vmatpush3.msra.mxu0 %v4674_v14  ;;  %v4673_v62 = vld [vmem:[%s10565_s7 + $0x40] sm:$0xff] }
 0xf17   :  { %7606 = vmatprep.subr.mxu1 %v10651_v35  ;;  %7639 = vmatprep.subr.mxu0 %v10651_v35 }
 0xf18   :  { %7607 = vmatpush3.msra.mxu1 %v10106_v16  ;;  %v4672_v16 = vld [vmem:[%s10565_s7 + $0x38] sm:$0xff]  ;;  %7640 = vmatpush3.msra.mxu0 %v4673_v62 }
 0xf19   :  { %7608 = vmatprep.subr.mxu1 %v10651_v35  ;;  %7641 = vmatprep.subr.mxu0 %v10651_v35 }
 0xf1a   :  { %7609 = vmatpush3.msra.mxu1 %v10112_v17  ;;  %v4671_v17 = vld [vmem:[%s10565_s7 + $0x30] sm:$0xff]  ;;  %7642 = vmatpush3.msra.mxu0 %v4672_v16 }
 0xf1b   :  { %7610 = vmatprep.subr.mxu1 %v10651_v35  ;;  %7643 = vmatprep.subr.mxu0 %v10651_v35 }
 0xf1c   :  { %7611 = vmatpush3.msra.mxu1 %v10118_v56  ;;  %v4670_v56 = vld [vmem:[%s10565_s7 + $0x28] sm:$0xff]  ;;  %7644 = vmatpush3.msra.mxu0 %v4671_v17 }
 0xf1d   :  { %7612 = vmatprep.subr.mxu1 %v10651_v35  ;;  %7645 = vmatprep.subr.mxu0 %v10651_v35 }
 0xf1e   :  { %7613 = vmatpush3.msra.mxu1 %v10124_v43  ;;  %v4669_v43 = vld [vmem:[%s10565_s7 + $0x20] sm:$0xff]  ;;  %7646 = vmatpush3.msra.mxu0 %v4670_v56 }
 0xf1f   :  { %7614 = vmatprep.subr.mxu1 %v10651_v35  ;;  %7647 = vmatprep.subr.mxu0 %v10651_v35 }
 0xf20   :  { %7615 = vmatpush3.msra.mxu1 %v10130_v8  ;;  %v4668_v8 = vld [vmem:[%s10565_s7 + $0x18] sm:$0xff]  ;;  %7648 = vmatpush3.msra.mxu0 %v4669_v43 }
 0xf21   :  { %7616 = vmatprep.subr.mxu1 %v10651_v35  ;;  %7649 = vmatprep.subr.mxu0 %v10651_v35 }
 0xf22   :  { %7617 = vmatpush3.msra.mxu1 %v10136_v36  ;;  %v4667_v36 = vld [vmem:[%s10565_s7 + $0x10] sm:$0xff]  ;;  %7650 = vmatpush3.msra.mxu0 %v4668_v8 }
 0xf23   :  { %7618 = vmatprep.subr.mxu1 %v10651_v35  ;;  %7651 = vmatprep.subr.mxu0 %v10651_v35 }
 0xf24   :  { %7619 = vmatpush3.msra.mxu1 %v10142_v9  ;;  %v4666_v9 = vld [vmem:[%s10565_s7 + $0x8] sm:$0xff]  ;;  %7652 = vmatpush3.msra.mxu0 %v4667_v36 }
 0xf25   :  { %7620 = vmatprep.subr.mxu1 %v10651_v35  ;;  %7653 = vmatprep.subr.mxu0 %v10651_v35 }
 0xf26   :  { %7621 = vmatpush3.msra.mxu1 %v10148_v61  ;;  %v4665_v61 = vld [vmem:[%s10565_s7] sm:$0xff]  ;;  %7654 = vmatpush3.msra.mxu0 %v4666_v9 }
 0xf27   :  { %7623 = vmatmul.mubr.f32.vlgmr.msra.gmra.mxu1 %v10442_v50  ;;  %7655 = vmatprep.subr.mxu0 %v10651_v35 }
 0xf28   :  { %7656 = vmatpush3.msra.mxu0 %v4665_v61 }
 0xfc7   :  { %v4500_v2 = vpop.f32.mrf.mxu1  ;;  %v4570_v48 = vpop.f32.mrf.mxu0 }
 0xfc8   :  { %v4644_v11 = vadd.f32 %v4500_v2, %v2496_v41  ;;  %v4651_v52 = vadd.f32 %v4570_v48, %v2626_v46 }
 0xfc9   :  { %v7554_v23 = vpop.f32.mrf.mxu1  ;;  %v7589_v39 = vpop.f32.mrf.mxu0 }
 0xfca   :  { %v4836_v63 = vmul.f32 -1.442695, %v4644_v11  ;;  %v4837_v58 = vmul.f32 -1.442695, %v4651_v52 }
 0xfcc   :  { %7819 = vpow2.f32 %v4836_v63 }
 0xfcd   :  { %7821 = vpow2.f32 %v4837_v58 }
 0xfd9   :  { %v7820_v33 = vpop.eup %7819 }
 0xfda   :  { %v4648_v27 = vadd.f32 1.0, %v7820_v33  ;;  %v7822_v35 = vpop.eup %7821 }
 0xfdb   :  { %v4655_v6 = vadd.f32 1.0, %v7822_v35 }
 0xfdc   :  { %7823 = vrcp.f32 %v4648_v27 }
 0xfdd   :  { %7825 = vrcp.f32 %v4655_v6 }
 0xfe7   :  { %v4640_v30 = vpop.f32.mrf.mxu1 }
 0xfe8   :  { %v4641_v31 = vadd.f32 %v10209_v19, %v4640_v30 }
 0xfe9   :  { %v7824_v1 = vpop.eup %7823  ;;  %v7624_v37 = vpop.f32.mrf.mxu1 }
 0xfea   :  { %v4658_v3 = vmul.f32 %v7824_v1, %v4641_v31  ;;  %v7826_v32 = vpop.eup %7825 }
 0xfeb   :  { %v4661_v22 = vsub.f32 1.0, %v7826_v32  ;;  %v4663_v29 = vmul.f32 %v7826_v32, %v10442_v50 }
 0xfec   :  { %v4659_v20 = vadd.f32 %v4658_v3, %v10781_v18 }
 0xfee   :  { %7827 = vtanh.f32 %v4659_v20 }
 0xffb   :  { %v7828_v24 = vpop.eup %7827 }
 0xffc   :  { %v4662_v26 = vmul.f32 %v7828_v24, %v4661_v22 }
 0xffe   :  { %v4664_v38 = vadd.f32 %v4663_v29, %v4662_v26 }
0x1000   :  { %7658 = vmatmul.mubr.f32.vlgmr.msra.gmra.mxu0 %v4664_v38 }
0x10c0   :  { %v4754_v19 = vpop.f32.mrf.mxu0 }
0x10c1   :  { %v4755_v49 = vadd.f32 %v4838_v28, %v4754_v19 }
0x10c2   :  { %v7659_v44 = vpop.f32.mrf.mxu0 }
0x10c3   :  { %4759 = vst.msk [vmem:[%s10567_s9] sm:$0xff] %vm4758_vm2, %v4755_v49 }
0x10c4   :  { %4764 = vsyncpa [#allocation4], 1 }
0x10c5   :  { %4765 = vsyncpa [#allocation6], 1 }

</bundles_post_ra>
